<compile_context>
chip_gen: v6e
topology: v6e:2x2x1
jax: 0.10.0
libtpu: 0.0.40
codegen_flags: <defaults>
</compile_context>

<pallas_src>
import functools

import jax
import jax.numpy as jnp
import numpy as np
from jax import lax
from jax.experimental import pallas as pl
from jax.experimental.pallas import tpu as pltpu

NEG_SLOPE = 0.01   # nn.LeakyReLU default
EPS = 1e-5         # nn.InstanceNorm3d default (affine=False, no running stats)


def _leaky(y):
    return jnp.where(y > 0, y, NEG_SLOPE * y)


def _round_up(v, m):
    return (v + m - 1) // m * m


# ------------------------------------------------------------------ kernel bodies

def _conv_taps_matmul(xf, w_bf16, pos, D, H, W):
    """3x3x3 conv (padding=1) of one sample, im2col fused in-kernel.

    xf:  (Cin_p, S) f32, channels-first, spatial flattened (d, h, w) row-major.
    w:   (Cout, 27*Cin_p) bf16, column order (kd, kh, kw, ci).
    pos: (2, S) int32; row 0 = w coordinate, row 1 = h coordinate of each flat position.
    Returns (Cout, S) f32 (no bias).
    """
    Cin_p, S = xf.shape
    HW = H * W
    PAD = HW + W + 1                                   # largest |flat offset| of any tap
    w_pos = pos[0:1, :]
    h_pos = pos[1:2, :]
    zpad = jnp.zeros((Cin_p, PAD), xf.dtype)
    xpad = jnp.concatenate([zpad, xf, zpad], axis=1)   # (Cin_p, S + 2*PAD)

    taps = []
    for dd in (-1, 0, 1):                              # kd: d boundary handled by zero pad
        for dh in (-1, 0, 1):                          # kh
            h_ok = None if dh == 0 else (h_pos >= 1 if dh < 0 else h_pos < H - 1)
            for dw in (-1, 0, 1):                      # kw
                w_ok = None if dw == 0 else (w_pos >= 1 if dw < 0 else w_pos < W - 1)
                off = dd * HW + dh * W + dw
                tap = xpad[:, PAD + off: PAD + off + S]      # static lane shift
                if h_ok is None and w_ok is None:
                    ok = None
                elif h_ok is None:
                    ok = w_ok
                elif w_ok is None:
                    ok = h_ok
                else:
                    ok = h_ok & w_ok
                if ok is not None:
                    tap = jnp.where(ok, tap, 0.0)            # zero-pad taps that cross h/w edges
                taps.append(tap)

    rhs = jnp.concatenate(taps, axis=0).astype(jnp.bfloat16)          # (27*Cin_p, S)
    return jnp.dot(w_bf16, rhs, preferred_element_type=jnp.float32)   # (Cout, S) f32


def _conv1_kernel(pos_ref, x_ref, w_ref, b_ref, o_ref, *, D, H, W):
    # conv1 + bias + LeakyReLU
    xf = x_ref[...].astype(jnp.float32)
    y = _conv_taps_matmul(xf, w_ref[...], pos_ref[...], D, H, W) + b_ref[...]
    o_ref[...] = _leaky(y).astype(o_ref.dtype)


def _conv2_kernel(pos_ref, sel_ref, x_ref, w_ref, b_ref, feat_ref, pool_ref, *, D, H, W):
    # conv2 + bias + LeakyReLU + InstanceNorm3d + MaxPool3d(2), all fused.
    xf = x_ref[...].astype(jnp.float32)
    y = _conv_taps_matmul(xf, w_ref[...], pos_ref[...], D, H, W) + b_ref[...]
    y = _leaky(y)

    # InstanceNorm3d: per (sample, channel) stats over all S spatial positions.
    # The whole sample is resident in this block, so single-pass stats are exact.
    mean = jnp.mean(y, axis=1, keepdims=True)
    var = jnp.mean(jnp.square(y - mean), axis=1, keepdims=True)
    y = (y - mean) * lax.rsqrt(var + EPS)
    feat_ref[...] = y.astype(feat_ref.dtype)

    # MaxPool3d(2): after the three shifted-max steps, column s holds the max of the
    # 2x2x2 window anchored at s; the precomputed 0/1 selection matrix gathers the
    # anchors (even d, h, w) as a tiny matmul - no strided loads or sub-vreg stores.
    HW = H * W
    m = y
    for off in (1, W, HW):
        m = jnp.maximum(m, jnp.concatenate([m[:, off:], m[:, :off]], axis=1))
    pool_ref[...] = jnp.dot(m, sel_ref[...],
                            preferred_element_type=jnp.float32).astype(pool_ref.dtype)


# ------------------------------------------------------------------ pallas_call wrappers

def _conv3x3x3(x2, w_mat, b_col, pos, D, H, W, *, sel=None):
    """x2: (N, Cin_p, S) bf16.  Without `sel`: returns (N, Cout, S) bf16 (conv+LeakyReLU).
    With `sel`: returns (feat (N,Cout,S) f32, pooled (N,Cout,Sp) f32) with norm+pool fused."""
    N, Cin_p, S = x2.shape
    Cout, K = w_mat.shape

    in_specs = [pl.BlockSpec((2, S), lambda n: (0, 0))]            # pos (VMEM-resident)
    args = [pos]
    if sel is not None:
        Sp = sel.shape[1]
        in_specs.append(pl.BlockSpec((S, Sp), lambda n: (0, 0)))   # pool selection matrix
        args.append(sel)
    in_specs += [
        pl.BlockSpec((None, Cin_p, S), lambda n: (n, 0, 0)),       # one sample per grid step
        pl.BlockSpec((Cout, K), lambda n: (0, 0)),                 # weights stay resident
        pl.BlockSpec((Cout, 1), lambda n: (0, 0)),                 # bias
    ]
    args += [x2, w_mat, b_col]

    if sel is None:
        kernel = functools.partial(_conv1_kernel, D=D, H=H, W=W)
        out_shape = jax.ShapeDtypeStruct((N, Cout, S), jnp.bfloat16)
        out_specs = pl.BlockSpec((None, Cout, S), lambda n: (n, 0, 0))
    else:
        kernel = functools.partial(_conv2_kernel, D=D, H=H, W=W)
        out_shape = (jax.ShapeDtypeStruct((N, Cout, S), jnp.float32),
                     jax.ShapeDtypeStruct((N, Cout, Sp), jnp.float32))
        out_specs = (pl.BlockSpec((None, Cout, S), lambda n: (n, 0, 0)),
                     pl.BlockSpec((None, Cout, Sp), lambda n: (n, 0, 0)))

    return pl.pallas_call(
        kernel,
        out_shape=out_shape,
        grid=(N,),
        in_specs=in_specs,
        out_specs=out_specs,
        compiler_params=pltpu.CompilerParams(dimension_semantics=("parallel",)),
    )(*args)


# ------------------------------------------------------------------ host-side glue

def _pos_table(D, H, W):
    s = np.arange(D * H * W, dtype=np.int32)
    return jnp.asarray(np.stack([s % W, (s // W) % H], axis=0))    # (2, S) int32


def _pool_select(D, H, W):
    Dp, Hp, Wp = D // 2, H // 2, W // 2
    S, Sp = D * H * W, Dp * Hp * Wp
    p = np.arange(Sp)
    src = 2 * (p // (Hp * Wp)) * (H * W) + 2 * ((p // Wp) % Hp) * W + 2 * (p % Wp)
    sel = np.zeros((S, Sp), np.float32)
    sel[src, p] = 1.0
    return jnp.asarray(sel)


def _weight_matrix(w, cin_p):
    # torch layout (Cout, Cin, 3, 3, 3) -> (Cout, 27*Cin_p), column order (kd, kh, kw, ci),
    # zero-padding input channels to cin_p so the in-kernel tap concat stays 8-aligned.
    Cout, Cin = w.shape[:2]
    w = jnp.transpose(w, (0, 2, 3, 4, 1))                          # (Cout, 3, 3, 3, Cin)
    if cin_p > Cin:
        w = jnp.pad(w, ((0, 0), (0, 0), (0, 0), (0, 0), (0, cin_p - Cin)))
    return w.reshape(Cout, 27 * cin_p)


def _pad_channels(a, c_p):
    N, C, S = a.shape
    if c_p == C:
        return a
    return jnp.pad(a, ((0, 0), (0, c_p - C), (0, 0)))


def encode_forward(x_ncdhw, params):
    """Forward of Encode. x is NCDHW (PyTorch convention); returns (pooled, feat), both NCDHW."""
    w1, b1, w2, b2 = params                     # torch layouts: (Cout, Cin, 3,3,3), (Cout,)
    N, Cin, D, H, W = x_ncdhw.shape
    Cout = w1.shape[0]
    S = D * H * W
    assert D % 2 == 0 and H % 2 == 0 and W % 2 == 0, "MaxPool3d(2) needs even D/H/W"

    cin_p = _round_up(Cin, 8)
    cout_p = _round_up(Cout, 8)

    pos = _pos_table(D, H, W)
    sel = _pool_select(D, H, W)

    x2 = _pad_channels(x_ncdhw.reshape(N, Cin, S).astype(jnp.float32), cin_p)
    x2 = x2.astype(jnp.bfloat16)
    w1m = _weight_matrix(w1, cin_p).astype(jnp.bfloat16)
    w2m = _weight_matrix(w2, cout_p).astype(jnp.bfloat16)
    b1c = b1.reshape(Cout, 1).astype(jnp.float32)
    b2c = b2.reshape(Cout, 1).astype(jnp.float32)

    # conv1 -> LeakyReLU (bf16 activations between the convs to halve HBM traffic)
    y1 = _conv3x3x3(x2, w1m, b1c, pos, D, H, W)                    # (N, Cout, S) bf16
    y1 = _pad_channels(y1, cout_p)
    # conv2 -> LeakyReLU -> InstanceNorm3d -> MaxPool3d(2), fused in one kernel
    feat, pooled = _conv3x3x3(y1, w2m, b2c, pos, D, H, W, sel=sel)

    return (pooled.reshape(N, Cout, D // 2, H // 2, W // 2),       # NCDHW
            feat.reshape(N, Cout, D, H, W))                        # NCDHW


def init_params(key, cin, cout, k=3):
    k1, k2, k3, k4 = jax.random.split(key, 4)
    fan1, fan2 = cin * k ** 3, cout * k ** 3
    w1 = jax.random.normal(k1, (cout, cin, k, k, k), jnp.float32) / np.sqrt(fan1)
    b1 = jax.random.normal(k2, (cout,), jnp.float32) * 0.01
    w2 = jax.random.normal(k3, (cout, cout, k, k, k), jnp.float32) / np.sqrt(fan2)
    b2 = jax.random.normal(k4, (cout,), jnp.float32) * 0.01
    return w1, b1, w2, b2


# ------------------------------------------------------------------ pure-JAX reference

def reference_forward(x, params):
    w1, b1, w2, b2 = params
    dn = ('NCDHW', 'OIDHW', 'NCDHW')
    y = lax.conv_general_dilated(x, w1, (1, 1, 1), [(1, 1)] * 3, dimension_numbers=dn)
    y = _leaky(y + b1[None, :, None, None, None])
    y = lax.conv_general_dilated(y, w2, (1, 1, 1), [(1, 1)] * 3, dimension_numbers=dn)
    y = _leaky(y + b2[None, :, None, None, None])
    mean = jnp.mean(y, axis=(2, 3, 4), keepdims=True)
    var = jnp.mean((y - mean) ** 2, axis=(2, 3, 4), keepdims=True)
    y = (y - mean) * lax.rsqrt(var + EPS)
    pooled = lax.reduce_window(y, -jnp.inf, lax.max,
                               (1, 1, 2, 2, 2), (1, 1, 2, 2, 2), 'VALID')
    return pooled, y


if __name__ == "__main__":
    key = jax.random.PRNGKey(0)
    kx, kp = jax.random.split(key)
    N, Cin, Cout, D, H, W = 2, 4, 8, 8, 8, 8
    x = jax.random.normal(kx, (N, Cin, D, H, W), jnp.float32)      # NCDHW, like the PyTorch module
    params = init_params(kp, Cin, Cout)

    pooled, feat = jax.jit(encode_forward)(x, params)
    jax.block_until_ready((pooled, feat))

    assert pooled.shape == (N, Cout, D // 2, H // 2, W // 2)
    assert feat.shape == (N, Cout, D, H, W)

    pooled_ref, feat_ref = reference_forward(x, params)
    # bf16 MXU operands (f32 accumulation) -> allow a few 1e-2 of error on the
    # unit-variance (InstanceNorm'd) outputs.
    np.testing.assert_allclose(np.asarray(feat), np.asarray(feat_ref), rtol=5e-2, atol=5e-2)
    np.testing.assert_allclose(np.asarray(pooled), np.asarray(pooled_ref), rtol=5e-2, atol=5e-2)

    print("KERNEL_OK")
</pallas_src>

<mosaic_0001>
module attributes {stable_mosaic.version = 11 : i64} {
  func.func @_conv1_kernel(%arg0: i32, %arg1: memref<2x512xi32, #tpu.memory_space<vmem>>, %arg2: memref<1x8x512xbf16, #tpu.memory_space<vmem>>, %arg3: memref<8x216xbf16, #tpu.memory_space<vmem>>, %arg4: memref<8x1xf32, #tpu.memory_space<vmem>>, %arg5: memref<1x8x512xbf16, #tpu.memory_space<vmem>>) attributes {dimension_semantics = [#tpu.dimension_semantics<parallel>], iteration_bounds = array<i64: 2>, scalar_prefetch = 0 : i64, scratch_operands = 0 : i64, tpu.core_type = #tpu.core_type<tc>, window_params = [{pipeline_mode = #tpu.pipeline_mode<synchronous>, transform_indices = @transform_0, window_bounds = array<i64: 2, 512>}, {transform_indices = @transform_1, window_bounds = array<i64: 1, 8, 512>}, {pipeline_mode = #tpu.pipeline_mode<synchronous>, transform_indices = @transform_2, window_bounds = array<i64: 8, 216>}, {pipeline_mode = #tpu.pipeline_mode<synchronous>, transform_indices = @transform_3, window_bounds = array<i64: 8, 1>}, {transform_indices = @transform_4, window_bounds = array<i64: 1, 8, 512>}]} {
    %c0 = arith.constant 0 : index
    %c0_0 = arith.constant 0 : index
    %c0_1 = arith.constant 0 : index
    %0 = vector.load %arg2[%c0, %c0_0, %c0_1] : memref<1x8x512xbf16, #tpu.memory_space<vmem>>, vector<1x8x512xbf16>
    %1 = vector.shape_cast %0 : vector<1x8x512xbf16> to vector<8x512xbf16>
    %2 = arith.extf %1 : vector<8x512xbf16> to vector<8x512xf32>
    %c0_2 = arith.constant 0 : index
    %c0_3 = arith.constant 0 : index
    %3 = vector.load %arg3[%c0_2, %c0_3] : memref<8x216xbf16, #tpu.memory_space<vmem>>, vector<8x216xbf16>
    %c0_4 = arith.constant 0 : index
    %c0_5 = arith.constant 0 : index
    %4 = vector.load %arg1[%c0_4, %c0_5] : memref<2x512xi32, #tpu.memory_space<vmem>>, vector<2x512xi32>
    %5 = vector.extract_strided_slice %4 {offsets = [0, 0], sizes = [1, 512], strides = [1, 1]} : vector<2x512xi32> to vector<1x512xi32>
    %6 = vector.extract_strided_slice %4 {offsets = [1, 0], sizes = [1, 512], strides = [1, 1]} : vector<2x512xi32> to vector<1x512xi32>
    %cst = arith.constant 0.000000e+00 : f32
    %7 = vector.broadcast %cst : f32 to vector<8x73xf32>
    %8 = tpu.concatenate %7, %2, %7 in 1 : vector<8x73xf32>, vector<8x512xf32>, vector<8x73xf32> -> vector<8x658xf32>
    %c1_i32 = arith.constant 1 : i32
    %9 = vector.broadcast %c1_i32 : i32 to vector<1x512xi32>
    %10 = arith.cmpi sge, %6, %9 : vector<1x512xi32>
    %c1_i32_6 = arith.constant 1 : i32
    %11 = vector.broadcast %c1_i32_6 : i32 to vector<1x512xi32>
    %12 = arith.cmpi sge, %5, %11 : vector<1x512xi32>
    %13 = vector.extract_strided_slice %8 {offsets = [0, 0], sizes = [8, 512], strides = [1, 1]} : vector<8x658xf32> to vector<8x512xf32>
    %14 = arith.andi %10, %12 : vector<1x512xi1>
    %cst_7 = arith.constant 0.000000e+00 : f32
    %15 = vector.shape_cast %14 : vector<1x512xi1> to vector<1x512xi1>
    %16 = vector.broadcast %15 : vector<1x512xi1> to vector<8x512xi1>
    %17 = vector.broadcast %cst_7 : f32 to vector<8x512xf32>
    %18 = arith.select %16, %13, %17 : vector<8x512xi1>, vector<8x512xf32>
    %19 = vector.extract_strided_slice %8 {offsets = [0, 1], sizes = [8, 512], strides = [1, 1]} : vector<8x658xf32> to vector<8x512xf32>
    %cst_8 = arith.constant 0.000000e+00 : f32
    %20 = vector.shape_cast %10 : vector<1x512xi1> to vector<1x512xi1>
    %21 = vector.broadcast %20 : vector<1x512xi1> to vector<8x512xi1>
    %22 = vector.broadcast %cst_8 : f32 to vector<8x512xf32>
    %23 = arith.select %21, %19, %22 : vector<8x512xi1>, vector<8x512xf32>
    %c7_i32 = arith.constant 7 : i32
    %24 = vector.broadcast %c7_i32 : i32 to vector<1x512xi32>
    %25 = arith.cmpi slt, %5, %24 : vector<1x512xi32>
    %26 = vector.extract_strided_slice %8 {offsets = [0, 2], sizes = [8, 512], strides = [1, 1]} : vector<8x658xf32> to vector<8x512xf32>
    %27 = arith.andi %10, %25 : vector<1x512xi1>
    %cst_9 = arith.constant 0.000000e+00 : f32
    %28 = vector.shape_cast %27 : vector<1x512xi1> to vector<1x512xi1>
    %29 = vector.broadcast %28 : vector<1x512xi1> to vector<8x512xi1>
    %30 = vector.broadcast %cst_9 : f32 to vector<8x512xf32>
    %31 = arith.select %29, %26, %30 : vector<8x512xi1>, vector<8x512xf32>
    %c1_i32_10 = arith.constant 1 : i32
    %32 = vector.broadcast %c1_i32_10 : i32 to vector<1x512xi32>
    %33 = arith.cmpi sge, %5, %32 : vector<1x512xi32>
    %34 = vector.extract_strided_slice %8 {offsets = [0, 8], sizes = [8, 512], strides = [1, 1]} : vector<8x658xf32> to vector<8x512xf32>
    %cst_11 = arith.constant 0.000000e+00 : f32
    %35 = vector.shape_cast %33 : vector<1x512xi1> to vector<1x512xi1>
    %36 = vector.broadcast %35 : vector<1x512xi1> to vector<8x512xi1>
    %37 = vector.broadcast %cst_11 : f32 to vector<8x512xf32>
    %38 = arith.select %36, %34, %37 : vector<8x512xi1>, vector<8x512xf32>
    %39 = vector.extract_strided_slice %8 {offsets = [0, 9], sizes = [8, 512], strides = [1, 1]} : vector<8x658xf32> to vector<8x512xf32>
    %c7_i32_12 = arith.constant 7 : i32
    %40 = vector.broadcast %c7_i32_12 : i32 to vector<1x512xi32>
    %41 = arith.cmpi slt, %5, %40 : vector<1x512xi32>
    %42 = vector.extract_strided_slice %8 {offsets = [0, 10], sizes = [8, 512], strides = [1, 1]} : vector<8x658xf32> to vector<8x512xf32>
    %cst_13 = arith.constant 0.000000e+00 : f32
    %43 = vector.shape_cast %41 : vector<1x512xi1> to vector<1x512xi1>
    %44 = vector.broadcast %43 : vector<1x512xi1> to vector<8x512xi1>
    %45 = vector.broadcast %cst_13 : f32 to vector<8x512xf32>
    %46 = arith.select %44, %42, %45 : vector<8x512xi1>, vector<8x512xf32>
    %c7_i32_14 = arith.constant 7 : i32
    %47 = vector.broadcast %c7_i32_14 : i32 to vector<1x512xi32>
    %48 = arith.cmpi slt, %6, %47 : vector<1x512xi32>
    %c1_i32_15 = arith.constant 1 : i32
    %49 = vector.broadcast %c1_i32_15 : i32 to vector<1x512xi32>
    %50 = arith.cmpi sge, %5, %49 : vector<1x512xi32>
    %51 = vector.extract_strided_slice %8 {offsets = [0, 16], sizes = [8, 512], strides = [1, 1]} : vector<8x658xf32> to vector<8x512xf32>
    %52 = arith.andi %48, %50 : vector<1x512xi1>
    %cst_16 = arith.constant 0.000000e+00 : f32
    %53 = vector.shape_cast %52 : vector<1x512xi1> to vector<1x512xi1>
    %54 = vector.broadcast %53 : vector<1x512xi1> to vector<8x512xi1>
    %55 = vector.broadcast %cst_16 : f32 to vector<8x512xf32>
    %56 = arith.select %54, %51, %55 : vector<8x512xi1>, vector<8x512xf32>
    %57 = vector.extract_strided_slice %8 {offsets = [0, 17], sizes = [8, 512], strides = [1, 1]} : vector<8x658xf32> to vector<8x512xf32>
    %cst_17 = arith.constant 0.000000e+00 : f32
    %58 = vector.shape_cast %48 : vector<1x512xi1> to vector<1x512xi1>
    %59 = vector.broadcast %58 : vector<1x512xi1> to vector<8x512xi1>
    %60 = vector.broadcast %cst_17 : f32 to vector<8x512xf32>
    %61 = arith.select %59, %57, %60 : vector<8x512xi1>, vector<8x512xf32>
    %c7_i32_18 = arith.constant 7 : i32
    %62 = vector.broadcast %c7_i32_18 : i32 to vector<1x512xi32>
    %63 = arith.cmpi slt, %5, %62 : vector<1x512xi32>
    %64 = vector.extract_strided_slice %8 {offsets = [0, 18], sizes = [8, 512], strides = [1, 1]} : vector<8x658xf32> to vector<8x512xf32>
    %65 = arith.andi %48, %63 : vector<1x512xi1>
    %cst_19 = arith.constant 0.000000e+00 : f32
    %66 = vector.shape_cast %65 : vector<1x512xi1> to vector<1x512xi1>
    %67 = vector.broadcast %66 : vector<1x512xi1> to vector<8x512xi1>
    %68 = vector.broadcast %cst_19 : f32 to vector<8x512xf32>
    %69 = arith.select %67, %64, %68 : vector<8x512xi1>, vector<8x512xf32>
    %c1_i32_20 = arith.constant 1 : i32
    %70 = vector.broadcast %c1_i32_20 : i32 to vector<1x512xi32>
    %71 = arith.cmpi sge, %6, %70 : vector<1x512xi32>
    %c1_i32_21 = arith.constant 1 : i32
    %72 = vector.broadcast %c1_i32_21 : i32 to vector<1x512xi32>
    %73 = arith.cmpi sge, %5, %72 : vector<1x512xi32>
    %74 = vector.extract_strided_slice %8 {offsets = [0, 64], sizes = [8, 512], strides = [1, 1]} : vector<8x658xf32> to vector<8x512xf32>
    %75 = arith.andi %71, %73 : vector<1x512xi1>
    %cst_22 = arith.constant 0.000000e+00 : f32
    %76 = vector.shape_cast %75 : vector<1x512xi1> to vector<1x512xi1>
    %77 = vector.broadcast %76 : vector<1x512xi1> to vector<8x512xi1>
    %78 = vector.broadcast %cst_22 : f32 to vector<8x512xf32>
    %79 = arith.select %77, %74, %78 : vector<8x512xi1>, vector<8x512xf32>
    %80 = vector.extract_strided_slice %8 {offsets = [0, 65], sizes = [8, 512], strides = [1, 1]} : vector<8x658xf32> to vector<8x512xf32>
    %cst_23 = arith.constant 0.000000e+00 : f32
    %81 = vector.shape_cast %71 : vector<1x512xi1> to vector<1x512xi1>
    %82 = vector.broadcast %81 : vector<1x512xi1> to vector<8x512xi1>
    %83 = vector.broadcast %cst_23 : f32 to vector<8x512xf32>
    %84 = arith.select %82, %80, %83 : vector<8x512xi1>, vector<8x512xf32>
    %c7_i32_24 = arith.constant 7 : i32
    %85 = vector.broadcast %c7_i32_24 : i32 to vector<1x512xi32>
    %86 = arith.cmpi slt, %5, %85 : vector<1x512xi32>
    %87 = vector.extract_strided_slice %8 {offsets = [0, 66], sizes = [8, 512], strides = [1, 1]} : vector<8x658xf32> to vector<8x512xf32>
    %88 = arith.andi %71, %86 : vector<1x512xi1>
    %cst_25 = arith.constant 0.000000e+00 : f32
    %89 = vector.shape_cast %88 : vector<1x512xi1> to vector<1x512xi1>
    %90 = vector.broadcast %89 : vector<1x512xi1> to vector<8x512xi1>
    %91 = vector.broadcast %cst_25 : f32 to vector<8x512xf32>
    %92 = arith.select %90, %87, %91 : vector<8x512xi1>, vector<8x512xf32>
    %c1_i32_26 = arith.constant 1 : i32
    %93 = vector.broadcast %c1_i32_26 : i32 to vector<1x512xi32>
    %94 = arith.cmpi sge, %5, %93 : vector<1x512xi32>
    %95 = vector.extract_strided_slice %8 {offsets = [0, 72], sizes = [8, 512], strides = [1, 1]} : vector<8x658xf32> to vector<8x512xf32>
    %cst_27 = arith.constant 0.000000e+00 : f32
    %96 = vector.shape_cast %94 : vector<1x512xi1> to vector<1x512xi1>
    %97 = vector.broadcast %96 : vector<1x512xi1> to vector<8x512xi1>
    %98 = vector.broadcast %cst_27 : f32 to vector<8x512xf32>
    %99 = arith.select %97, %95, %98 : vector<8x512xi1>, vector<8x512xf32>
    %100 = vector.extract_strided_slice %8 {offsets = [0, 73], sizes = [8, 512], strides = [1, 1]} : vector<8x658xf32> to vector<8x512xf32>
    %c7_i32_28 = arith.constant 7 : i32
    %101 = vector.broadcast %c7_i32_28 : i32 to vector<1x512xi32>
    %102 = arith.cmpi slt, %5, %101 : vector<1x512xi32>
    %103 = vector.extract_strided_slice %8 {offsets = [0, 74], sizes = [8, 512], strides = [1, 1]} : vector<8x658xf32> to vector<8x512xf32>
    %cst_29 = arith.constant 0.000000e+00 : f32
    %104 = vector.shape_cast %102 : vector<1x512xi1> to vector<1x512xi1>
    %105 = vector.broadcast %104 : vector<1x512xi1> to vector<8x512xi1>
    %106 = vector.broadcast %cst_29 : f32 to vector<8x512xf32>
    %107 = arith.select %105, %103, %106 : vector<8x512xi1>, vector<8x512xf32>
    %c7_i32_30 = arith.constant 7 : i32
    %108 = vector.broadcast %c7_i32_30 : i32 to vector<1x512xi32>
    %109 = arith.cmpi slt, %6, %108 : vector<1x512xi32>
    %c1_i32_31 = arith.constant 1 : i32
    %110 = vector.broadcast %c1_i32_31 : i32 to vector<1x512xi32>
    %111 = arith.cmpi sge, %5, %110 : vector<1x512xi32>
    %112 = vector.extract_strided_slice %8 {offsets = [0, 80], sizes = [8, 512], strides = [1, 1]} : vector<8x658xf32> to vector<8x512xf32>
    %113 = arith.andi %109, %111 : vector<1x512xi1>
    %cst_32 = arith.constant 0.000000e+00 : f32
    %114 = vector.shape_cast %113 : vector<1x512xi1> to vector<1x512xi1>
    %115 = vector.broadcast %114 : vector<1x512xi1> to vector<8x512xi1>
    %116 = vector.broadcast %cst_32 : f32 to vector<8x512xf32>
    %117 = arith.select %115, %112, %116 : vector<8x512xi1>, vector<8x512xf32>
    %118 = vector.extract_strided_slice %8 {offsets = [0, 81], sizes = [8, 512], strides = [1, 1]} : vector<8x658xf32> to vector<8x512xf32>
    %cst_33 = arith.constant 0.000000e+00 : f32
    %119 = vector.shape_cast %109 : vector<1x512xi1> to vector<1x512xi1>
    %120 = vector.broadcast %119 : vector<1x512xi1> to vector<8x512xi1>
    %121 = vector.broadcast %cst_33 : f32 to vector<8x512xf32>
    %122 = arith.select %120, %118, %121 : vector<8x512xi1>, vector<8x512xf32>
    %c7_i32_34 = arith.constant 7 : i32
    %123 = vector.broadcast %c7_i32_34 : i32 to vector<1x512xi32>
    %124 = arith.cmpi slt, %5, %123 : vector<1x512xi32>
    %125 = vector.extract_strided_slice %8 {offsets = [0, 82], sizes = [8, 512], strides = [1, 1]} : vector<8x658xf32> to vector<8x512xf32>
    %126 = arith.andi %109, %124 : vector<1x512xi1>
    %cst_35 = arith.constant 0.000000e+00 : f32
    %127 = vector.shape_cast %126 : vector<1x512xi1> to vector<1x512xi1>
    %128 = vector.broadcast %127 : vector<1x512xi1> to vector<8x512xi1>
    %129 = vector.broadcast %cst_35 : f32 to vector<8x512xf32>
    %130 = arith.select %128, %125, %129 : vector<8x512xi1>, vector<8x512xf32>
    %c1_i32_36 = arith.constant 1 : i32
    %131 = vector.broadcast %c1_i32_36 : i32 to vector<1x512xi32>
    %132 = arith.cmpi sge, %6, %131 : vector<1x512xi32>
    %c1_i32_37 = arith.constant 1 : i32
    %133 = vector.broadcast %c1_i32_37 : i32 to vector<1x512xi32>
    %134 = arith.cmpi sge, %5, %133 : vector<1x512xi32>
    %135 = vector.extract_strided_slice %8 {offsets = [0, 128], sizes = [8, 512], strides = [1, 1]} : vector<8x658xf32> to vector<8x512xf32>
    %136 = arith.andi %132, %134 : vector<1x512xi1>
    %cst_38 = arith.constant 0.000000e+00 : f32
    %137 = vector.shape_cast %136 : vector<1x512xi1> to vector<1x512xi1>
    %138 = vector.broadcast %137 : vector<1x512xi1> to vector<8x512xi1>
    %139 = vector.broadcast %cst_38 : f32 to vector<8x512xf32>
    %140 = arith.select %138, %135, %139 : vector<8x512xi1>, vector<8x512xf32>
    %141 = vector.extract_strided_slice %8 {offsets = [0, 129], sizes = [8, 512], strides = [1, 1]} : vector<8x658xf32> to vector<8x512xf32>
    %cst_39 = arith.constant 0.000000e+00 : f32
    %142 = vector.shape_cast %132 : vector<1x512xi1> to vector<1x512xi1>
    %143 = vector.broadcast %142 : vector<1x512xi1> to vector<8x512xi1>
    %144 = vector.broadcast %cst_39 : f32 to vector<8x512xf32>
    %145 = arith.select %143, %141, %144 : vector<8x512xi1>, vector<8x512xf32>
    %c7_i32_40 = arith.constant 7 : i32
    %146 = vector.broadcast %c7_i32_40 : i32 to vector<1x512xi32>
    %147 = arith.cmpi slt, %5, %146 : vector<1x512xi32>
    %148 = vector.extract_strided_slice %8 {offsets = [0, 130], sizes = [8, 512], strides = [1, 1]} : vector<8x658xf32> to vector<8x512xf32>
    %149 = arith.andi %132, %147 : vector<1x512xi1>
    %cst_41 = arith.constant 0.000000e+00 : f32
    %150 = vector.shape_cast %149 : vector<1x512xi1> to vector<1x512xi1>
    %151 = vector.broadcast %150 : vector<1x512xi1> to vector<8x512xi1>
    %152 = vector.broadcast %cst_41 : f32 to vector<8x512xf32>
    %153 = arith.select %151, %148, %152 : vector<8x512xi1>, vector<8x512xf32>
    %c1_i32_42 = arith.constant 1 : i32
    %154 = vector.broadcast %c1_i32_42 : i32 to vector<1x512xi32>
    %155 = arith.cmpi sge, %5, %154 : vector<1x512xi32>
    %156 = vector.extract_strided_slice %8 {offsets = [0, 136], sizes = [8, 512], strides = [1, 1]} : vector<8x658xf32> to vector<8x512xf32>
    %cst_43 = arith.constant 0.000000e+00 : f32
    %157 = vector.shape_cast %155 : vector<1x512xi1> to vector<1x512xi1>
    %158 = vector.broadcast %157 : vector<1x512xi1> to vector<8x512xi1>
    %159 = vector.broadcast %cst_43 : f32 to vector<8x512xf32>
    %160 = arith.select %158, %156, %159 : vector<8x512xi1>, vector<8x512xf32>
    %161 = vector.extract_strided_slice %8 {offsets = [0, 137], sizes = [8, 512], strides = [1, 1]} : vector<8x658xf32> to vector<8x512xf32>
    %c7_i32_44 = arith.constant 7 : i32
    %162 = vector.broadcast %c7_i32_44 : i32 to vector<1x512xi32>
    %163 = arith.cmpi slt, %5, %162 : vector<1x512xi32>
    %164 = vector.extract_strided_slice %8 {offsets = [0, 138], sizes = [8, 512], strides = [1, 1]} : vector<8x658xf32> to vector<8x512xf32>
    %cst_45 = arith.constant 0.000000e+00 : f32
    %165 = vector.shape_cast %163 : vector<1x512xi1> to vector<1x512xi1>
    %166 = vector.broadcast %165 : vector<1x512xi1> to vector<8x512xi1>
    %167 = vector.broadcast %cst_45 : f32 to vector<8x512xf32>
    %168 = arith.select %166, %164, %167 : vector<8x512xi1>, vector<8x512xf32>
    %c7_i32_46 = arith.constant 7 : i32
    %169 = vector.broadcast %c7_i32_46 : i32 to vector<1x512xi32>
    %170 = arith.cmpi slt, %6, %169 : vector<1x512xi32>
    %c1_i32_47 = arith.constant 1 : i32
    %171 = vector.broadcast %c1_i32_47 : i32 to vector<1x512xi32>
    %172 = arith.cmpi sge, %5, %171 : vector<1x512xi32>
    %173 = vector.extract_strided_slice %8 {offsets = [0, 144], sizes = [8, 512], strides = [1, 1]} : vector<8x658xf32> to vector<8x512xf32>
    %174 = arith.andi %170, %172 : vector<1x512xi1>
    %cst_48 = arith.constant 0.000000e+00 : f32
    %175 = vector.shape_cast %174 : vector<1x512xi1> to vector<1x512xi1>
    %176 = vector.broadcast %175 : vector<1x512xi1> to vector<8x512xi1>
    %177 = vector.broadcast %cst_48 : f32 to vector<8x512xf32>
    %178 = arith.select %176, %173, %177 : vector<8x512xi1>, vector<8x512xf32>
    %179 = vector.extract_strided_slice %8 {offsets = [0, 145], sizes = [8, 512], strides = [1, 1]} : vector<8x658xf32> to vector<8x512xf32>
    %cst_49 = arith.constant 0.000000e+00 : f32
    %180 = vector.shape_cast %170 : vector<1x512xi1> to vector<1x512xi1>
    %181 = vector.broadcast %180 : vector<1x512xi1> to vector<8x512xi1>
    %182 = vector.broadcast %cst_49 : f32 to vector<8x512xf32>
    %183 = arith.select %181, %179, %182 : vector<8x512xi1>, vector<8x512xf32>
    %c7_i32_50 = arith.constant 7 : i32
    %184 = vector.broadcast %c7_i32_50 : i32 to vector<1x512xi32>
    %185 = arith.cmpi slt, %5, %184 : vector<1x512xi32>
    %186 = vector.extract_strided_slice %8 {offsets = [0, 146], sizes = [8, 512], strides = [1, 1]} : vector<8x658xf32> to vector<8x512xf32>
    %187 = arith.andi %170, %185 : vector<1x512xi1>
    %cst_51 = arith.constant 0.000000e+00 : f32
    %188 = vector.shape_cast %187 : vector<1x512xi1> to vector<1x512xi1>
    %189 = vector.broadcast %188 : vector<1x512xi1> to vector<8x512xi1>
    %190 = vector.broadcast %cst_51 : f32 to vector<8x512xf32>
    %191 = arith.select %189, %186, %190 : vector<8x512xi1>, vector<8x512xf32>
    %192 = tpu.concatenate %18, %23, %31, %38, %39, %46, %56, %61, %69, %79, %84, %92, %99, %100, %107, %117 in 0 : vector<8x512xf32>, vector<8x512xf32>, vector<8x512xf32>, vector<8x512xf32>, vector<8x512xf32>, vector<8x512xf32>, vector<8x512xf32>, vector<8x512xf32>, vector<8x512xf32>, vector<8x512xf32>, vector<8x512xf32>, vector<8x512xf32>, vector<8x512xf32>, vector<8x512xf32>, vector<8x512xf32>, vector<8x512xf32> -> vector<128x512xf32>
    %193 = tpu.concatenate %122, %130, %140, %145, %153, %160, %161, %168, %178, %183, %191 in 0 : vector<8x512xf32>, vector<8x512xf32>, vector<8x512xf32>, vector<8x512xf32>, vector<8x512xf32>, vector<8x512xf32>, vector<8x512xf32>, vector<8x512xf32>, vector<8x512xf32>, vector<8x512xf32>, vector<8x512xf32> -> vector<88x512xf32>
    %194 = tpu.concatenate %192, %193 in 0 : vector<128x512xf32>, vector<88x512xf32> -> vector<216x512xf32>
    %195 = arith.truncf %194 : vector<216x512xf32> to vector<216x512xbf16>
    %cst_52 = arith.constant dense<0.000000e+00> : vector<8x512xf32>
    %196 = tpu.matmul %3, %195, %cst_52 {dimension_numbers = #tpu.dot_dimension_numbers<[1], [0], [0], [1], [0, 0, 1, 1], [], []>} : vector<8x216xbf16>, vector<216x512xbf16>, vector<8x512xf32> -> vector<8x512xf32>
    %c0_53 = arith.constant 0 : index
    %c0_54 = arith.constant 0 : index
    %197 = vector.load %arg4[%c0_53, %c0_54] : memref<8x1xf32, #tpu.memory_space<vmem>>, vector<8x1xf32>
    %198 = vector.broadcast %197 : vector<8x1xf32> to vector<8x512xf32>
    %199 = arith.addf %196, %198 : vector<8x512xf32>
    %cst_55 = arith.constant 0.000000e+00 : f32
    %200 = vector.broadcast %cst_55 : f32 to vector<8x512xf32>
    %201 = arith.cmpf ogt, %199, %200 : vector<8x512xf32>
    %cst_56 = arith.constant 0.00999999977 : f32
    %202 = vector.broadcast %cst_56 : f32 to vector<8x512xf32>
    %203 = arith.mulf %202, %199 : vector<8x512xf32>
    %204 = arith.select %201, %199, %203 : vector<8x512xi1>, vector<8x512xf32>
    %205 = arith.truncf %204 : vector<8x512xf32> to vector<8x512xbf16>
    %c0_57 = arith.constant 0 : index
    %c0_58 = arith.constant 0 : index
    %c0_59 = arith.constant 0 : index
    %206 = vector.load %arg5[%c0_57, %c0_58, %c0_59] : memref<1x8x512xbf16, #tpu.memory_space<vmem>>, vector<1x8x512xbf16>
    %207 = vector.shape_cast %206 : vector<1x8x512xbf16> to vector<8x512xbf16>
    %208 = vector.shape_cast %205 : vector<8x512xbf16> to vector<1x8x512xbf16>
    tpu.vector_store %arg5[%c0_57, %c0_58, %c0_59], %208 {strides = array<i32>} : memref<1x8x512xbf16, #tpu.memory_space<vmem>>, vector<1x8x512xbf16>,
    return
  }
  func.func @transform_0(%arg0: i32) -> (i32, i32) {
    %c0_i32 = arith.constant 0 : i32
    %c0_i32_0 = arith.constant 0 : i32
    %c0_i32_1 = arith.constant 0 : i32
    return %c0_i32, %c0_i32_0 : i32, i32
  }
  func.func @transform_1(%arg0: i32) -> (i32, i32, i32) {
    %c0_i32 = arith.constant 0 : i32
    %c0_i32_0 = arith.constant 0 : i32
    %c0_i32_1 = arith.constant 0 : i32
    return %arg0, %c0_i32, %c0_i32_0 : i32, i32, i32
  }
  func.func @transform_2(%arg0: i32) -> (i32, i32) {
    %c0_i32 = arith.constant 0 : i32
    %c0_i32_0 = arith.constant 0 : i32
    %c0_i32_1 = arith.constant 0 : i32
    return %c0_i32, %c0_i32_0 : i32, i32
  }
  func.func @transform_3(%arg0: i32) -> (i32, i32) {
    %c0_i32 = arith.constant 0 : i32
    %c0_i32_0 = arith.constant 0 : i32
    %c0_i32_1 = arith.constant 0 : i32
    return %c0_i32, %c0_i32_0 : i32, i32
  }
  func.func @transform_4(%arg0: i32) -> (i32, i32, i32) {
    %c0_i32 = arith.constant 0 : i32
    %c0_i32_0 = arith.constant 0 : i32
    %c0_i32_1 = arith.constant 0 : i32
    return %arg0, %c0_i32, %c0_i32_0 : i32, i32, i32
  }
}

module attributes {stable_mosaic.version = 11 : i64} {
  func.func @_conv2_kernel(%arg0: i32, %arg1: memref<2x512xi32, #tpu.memory_space<vmem>>, %arg2: memref<512x64xf32, #tpu.memory_space<vmem>>, %arg3: memref<1x8x512xbf16, #tpu.memory_space<vmem>>, %arg4: memref<8x216xbf16, #tpu.memory_space<vmem>>, %arg5: memref<8x1xf32, #tpu.memory_space<vmem>>, %arg6: memref<1x8x512xf32, #tpu.memory_space<vmem>>, %arg7: memref<1x8x64xf32, #tpu.memory_space<vmem>>) attributes {dimension_semantics = [#tpu.dimension_semantics<parallel>], iteration_bounds = array<i64: 2>, scalar_prefetch = 0 : i64, scratch_operands = 0 : i64, tpu.core_type = #tpu.core_type<tc>, window_params = [{pipeline_mode = #tpu.pipeline_mode<synchronous>, transform_indices = @transform_0, window_bounds = array<i64: 2, 512>}, {pipeline_mode = #tpu.pipeline_mode<synchronous>, transform_indices = @transform_1, window_bounds = array<i64: 512, 64>}, {transform_indices = @transform_2, window_bounds = array<i64: 1, 8, 512>}, {pipeline_mode = #tpu.pipeline_mode<synchronous>, transform_indices = @transform_3, window_bounds = array<i64: 8, 216>}, {pipeline_mode = #tpu.pipeline_mode<synchronous>, transform_indices = @transform_4, window_bounds = array<i64: 8, 1>}, {transform_indices = @transform_5, window_bounds = array<i64: 1, 8, 512>}, {transform_indices = @transform_6, window_bounds = array<i64: 1, 8, 64>}]} {
    %c0 = arith.constant 0 : index
    %c0_0 = arith.constant 0 : index
    %c0_1 = arith.constant 0 : index
    %0 = vector.load %arg3[%c0, %c0_0, %c0_1] : memref<1x8x512xbf16, #tpu.memory_space<vmem>>, vector<1x8x512xbf16>
    %1 = vector.shape_cast %0 : vector<1x8x512xbf16> to vector<8x512xbf16>
    %2 = arith.extf %1 : vector<8x512xbf16> to vector<8x512xf32>
    %c0_2 = arith.constant 0 : index
    %c0_3 = arith.constant 0 : index
    %3 = vector.load %arg4[%c0_2, %c0_3] : memref<8x216xbf16, #tpu.memory_space<vmem>>, vector<8x216xbf16>
    %c0_4 = arith.constant 0 : index
    %c0_5 = arith.constant 0 : index
    %4 = vector.load %arg1[%c0_4, %c0_5] : memref<2x512xi32, #tpu.memory_space<vmem>>, vector<2x512xi32>
    %5 = vector.extract_strided_slice %4 {offsets = [0, 0], sizes = [1, 512], strides = [1, 1]} : vector<2x512xi32> to vector<1x512xi32>
    %6 = vector.extract_strided_slice %4 {offsets = [1, 0], sizes = [1, 512], strides = [1, 1]} : vector<2x512xi32> to vector<1x512xi32>
    %cst = arith.constant 0.000000e+00 : f32
    %7 = vector.broadcast %cst : f32 to vector<8x73xf32>
    %8 = tpu.concatenate %7, %2, %7 in 1 : vector<8x73xf32>, vector<8x512xf32>, vector<8x73xf32> -> vector<8x658xf32>
    %c1_i32 = arith.constant 1 : i32
    %9 = vector.broadcast %c1_i32 : i32 to vector<1x512xi32>
    %10 = arith.cmpi sge, %6, %9 : vector<1x512xi32>
    %c1_i32_6 = arith.constant 1 : i32
    %11 = vector.broadcast %c1_i32_6 : i32 to vector<1x512xi32>
    %12 = arith.cmpi sge, %5, %11 : vector<1x512xi32>
    %13 = vector.extract_strided_slice %8 {offsets = [0, 0], sizes = [8, 512], strides = [1, 1]} : vector<8x658xf32> to vector<8x512xf32>
    %14 = arith.andi %10, %12 : vector<1x512xi1>
    %cst_7 = arith.constant 0.000000e+00 : f32
    %15 = vector.shape_cast %14 : vector<1x512xi1> to vector<1x512xi1>
    %16 = vector.broadcast %15 : vector<1x512xi1> to vector<8x512xi1>
    %17 = vector.broadcast %cst_7 : f32 to vector<8x512xf32>
    %18 = arith.select %16, %13, %17 : vector<8x512xi1>, vector<8x512xf32>
    %19 = vector.extract_strided_slice %8 {offsets = [0, 1], sizes = [8, 512], strides = [1, 1]} : vector<8x658xf32> to vector<8x512xf32>
    %cst_8 = arith.constant 0.000000e+00 : f32
    %20 = vector.shape_cast %10 : vector<1x512xi1> to vector<1x512xi1>
    %21 = vector.broadcast %20 : vector<1x512xi1> to vector<8x512xi1>
    %22 = vector.broadcast %cst_8 : f32 to vector<8x512xf32>
    %23 = arith.select %21, %19, %22 : vector<8x512xi1>, vector<8x512xf32>
    %c7_i32 = arith.constant 7 : i32
    %24 = vector.broadcast %c7_i32 : i32 to vector<1x512xi32>
    %25 = arith.cmpi slt, %5, %24 : vector<1x512xi32>
    %26 = vector.extract_strided_slice %8 {offsets = [0, 2], sizes = [8, 512], strides = [1, 1]} : vector<8x658xf32> to vector<8x512xf32>
    %27 = arith.andi %10, %25 : vector<1x512xi1>
    %cst_9 = arith.constant 0.000000e+00 : f32
    %28 = vector.shape_cast %27 : vector<1x512xi1> to vector<1x512xi1>
    %29 = vector.broadcast %28 : vector<1x512xi1> to vector<8x512xi1>
    %30 = vector.broadcast %cst_9 : f32 to vector<8x512xf32>
    %31 = arith.select %29, %26, %30 : vector<8x512xi1>, vector<8x512xf32>
    %c1_i32_10 = arith.constant 1 : i32
    %32 = vector.broadcast %c1_i32_10 : i32 to vector<1x512xi32>
    %33 = arith.cmpi sge, %5, %32 : vector<1x512xi32>
    %34 = vector.extract_strided_slice %8 {offsets = [0, 8], sizes = [8, 512], strides = [1, 1]} : vector<8x658xf32> to vector<8x512xf32>
    %cst_11 = arith.constant 0.000000e+00 : f32
    %35 = vector.shape_cast %33 : vector<1x512xi1> to vector<1x512xi1>
    %36 = vector.broadcast %35 : vector<1x512xi1> to vector<8x512xi1>
    %37 = vector.broadcast %cst_11 : f32 to vector<8x512xf32>
    %38 = arith.select %36, %34, %37 : vector<8x512xi1>, vector<8x512xf32>
    %39 = vector.extract_strided_slice %8 {offsets = [0, 9], sizes = [8, 512], strides = [1, 1]} : vector<8x658xf32> to vector<8x512xf32>
    %c7_i32_12 = arith.constant 7 : i32
    %40 = vector.broadcast %c7_i32_12 : i32 to vector<1x512xi32>
    %41 = arith.cmpi slt, %5, %40 : vector<1x512xi32>
    %42 = vector.extract_strided_slice %8 {offsets = [0, 10], sizes = [8, 512], strides = [1, 1]} : vector<8x658xf32> to vector<8x512xf32>
    %cst_13 = arith.constant 0.000000e+00 : f32
    %43 = vector.shape_cast %41 : vector<1x512xi1> to vector<1x512xi1>
    %44 = vector.broadcast %43 : vector<1x512xi1> to vector<8x512xi1>
    %45 = vector.broadcast %cst_13 : f32 to vector<8x512xf32>
    %46 = arith.select %44, %42, %45 : vector<8x512xi1>, vector<8x512xf32>
    %c7_i32_14 = arith.constant 7 : i32
    %47 = vector.broadcast %c7_i32_14 : i32 to vector<1x512xi32>
    %48 = arith.cmpi slt, %6, %47 : vector<1x512xi32>
    %c1_i32_15 = arith.constant 1 : i32
    %49 = vector.broadcast %c1_i32_15 : i32 to vector<1x512xi32>
    %50 = arith.cmpi sge, %5, %49 : vector<1x512xi32>
    %51 = vector.extract_strided_slice %8 {offsets = [0, 16], sizes = [8, 512], strides = [1, 1]} : vector<8x658xf32> to vector<8x512xf32>
    %52 = arith.andi %48, %50 : vector<1x512xi1>
    %cst_16 = arith.constant 0.000000e+00 : f32
    %53 = vector.shape_cast %52 : vector<1x512xi1> to vector<1x512xi1>
    %54 = vector.broadcast %53 : vector<1x512xi1> to vector<8x512xi1>
    %55 = vector.broadcast %cst_16 : f32 to vector<8x512xf32>
    %56 = arith.select %54, %51, %55 : vector<8x512xi1>, vector<8x512xf32>
    %57 = vector.extract_strided_slice %8 {offsets = [0, 17], sizes = [8, 512], strides = [1, 1]} : vector<8x658xf32> to vector<8x512xf32>
    %cst_17 = arith.constant 0.000000e+00 : f32
    %58 = vector.shape_cast %48 : vector<1x512xi1> to vector<1x512xi1>
    %59 = vector.broadcast %58 : vector<1x512xi1> to vector<8x512xi1>
    %60 = vector.broadcast %cst_17 : f32 to vector<8x512xf32>
    %61 = arith.select %59, %57, %60 : vector<8x512xi1>, vector<8x512xf32>
    %c7_i32_18 = arith.constant 7 : i32
    %62 = vector.broadcast %c7_i32_18 : i32 to vector<1x512xi32>
    %63 = arith.cmpi slt, %5, %62 : vector<1x512xi32>
    %64 = vector.extract_strided_slice %8 {offsets = [0, 18], sizes = [8, 512], strides = [1, 1]} : vector<8x658xf32> to vector<8x512xf32>
    %65 = arith.andi %48, %63 : vector<1x512xi1>
    %cst_19 = arith.constant 0.000000e+00 : f32
    %66 = vector.shape_cast %65 : vector<1x512xi1> to vector<1x512xi1>
    %67 = vector.broadcast %66 : vector<1x512xi1> to vector<8x512xi1>
    %68 = vector.broadcast %cst_19 : f32 to vector<8x512xf32>
    %69 = arith.select %67, %64, %68 : vector<8x512xi1>, vector<8x512xf32>
    %c1_i32_20 = arith.constant 1 : i32
    %70 = vector.broadcast %c1_i32_20 : i32 to vector<1x512xi32>
    %71 = arith.cmpi sge, %6, %70 : vector<1x512xi32>
    %c1_i32_21 = arith.constant 1 : i32
    %72 = vector.broadcast %c1_i32_21 : i32 to vector<1x512xi32>
    %73 = arith.cmpi sge, %5, %72 : vector<1x512xi32>
    %74 = vector.extract_strided_slice %8 {offsets = [0, 64], sizes = [8, 512], strides = [1, 1]} : vector<8x658xf32> to vector<8x512xf32>
    %75 = arith.andi %71, %73 : vector<1x512xi1>
    %cst_22 = arith.constant 0.000000e+00 : f32
    %76 = vector.shape_cast %75 : vector<1x512xi1> to vector<1x512xi1>
    %77 = vector.broadcast %76 : vector<1x512xi1> to vector<8x512xi1>
    %78 = vector.broadcast %cst_22 : f32 to vector<8x512xf32>
    %79 = arith.select %77, %74, %78 : vector<8x512xi1>, vector<8x512xf32>
    %80 = vector.extract_strided_slice %8 {offsets = [0, 65], sizes = [8, 512], strides = [1, 1]} : vector<8x658xf32> to vector<8x512xf32>
    %cst_23 = arith.constant 0.000000e+00 : f32
    %81 = vector.shape_cast %71 : vector<1x512xi1> to vector<1x512xi1>
    %82 = vector.broadcast %81 : vector<1x512xi1> to vector<8x512xi1>
    %83 = vector.broadcast %cst_23 : f32 to vector<8x512xf32>
    %84 = arith.select %82, %80, %83 : vector<8x512xi1>, vector<8x512xf32>
    %c7_i32_24 = arith.constant 7 : i32
    %85 = vector.broadcast %c7_i32_24 : i32 to vector<1x512xi32>
    %86 = arith.cmpi slt, %5, %85 : vector<1x512xi32>
    %87 = vector.extract_strided_slice %8 {offsets = [0, 66], sizes = [8, 512], strides = [1, 1]} : vector<8x658xf32> to vector<8x512xf32>
    %88 = arith.andi %71, %86 : vector<1x512xi1>
    %cst_25 = arith.constant 0.000000e+00 : f32
    %89 = vector.shape_cast %88 : vector<1x512xi1> to vector<1x512xi1>
    %90 = vector.broadcast %89 : vector<1x512xi1> to vector<8x512xi1>
    %91 = vector.broadcast %cst_25 : f32 to vector<8x512xf32>
    %92 = arith.select %90, %87, %91 : vector<8x512xi1>, vector<8x512xf32>
    %c1_i32_26 = arith.constant 1 : i32
    %93 = vector.broadcast %c1_i32_26 : i32 to vector<1x512xi32>
    %94 = arith.cmpi sge, %5, %93 : vector<1x512xi32>
    %95 = vector.extract_strided_slice %8 {offsets = [0, 72], sizes = [8, 512], strides = [1, 1]} : vector<8x658xf32> to vector<8x512xf32>
    %cst_27 = arith.constant 0.000000e+00 : f32
    %96 = vector.shape_cast %94 : vector<1x512xi1> to vector<1x512xi1>
    %97 = vector.broadcast %96 : vector<1x512xi1> to vector<8x512xi1>
    %98 = vector.broadcast %cst_27 : f32 to vector<8x512xf32>
    %99 = arith.select %97, %95, %98 : vector<8x512xi1>, vector<8x512xf32>
    %100 = vector.extract_strided_slice %8 {offsets = [0, 73], sizes = [8, 512], strides = [1, 1]} : vector<8x658xf32> to vector<8x512xf32>
    %c7_i32_28 = arith.constant 7 : i32
    %101 = vector.broadcast %c7_i32_28 : i32 to vector<1x512xi32>
    %102 = arith.cmpi slt, %5, %101 : vector<1x512xi32>
    %103 = vector.extract_strided_slice %8 {offsets = [0, 74], sizes = [8, 512], strides = [1, 1]} : vector<8x658xf32> to vector<8x512xf32>
    %cst_29 = arith.constant 0.000000e+00 : f32
    %104 = vector.shape_cast %102 : vector<1x512xi1> to vector<1x512xi1>
    %105 = vector.broadcast %104 : vector<1x512xi1> to vector<8x512xi1>
    %106 = vector.broadcast %cst_29 : f32 to vector<8x512xf32>
    %107 = arith.select %105, %103, %106 : vector<8x512xi1>, vector<8x512xf32>
    %c7_i32_30 = arith.constant 7 : i32
    %108 = vector.broadcast %c7_i32_30 : i32 to vector<1x512xi32>
    %109 = arith.cmpi slt, %6, %108 : vector<1x512xi32>
    %c1_i32_31 = arith.constant 1 : i32
    %110 = vector.broadcast %c1_i32_31 : i32 to vector<1x512xi32>
    %111 = arith.cmpi sge, %5, %110 : vector<1x512xi32>
    %112 = vector.extract_strided_slice %8 {offsets = [0, 80], sizes = [8, 512], strides = [1, 1]} : vector<8x658xf32> to vector<8x512xf32>
    %113 = arith.andi %109, %111 : vector<1x512xi1>
    %cst_32 = arith.constant 0.000000e+00 : f32
    %114 = vector.shape_cast %113 : vector<1x512xi1> to vector<1x512xi1>
    %115 = vector.broadcast %114 : vector<1x512xi1> to vector<8x512xi1>
    %116 = vector.broadcast %cst_32 : f32 to vector<8x512xf32>
    %117 = arith.select %115, %112, %116 : vector<8x512xi1>, vector<8x512xf32>
    %118 = vector.extract_strided_slice %8 {offsets = [0, 81], sizes = [8, 512], strides = [1, 1]} : vector<8x658xf32> to vector<8x512xf32>
    %cst_33 = arith.constant 0.000000e+00 : f32
    %119 = vector.shape_cast %109 : vector<1x512xi1> to vector<1x512xi1>
    %120 = vector.broadcast %119 : vector<1x512xi1> to vector<8x512xi1>
    %121 = vector.broadcast %cst_33 : f32 to vector<8x512xf32>
    %122 = arith.select %120, %118, %121 : vector<8x512xi1>, vector<8x512xf32>
    %c7_i32_34 = arith.constant 7 : i32
    %123 = vector.broadcast %c7_i32_34 : i32 to vector<1x512xi32>
    %124 = arith.cmpi slt, %5, %123 : vector<1x512xi32>
    %125 = vector.extract_strided_slice %8 {offsets = [0, 82], sizes = [8, 512], strides = [1, 1]} : vector<8x658xf32> to vector<8x512xf32>
    %126 = arith.andi %109, %124 : vector<1x512xi1>
    %cst_35 = arith.constant 0.000000e+00 : f32
    %127 = vector.shape_cast %126 : vector<1x512xi1> to vector<1x512xi1>
    %128 = vector.broadcast %127 : vector<1x512xi1> to vector<8x512xi1>
    %129 = vector.broadcast %cst_35 : f32 to vector<8x512xf32>
    %130 = arith.select %128, %125, %129 : vector<8x512xi1>, vector<8x512xf32>
    %c1_i32_36 = arith.constant 1 : i32
    %131 = vector.broadcast %c1_i32_36 : i32 to vector<1x512xi32>
    %132 = arith.cmpi sge, %6, %131 : vector<1x512xi32>
    %c1_i32_37 = arith.constant 1 : i32
    %133 = vector.broadcast %c1_i32_37 : i32 to vector<1x512xi32>
    %134 = arith.cmpi sge, %5, %133 : vector<1x512xi32>
    %135 = vector.extract_strided_slice %8 {offsets = [0, 128], sizes = [8, 512], strides = [1, 1]} : vector<8x658xf32> to vector<8x512xf32>
    %136 = arith.andi %132, %134 : vector<1x512xi1>
    %cst_38 = arith.constant 0.000000e+00 : f32
    %137 = vector.shape_cast %136 : vector<1x512xi1> to vector<1x512xi1>
    %138 = vector.broadcast %137 : vector<1x512xi1> to vector<8x512xi1>
    %139 = vector.broadcast %cst_38 : f32 to vector<8x512xf32>
    %140 = arith.select %138, %135, %139 : vector<8x512xi1>, vector<8x512xf32>
    %141 = vector.extract_strided_slice %8 {offsets = [0, 129], sizes = [8, 512], strides = [1, 1]} : vector<8x658xf32> to vector<8x512xf32>
    %cst_39 = arith.constant 0.000000e+00 : f32
    %142 = vector.shape_cast %132 : vector<1x512xi1> to vector<1x512xi1>
    %143 = vector.broadcast %142 : vector<1x512xi1> to vector<8x512xi1>
    %144 = vector.broadcast %cst_39 : f32 to vector<8x512xf32>
    %145 = arith.select %143, %141, %144 : vector<8x512xi1>, vector<8x512xf32>
    %c7_i32_40 = arith.constant 7 : i32
    %146 = vector.broadcast %c7_i32_40 : i32 to vector<1x512xi32>
    %147 = arith.cmpi slt, %5, %146 : vector<1x512xi32>
    %148 = vector.extract_strided_slice %8 {offsets = [0, 130], sizes = [8, 512], strides = [1, 1]} : vector<8x658xf32> to vector<8x512xf32>
    %149 = arith.andi %132, %147 : vector<1x512xi1>
    %cst_41 = arith.constant 0.000000e+00 : f32
    %150 = vector.shape_cast %149 : vector<1x512xi1> to vector<1x512xi1>
    %151 = vector.broadcast %150 : vector<1x512xi1> to vector<8x512xi1>
    %152 = vector.broadcast %cst_41 : f32 to vector<8x512xf32>
    %153 = arith.select %151, %148, %152 : vector<8x512xi1>, vector<8x512xf32>
    %c1_i32_42 = arith.constant 1 : i32
    %154 = vector.broadcast %c1_i32_42 : i32 to vector<1x512xi32>
    %155 = arith.cmpi sge, %5, %154 : vector<1x512xi32>
    %156 = vector.extract_strided_slice %8 {offsets = [0, 136], sizes = [8, 512], strides = [1, 1]} : vector<8x658xf32> to vector<8x512xf32>
    %cst_43 = arith.constant 0.000000e+00 : f32
    %157 = vector.shape_cast %155 : vector<1x512xi1> to vector<1x512xi1>
    %158 = vector.broadcast %157 : vector<1x512xi1> to vector<8x512xi1>
    %159 = vector.broadcast %cst_43 : f32 to vector<8x512xf32>
    %160 = arith.select %158, %156, %159 : vector<8x512xi1>, vector<8x512xf32>
    %161 = vector.extract_strided_slice %8 {offsets = [0, 137], sizes = [8, 512], strides = [1, 1]} : vector<8x658xf32> to vector<8x512xf32>
    %c7_i32_44 = arith.constant 7 : i32
    %162 = vector.broadcast %c7_i32_44 : i32 to vector<1x512xi32>
    %163 = arith.cmpi slt, %5, %162 : vector<1x512xi32>
    %164 = vector.extract_strided_slice %8 {offsets = [0, 138], sizes = [8, 512], strides = [1, 1]} : vector<8x658xf32> to vector<8x512xf32>
    %cst_45 = arith.constant 0.000000e+00 : f32
    %165 = vector.shape_cast %163 : vector<1x512xi1> to vector<1x512xi1>
    %166 = vector.broadcast %165 : vector<1x512xi1> to vector<8x512xi1>
    %167 = vector.broadcast %cst_45 : f32 to vector<8x512xf32>
    %168 = arith.select %166, %164, %167 : vector<8x512xi1>, vector<8x512xf32>
    %c7_i32_46 = arith.constant 7 : i32
    %169 = vector.broadcast %c7_i32_46 : i32 to vector<1x512xi32>
    %170 = arith.cmpi slt, %6, %169 : vector<1x512xi32>
    %c1_i32_47 = arith.constant 1 : i32
    %171 = vector.broadcast %c1_i32_47 : i32 to vector<1x512xi32>
    %172 = arith.cmpi sge, %5, %171 : vector<1x512xi32>
    %173 = vector.extract_strided_slice %8 {offsets = [0, 144], sizes = [8, 512], strides = [1, 1]} : vector<8x658xf32> to vector<8x512xf32>
    %174 = arith.andi %170, %172 : vector<1x512xi1>
    %cst_48 = arith.constant 0.000000e+00 : f32
    %175 = vector.shape_cast %174 : vector<1x512xi1> to vector<1x512xi1>
    %176 = vector.broadcast %175 : vector<1x512xi1> to vector<8x512xi1>
    %177 = vector.broadcast %cst_48 : f32 to vector<8x512xf32>
    %178 = arith.select %176, %173, %177 : vector<8x512xi1>, vector<8x512xf32>
    %179 = vector.extract_strided_slice %8 {offsets = [0, 145], sizes = [8, 512], strides = [1, 1]} : vector<8x658xf32> to vector<8x512xf32>
    %cst_49 = arith.constant 0.000000e+00 : f32
    %180 = vector.shape_cast %170 : vector<1x512xi1> to vector<1x512xi1>
    %181 = vector.broadcast %180 : vector<1x512xi1> to vector<8x512xi1>
    %182 = vector.broadcast %cst_49 : f32 to vector<8x512xf32>
    %183 = arith.select %181, %179, %182 : vector<8x512xi1>, vector<8x512xf32>
    %c7_i32_50 = arith.constant 7 : i32
    %184 = vector.broadcast %c7_i32_50 : i32 to vector<1x512xi32>
    %185 = arith.cmpi slt, %5, %184 : vector<1x512xi32>
    %186 = vector.extract_strided_slice %8 {offsets = [0, 146], sizes = [8, 512], strides = [1, 1]} : vector<8x658xf32> to vector<8x512xf32>
    %187 = arith.andi %170, %185 : vector<1x512xi1>
    %cst_51 = arith.constant 0.000000e+00 : f32
    %188 = vector.shape_cast %187 : vector<1x512xi1> to vector<1x512xi1>
    %189 = vector.broadcast %188 : vector<1x512xi1> to vector<8x512xi1>
    %190 = vector.broadcast %cst_51 : f32 to vector<8x512xf32>
    %191 = arith.select %189, %186, %190 : vector<8x512xi1>, vector<8x512xf32>
    %192 = tpu.concatenate %18, %23, %31, %38, %39, %46, %56, %61, %69, %79, %84, %92, %99, %100, %107, %117 in 0 : vector<8x512xf32>, vector<8x512xf32>, vector<8x512xf32>, vector<8x512xf32>, vector<8x512xf32>, vector<8x512xf32>, vector<8x512xf32>, vector<8x512xf32>, vector<8x512xf32>, vector<8x512xf32>, vector<8x512xf32>, vector<8x512xf32>, vector<8x512xf32>, vector<8x512xf32>, vector<8x512xf32>, vector<8x512xf32> -> vector<128x512xf32>
    %193 = tpu.concatenate %122, %130, %140, %145, %153, %160, %161, %168, %178, %183, %191 in 0 : vector<8x512xf32>, vector<8x512xf32>, vector<8x512xf32>, vector<8x512xf32>, vector<8x512xf32>, vector<8x512xf32>, vector<8x512xf32>, vector<8x512xf32>, vector<8x512xf32>, vector<8x512xf32>, vector<8x512xf32> -> vector<88x512xf32>
    %194 = tpu.concatenate %192, %193 in 0 : vector<128x512xf32>, vector<88x512xf32> -> vector<216x512xf32>
    %195 = arith.truncf %194 : vector<216x512xf32> to vector<216x512xbf16>
    %cst_52 = arith.constant dense<0.000000e+00> : vector<8x512xf32>
    %196 = tpu.matmul %3, %195, %cst_52 {dimension_numbers = #tpu.dot_dimension_numbers<[1], [0], [0], [1], [0, 0, 1, 1], [], []>} : vector<8x216xbf16>, vector<216x512xbf16>, vector<8x512xf32> -> vector<8x512xf32>
    %c0_53 = arith.constant 0 : index
    %c0_54 = arith.constant 0 : index
    %197 = vector.load %arg5[%c0_53, %c0_54] : memref<8x1xf32, #tpu.memory_space<vmem>>, vector<8x1xf32>
    %198 = vector.broadcast %197 : vector<8x1xf32> to vector<8x512xf32>
    %199 = arith.addf %196, %198 : vector<8x512xf32>
    %cst_55 = arith.constant 0.000000e+00 : f32
    %200 = vector.broadcast %cst_55 : f32 to vector<8x512xf32>
    %201 = arith.cmpf ogt, %199, %200 : vector<8x512xf32>
    %cst_56 = arith.constant 0.00999999977 : f32
    %202 = vector.broadcast %cst_56 : f32 to vector<8x512xf32>
    %203 = arith.mulf %202, %199 : vector<8x512xf32>
    %204 = arith.select %201, %199, %203 : vector<8x512xi1>, vector<8x512xf32>
    %cst_57 = arith.constant dense<0.000000e+00> : vector<8xf32>
    %205 = vector.multi_reduction <add>, %204, %cst_57 [1] : vector<8x512xf32> to vector<8xf32>
    %206 = vector.shape_cast %205 : vector<8xf32> to vector<8x1xf32>
    %cst_58 = arith.constant 5.120000e+02 : f32
    %207 = vector.broadcast %cst_58 : f32 to vector<8x1xf32>
    %208 = arith.divf %206, %207 : vector<8x1xf32>
    %209 = vector.broadcast %208 : vector<8x1xf32> to vector<8x512xf32>
    %210 = arith.subf %204, %209 : vector<8x512xf32>
    %211 = arith.mulf %210, %210 : vector<8x512xf32>
    %cst_59 = arith.constant dense<0.000000e+00> : vector<8xf32>
    %212 = vector.multi_reduction <add>, %211, %cst_59 [1] : vector<8x512xf32> to vector<8xf32>
    %213 = vector.shape_cast %212 : vector<8xf32> to vector<8x1xf32>
    %cst_60 = arith.constant 5.120000e+02 : f32
    %214 = vector.broadcast %cst_60 : f32 to vector<8x1xf32>
    %215 = arith.divf %213, %214 : vector<8x1xf32>
    %216 = vector.broadcast %208 : vector<8x1xf32> to vector<8x512xf32>
    %217 = arith.subf %204, %216 : vector<8x512xf32>
    %cst_61 = arith.constant 9.99999974E-6 : f32
    %218 = vector.broadcast %cst_61 : f32 to vector<8x1xf32>
    %219 = arith.addf %215, %218 : vector<8x1xf32>
    %220 = math.rsqrt %219 : vector<8x1xf32>
    %221 = vector.broadcast %220 : vector<8x1xf32> to vector<8x512xf32>
    %222 = arith.mulf %217, %221 : vector<8x512xf32>
    %c0_62 = arith.constant 0 : index
    %c0_63 = arith.constant 0 : index
    %c0_64 = arith.constant 0 : index
    %223 = vector.load %arg6[%c0_62, %c0_63, %c0_64] : memref<1x8x512xf32, #tpu.memory_space<vmem>>, vector<1x8x512xf32>
    %224 = vector.shape_cast %223 : vector<1x8x512xf32> to vector<8x512xf32>
    %225 = vector.shape_cast %222 : vector<8x512xf32> to vector<1x8x512xf32>
    tpu.vector_store %arg6[%c0_62, %c0_63, %c0_64], %225 {strides = array<i32>} : memref<1x8x512xf32, #tpu.memory_space<vmem>>, vector<1x8x512xf32>,
    %226 = vector.extract_strided_slice %222 {offsets = [0, 1], sizes = [8, 511], strides = [1, 1]} : vector<8x512xf32> to vector<8x511xf32>
    %227 = vector.extract_strided_slice %222 {offsets = [0, 0], sizes = [8, 1], strides = [1, 1]} : vector<8x512xf32> to vector<8x1xf32>
    %228 = tpu.concatenate %226, %227 in 1 : vector<8x511xf32>, vector<8x1xf32> -> vector<8x512xf32>
    %229 = arith.maximumf %222, %228 : vector<8x512xf32>
    %230 = vector.extract_strided_slice %229 {offsets = [0, 8], sizes = [8, 504], strides = [1, 1]} : vector<8x512xf32> to vector<8x504xf32>
    %231 = vector.extract_strided_slice %229 {offsets = [0, 0], sizes = [8, 8], strides = [1, 1]} : vector<8x512xf32> to vector<8x8xf32>
    %232 = tpu.concatenate %230, %231 in 1 : vector<8x504xf32>, vector<8x8xf32> -> vector<8x512xf32>
    %233 = arith.maximumf %229, %232 : vector<8x512xf32>
    %234 = vector.extract_strided_slice %233 {offsets = [0, 64], sizes = [8, 448], strides = [1, 1]} : vector<8x512xf32> to vector<8x448xf32>
    %235 = vector.extract_strided_slice %233 {offsets = [0, 0], sizes = [8, 64], strides = [1, 1]} : vector<8x512xf32> to vector<8x64xf32>
    %236 = tpu.concatenate %234, %235 in 1 : vector<8x448xf32>, vector<8x64xf32> -> vector<8x512xf32>
    %237 = arith.maximumf %233, %236 : vector<8x512xf32>
    %c0_65 = arith.constant 0 : index
    %c0_66 = arith.constant 0 : index
    %238 = vector.load %arg2[%c0_65, %c0_66] : memref<512x64xf32, #tpu.memory_space<vmem>>, vector<512x64xf32>
    %cst_67 = arith.constant dense<0.000000e+00> : vector<8x64xf32>
    %239 = tpu.matmul %237, %238, %cst_67 {dimension_numbers = #tpu.dot_dimension_numbers<[1], [0], [0], [1], [0, 0, 1, 1], [], []>} : vector<8x512xf32>, vector<512x64xf32>, vector<8x64xf32> -> vector<8x64xf32>
    %c0_68 = arith.constant 0 : index
    %c0_69 = arith.constant 0 : index
    %c0_70 = arith.constant 0 : index
    %240 = vector.load %arg7[%c0_68, %c0_69, %c0_70] : memref<1x8x64xf32, #tpu.memory_space<vmem>>, vector<1x8x64xf32>
    %241 = vector.shape_cast %240 : vector<1x8x64xf32> to vector<8x64xf32>
    %242 = vector.shape_cast %239 : vector<8x64xf32> to vector<1x8x64xf32>
    tpu.vector_store %arg7[%c0_68, %c0_69, %c0_70], %242 {strides = array<i32>} : memref<1x8x64xf32, #tpu.memory_space<vmem>>, vector<1x8x64xf32>,
    return
  }
  func.func @transform_0(%arg0: i32) -> (i32, i32) {
    %c0_i32 = arith.constant 0 : i32
    %c0_i32_0 = arith.constant 0 : i32
    %c0_i32_1 = arith.constant 0 : i32
    return %c0_i32, %c0_i32_0 : i32, i32
  }
  func.func @transform_1(%arg0: i32) -> (i32, i32) {
    %c0_i32 = arith.constant 0 : i32
    %c0_i32_0 = arith.constant 0 : i32
    %c0_i32_1 = arith.constant 0 : i32
    return %c0_i32, %c0_i32_0 : i32, i32
  }
  func.func @transform_2(%arg0: i32) -> (i32, i32, i32) {
    %c0_i32 = arith.constant 0 : i32
    %c0_i32_0 = arith.constant 0 : i32
    %c0_i32_1 = arith.constant 0 : i32
    return %arg0, %c0_i32, %c0_i32_0 : i32, i32, i32
  }
  func.func @transform_3(%arg0: i32) -> (i32, i32) {
    %c0_i32 = arith.constant 0 : i32
    %c0_i32_0 = arith.constant 0 : i32
    %c0_i32_1 = arith.constant 0 : i32
    return %c0_i32, %c0_i32_0 : i32, i32
  }
  func.func @transform_4(%arg0: i32) -> (i32, i32) {
    %c0_i32 = arith.constant 0 : i32
    %c0_i32_0 = arith.constant 0 : i32
    %c0_i32_1 = arith.constant 0 : i32
    return %c0_i32, %c0_i32_0 : i32, i32
  }
  func.func @transform_5(%arg0: i32) -> (i32, i32, i32) {
    %c0_i32 = arith.constant 0 : i32
    %c0_i32_0 = arith.constant 0 : i32
    %c0_i32_1 = arith.constant 0 : i32
    return %arg0, %c0_i32, %c0_i32_0 : i32, i32, i32
  }
  func.func @transform_6(%arg0: i32) -> (i32, i32, i32) {
    %c0_i32 = arith.constant 0 : i32
    %c0_i32_0 = arith.constant 0 : i32
    %c0_i32_1 = arith.constant 0 : i32
    return %arg0, %c0_i32, %c0_i32_0 : i32, i32, i32
  }
}

</mosaic_0001>

<bundles_post_ra>
// kernel: encode_forward.2
= control target key start
LH: loop header
LB: loop body
LE: loop exit
PB: predicated region body
PF: predicated region fallthrough
CT: control target
= control target key end

     0   :  { %s1686_s15 = smov 0   ;;  %s2602_s0 = inlined_call_operand.vmem [shape: s32[2,512], index: 0, kind: input, shape index: {}]   ;;  %s2603_s1 = inlined_call_operand.vmem [shape: bf16[2,8,512], index: 1, kind: input, shape index: {}]   ;;  %s2604_s2 = inlined_call_operand.vmem [shape: bf16[8,216], index: 2, kind: input, shape index: {}]   ;;  %s2605_s3 = inlined_call_operand.vmem [shape: f32[8,1], index: 3, kind: input, shape index: {}]   ;;  %s2606_s4 = inlined_call_operand.vmem [shape: bf16[2,8,512], index: 4, kind: output, shape index: {}]  }
   0x1 LB: > { %s1240_s16 = sadd.s32 4294967295, %s1638_s15   ;;  %p1244_p0 = scmp.ge.s32.totalorder %s1638_s15, 1  ;;  %s1638_s15 = sphi %s1686_s15, %s14_s15  }
   0x2   : > { %p162_p1 = scmp.lt.s32.totalorder %s1638_s15, 3 }
   0x4   : > { %p163_p2 = pnand %p1244_p0, %p162_p1 }
   0x6   : > { %166 = sbr.rel (%p163_p2) target bundleno = 585 (0x249), region = 36 }
   0xb   : > { %p188_p3 = scmp.lt.s32.totalorder %s1240_s16, 1  ;;  %s1640_s21 = smov 73   ;;  %v1641_v8 = vmov 0   ;;  %vm219_vm0 = vcmask 596992   ;;  %v1657_v22 = vmov 0.0   ;;  %v1780_v23 = vld [vmem:[%s2602_s0] sm:$0xff]  ;;  %v236_v26 = vlaneseq }
   0xc   : > { %1628 = vset.pattern.permute.xlu1 %v1641_v8  ;;  %1629 = vset.pattern.permute.xlu0 %v1641_v8  ;;  %s1642_s22 = smov 48   ;;  %s1643_s23 = smov 54   ;;  %vm2608_vm1 = vcmp.ge.s32.totalorder %v1780_v23, 1  ;;  %vm2609_vm3 = vcmp.lt.s32.totalorder %v1780_v23, 7  ;;  %v1829_v37 = vld [vmem:[%s2604_s2] sm:$0xff]  ;;  %vm1056_vm5 = vcmask 719872  }
   0xd   : > { %s2806_s16 = smov (!%p188_p3, %s1240_s16), 1  ;;  %s1644_s24 = smov 56   ;;  %v1788_v24 = vsel %vm2608_vm1, 1, %v1641_v8  ;;  %v1797_v28 = vshrl.u32 %v236_v26, 7  ;;  %v1812_v31 = vsel %vm2609_vm3, 1, %v1641_v8  ;;  %2654 = vst [vmem:[#allocation3_spill] sm:$0xff] %v1829_v37  ;;  %v1250_v38 = vcombine.high %v1829_v37, %v1829_v37 }
   0xe   : > { %s1415_s17 = sshll.u32 %s2806_s16, 4  ;;  %s1645_s25 = smov 55   ;;  %v232_v25 = vrot.slane %v1788_v24, 7  ;;  %vm803_vm6 = vcmask 441344   ;;  %vm826_vm8 = vcmask 392192   ;;  %v339_v54 = vrot.slane %v1812_v31, 7 }
   0xf   : > { %s192_s20 = scalar_lea.vmem %s2603_s1, %s1415_s17  ;;  %s1646_s26 = smov 63   ;;  %v408_v29 = vsub.s32 2, %v1797_v28  ;;  %v1807_v30 = vsub.s32 3, %v1797_v28  ;;  %v1819_v33 = vsub.s32 1, %v1797_v28  ;;  %v1822_v34 = vsub.s32 0, %v1797_v28  ;;  %1410 = vmatprep.mubr.msk.bf16.mxu1 %vm1056_vm5, %v1250_v38  ;;  %1330 = vmatprep.mubr.msk.bf16.mxu0 %vm1056_vm5, %v1250_v38 }
  0x10   : > { %v199_v0 = vld [vmem:[%s192_s20] sm:$0xff]  ;;  %v200_v1 = vld [vmem:[%s192_s20 + $0x8] sm:$0xff]  ;;  %s1647_s27 = smov 62   ;;  %s1648_s28 = smov 110   ;;  %vm1793_vm2 = vcmp.ne.s32.totalorder %v232_v25, 0  ;;  %v416_v39 = vsub.s32 6, %v1797_v28 }
  0x11   : > { %v201_v2 = vunpack.c.l.bf16 %v199_v0  ;;  %v202_v3 = vunpack.c.h.bf16 %v199_v0  ;;  %v203_v4 = vunpack.c.l.bf16 %v200_v1  ;;  %v204_v5 = vunpack.c.h.bf16 %v200_v1  ;;  %s1649_s29 = smov 64   ;;  %s1650_s30 = smov 112   ;;  %vm520_vm4 = vmand %vm2609_vm3, %vm1793_vm2 }
  0x12   : > { %s1651_s5 = smov 111   ;;  %s1652_s6 = smov 118   ;;  %v521_v32 = vsel %vm520_vm4, 1, %v1641_v8  ;;  %v468_v35 = vrot.slane %v1812_v31, %v408_v29  ;;  %v1839_v41 = vsub.s32 7, %v1797_v28  ;;  %v1845_v43 = vsub.s32 5, %v1797_v28 }
  0x13   : > { %v1448_v6 = vpack.i.bf16 %v202_v3, %v201_v2  ;;  %v1453_v7 = vpack.i.bf16 %v204_v5, %v203_v4  ;;  %s1653_s7 = smov 119   ;;  %s1654_s8 = smov 126   ;;  %v529_v36 = vrot.slane %v521_v32, %v1807_v30  ;;  %v412_v44 = vsub.s32 4, %v1797_v28  ;;  %v1044_v2 = vld [vmem:[%s2605_s3] sm:$0xff] }
  0x14   : > { %s1655_s9 = smov 120   ;;  %s1656_s10 = smov 127   ;;  %v484_v40 = vrot.slane %v468_v35, %v1822_v34  ;;  %v476_v45 = vrot.slane %v1812_v31, %v416_v39  ;;  %v464_v46 = vrot.slane %v1812_v31, %v1822_v34  ;;  %v525_v47 = vrot.slane %v521_v32, %v1819_v33 }
  0x15   : > { %1449 = vrot.lane.b32.xlu0 %v1448_v6, %s1640_s21  ;;  %s1658_s13 = smov 47   ;;  %s1659_s19 = smov 46   ;;  %v1842_v42 = vrot.slane %v529_v36, %v1819_v33  ;;  %v537_v49 = vrot.slane %v521_v32, %v1839_v41  ;;  %v472_v52 = vrot.slane %v1812_v31, %v412_v44  ;;  %v533_v53 = vrot.slane %v521_v32, %v1845_v43 }
  0x16   : > { %vm1854_vm7 = vcmp.eq.s32.totalorder %v484_v40, 1  ;;  %v492_v59 = vrot.slane %v476_v45, %v1822_v34  ;;  %v1875_v60 = vrot.slane %v464_v46, %v1822_v34  ;;  %v1878_v61 = vrot.slane %v525_v47, %v1819_v33 }
  0x17   : > { %vm2607_vm9 = vcmp.eq.s32.totalorder %v1842_v42, 1  ;;  %v1887_v0 = vrot.slane %v537_v49, %v1819_v33  ;;  %v409_v1 = vrot.slane %v1788_v24, %v408_v29  ;;  %v488_v6 = vrot.slane %v472_v52, %v1822_v34 }
  0x18   : > { %vm1251_vm10 = vmpackc.low %vm2607_vm9, %vm1854_vm7  ;;  %vm1897_vm11 = vcmp.ne.s32.totalorder %v339_v54, 0  ;;  %vm975_vm12 = vcmask 449536   ;;  %vm1901_vm13 = vcmp.eq.s32.totalorder %v492_v59, 1  ;;  %vm2611_vm15 = vcmp.eq.s32.totalorder %v1875_v60, 1 }
  0x19   : > { %1454 = vrot.lane.b32.xlu0 %v1453_v7, %s1640_s21  ;;  %v1895_v7 = vrot.slane %v533_v53, %v1819_v33  ;;  %vm2610_vm14 = vcmp.eq.s32.totalorder %v1887_v0, 1  ;;  %vm341_vm4 = vmand %vm2608_vm1, %vm1897_vm11  ;;  %vm1914_vm5 = vcmp.eq.s32.totalorder %v488_v6, 1  ;;  %v413_v28 = vrot.slane %v1788_v24, %v412_v44 }
  0x1a   : > { %v405_v29 = vrot.slane %v1788_v24, %v1822_v34  ;;  %v283_v36 = vrot.slane %v1788_v24, %v1807_v30  ;;  %v1929_v38 = vsel %vm341_vm4, 1, %v1641_v8  ;;  %vm1331_vm9 = vmpackc.low %vm2610_vm14, %vm1901_vm13  ;;  %vm780_vm1 = vcmask 457728  }
  0x87   : > { %v1450_v9 = vpop.permute.xlu0 %1449 }
  0x88   : > { %v1452_v10 = vunpack.i.h.bf16 %v1450_v9  ;;  %v1451_v11 = vunpack.i.l.bf16 %v1450_v9 }
  0x8a   : > { %v1704_v15 = vsel %vm219_vm0, %v1451_v11, %v1452_v10  ;;  %v1722_v21 = vsel %vm219_vm0, 0.0, %v1451_v11 }
  0x8b   : > { %v1455_v12 = vpop.permute.xlu0 %1454 }
  0x8c   : > { %v1457_v13 = vunpack.i.h.bf16 %v1455_v12  ;;  %v1456_v14 = vunpack.i.l.bf16 %v1455_v12 }
  0x8e   : > { %v1706_v16 = vsel %vm219_vm0, %v1452_v10, %v1456_v14  ;;  %v1712_v18 = vsel %vm219_vm0, %v1457_v13, 0.0  ;;  %v1714_v19 = vsel %vm219_vm0, %v1456_v14, %v1457_v13  ;;  %vm2612_vm0 = vcmp.eq.s32.totalorder %v1878_v61, 1 }
  0x8f   : > { %v1710_v17 = vpack.i.bf16 %v1706_v16, %v1704_v15  ;;  %2651 = vst [vmem:[#allocation2_spill] sm:$0xff] %v1712_v18  ;;  %v1720_v20 = vpack.i.bf16 %v1712_v18, %v1714_v19  ;;  %vm1254_vm14 = vmpackc.low %vm2612_vm0, %vm2611_vm15  ;;  %vm2668_vm0 = vcmp.ge.s32.totalorder %v1780_v23, 1 }
  0x91   : > { %1469 = vrot.lane.b32.xlu0 %v1710_v17, %s1642_s22  ;;  %1459 = vrot.lane.b32.xlu1 %v1710_v17, %s1643_s23 }
  0x95   : > { %793 = vrot.lane.b32.xlu0 %v1722_v21, %s1643_s23  ;;  %1464 = vrot.lane.b32.xlu1 %v1720_v20, %s1643_s23 }
  0x99   : > { %1479 = vrot.lane.b32.xlu0 %v1710_v17, %s1644_s24  ;;  %1474 = vrot.lane.b32.xlu1 %v1720_v20, %s1642_s22 }
  0x9d   : > { %1489 = vrot.lane.b32.xlu0 %v1710_v17, %s1645_s25  ;;  %816 = vrot.lane.b32.xlu1 %v1722_v21, %s1642_s22 }
  0xa1   : > { %770 = vrot.lane.b32.xlu0 %v1722_v21, %s1644_s24  ;;  %1484 = vrot.lane.b32.xlu1 %v1720_v20, %s1644_s24  ;;  %s197_s24 = scalar_lea.vmem %s2606_s4, %s1415_s17 }
  0xa5   : > { %1499 = vrot.lane.b32.xlu0 %v1710_v17, %s1646_s26  ;;  %1494 = vrot.lane.b32.xlu1 %v1720_v20, %s1645_s25 }
  0xa9   : > { %1509 = vrot.lane.b32.xlu0 %v1710_v17, %s1647_s27  ;;  %965 = vrot.lane.b32.xlu1 %v1722_v21, %s1645_s25 }
  0xad   : > { %724 = vrot.lane.b32.xlu0 %v1722_v21, %s1646_s26  ;;  %1504 = vrot.lane.b32.xlu1 %v1720_v20, %s1646_s26 }
  0xb1   : > { %1519 = vrot.lane.b32.xlu0 %v1710_v17, %s1648_s28  ;;  %1514 = vrot.lane.b32.xlu1 %v1720_v20, %s1647_s27 }
  0xb5   : > { %1529 = vrot.lane.b32.xlu0 %v1710_v17, %s1649_s29  ;;  %747 = vrot.lane.b32.xlu1 %v1722_v21, %s1647_s27 }
  0xb9   : > { %678 = vrot.lane.b32.xlu0 %v1722_v21, %s1648_s28  ;;  %1524 = vrot.lane.b32.xlu1 %v1720_v20, %s1648_s28 }
  0xbd   : > { %1539 = vrot.lane.b32.xlu0 %v1710_v17, %s1650_s30  ;;  %1534 = vrot.lane.b32.xlu1 %v1720_v20, %s1649_s29 }
  0xc1   : > { %1549 = vrot.lane.b32.xlu0 %v1710_v17, %s1651_s5  ;;  %701 = vrot.lane.b32.xlu1 %v1722_v21, %s1649_s29 }
  0xc5   : > { %558 = vrot.lane.b32.xlu0 %v1722_v21, %s1650_s30  ;;  %1544 = vrot.lane.b32.xlu1 %v1720_v20, %s1650_s30 }
  0xc9   : > { %1559 = vrot.lane.b32.xlu0 %v1710_v17, %s1652_s6  ;;  %1554 = vrot.lane.b32.xlu1 %v1720_v20, %s1651_s5 }
  0xcd   : > { %1569 = vrot.lane.b32.xlu0 %v1710_v17, %s1653_s7  ;;  %617 = vrot.lane.b32.xlu1 %v1722_v21, %s1651_s5 }
  0xd1   : > { %497 = vrot.lane.b32.xlu0 %v1722_v21, %s1652_s6  ;;  %1564 = vrot.lane.b32.xlu1 %v1720_v20, %s1652_s6 }
  0xd5   : > { %1579 = vrot.lane.b32.xlu0 %v1710_v17, %s1654_s8  ;;  %1574 = vrot.lane.b32.xlu1 %v1720_v20, %s1653_s7 }
  0xd9   : > { %1589 = vrot.lane.b32.xlu0 %v1710_v17, %s1655_s9  ;;  %946 = vrot.lane.b32.xlu1 %v1722_v21, %s1653_s7 }
  0xdd   : > { %379 = vrot.lane.b32.xlu0 %v1722_v21, %s1654_s8  ;;  %1584 = vrot.lane.b32.xlu1 %v1720_v20, %s1654_s8 }
  0xe1   : > { %1599 = vrot.lane.b32.xlu0 %v1710_v17, %s1656_s10  ;;  %1594 = vrot.lane.b32.xlu1 %v1720_v20, %s1655_s9 }
  0xe5   : > { %922 = vrot.lane.b32.xlu0 %v1657_v22, %s1650_s30  ;;  %438 = vrot.lane.b32.xlu1 %v1722_v21, %s1655_s9 }
  0xe9   : > { %314 = vrot.lane.b32.xlu0 %v1722_v21, %s1656_s10  ;;  %1604 = vrot.lane.b32.xlu1 %v1720_v20, %s1656_s10 }
  0xed   : > { %914 = vrot.lane.b32.xlu0 %v1657_v22, %s1652_s6  ;;  %938 = vrot.lane.b32.xlu1 %v1657_v22, %s1648_s28 }
  0xf1   : > { %898 = vrot.lane.b32.xlu0 %v1657_v22, %s1654_s8  ;;  %930 = vrot.lane.b32.xlu1 %v1657_v22, %s1651_s5 }
  0xf5   : > { %890 = vrot.lane.b32.xlu0 %v1657_v22, %s1656_s10  ;;  %984 = vrot.lane.b32.xlu1 %v1657_v22, %s1653_s7 }
  0xf9   : > { %1614 = vrot.lane.b32.xlu0 %v1720_v20, %s1658_s13  ;;  %906 = vrot.lane.b32.xlu1 %v1657_v22, %s1655_s9  ;;  %v417_v22 = vrot.slane %v1788_v24, %v416_v39 }
  0xfb   : > { %v433_v59 = vrot.slane %v417_v22, %v1822_v34  ;;  %v291_v22 = vrot.slane %v1788_v24, %v1839_v41 }
  0xfd   : > { %1624 = vrot.lane.b32.xlu0 %v1720_v20, %s1659_s19  ;;  %1609 = vrot.lane.b32.xlu1 %v1710_v17, %s1658_s13  ;;  %v425_v20 = vrot.slane %v409_v1, %v1822_v34  ;;  %v1969_v1 = vrot.slane %v405_v29, %v1822_v34 }
  0xff   : > { %vm1945_vm3 = vcmp.eq.s32.totalorder %v425_v20, 1 }
 0x101   : > { %862 = vrot.lane.b32.xlu0 %v1722_v21, %s1659_s19  ;;  %1619 = vrot.lane.b32.xlu1 %v1710_v17, %s1659_s19 }
 0x103   : > { %v1859_v50 = vpop.permute.xlu0 %1469  ;;  %v1861_v51 = vpop.permute.xlu1 %1459 }
 0x104   : > { %v1472_v55 = vunpack.i.h.bf16 %v1859_v50  ;;  %v1471_v56 = vunpack.i.l.bf16 %v1859_v50  ;;  %v1462_v57 = vunpack.i.h.bf16 %v1861_v51  ;;  %v1461_v58 = vunpack.i.l.bf16 %v1861_v51 }
 0x105   : > { %839 = vrot.lane.b32.xlu1 %v1722_v21, %s1658_s13 }
 0x106   : > { %v805_v62 = vsel %vm803_vm6, %v1461_v58, %v1462_v57  ;;  %v828_v63 = vsel %vm826_vm8, %v1471_v56, %v1472_v55 }
 0x107   : > { %v794_v3 = vpop.permute.xlu0 %793  ;;  %v1465_v4 = vpop.permute.xlu1 %1464  ;;  %v1252_v5 = vpack.c.bf16 %v828_v63, %v805_v62  ;;  %v429_v62 = vrot.slane %v413_v28, %v1822_v34 }
 0x108   : > { %v1467_v10 = vunpack.i.h.bf16 %v1465_v4  ;;  %v1466_v11 = vunpack.i.l.bf16 %v1465_v4  ;;  %v804_v52 = vsel %vm803_vm6, %v794_v3, %v1461_v58  ;;  %v350_v58 = vrot.slane %v1929_v38, %v1807_v30 }
 0x109   : > { %1253 = vmatprep.subr.msk.bf16.mxu0 %vm1251_vm10, %v1252_v5  ;;  %1047 = vperm.xlu1 %1628, %v1044_v2   ;;  %vm2613_vm10 = vcmp.eq.s32.totalorder %v1895_v7, 1  ;;  %v1972_v2 = vrot.slane %v283_v36, %v1819_v33 }
 0x10a   : > { %v807_v32 = vsel %vm803_vm6, %v1466_v11, %v1467_v10  ;;  %v806_v35 = vsel %vm803_vm6, %v1462_v57, %v1466_v11  ;;  %vm1334_vm4 = vmpackc.low %vm2613_vm10, %vm1914_vm5  ;;  %vm2616_vm6 = vmmov 1   ;;  %v1991_v9 = vrot.slane %v350_v58, %v1819_v33 }
 0x10b   : > { %v1912_v13 = vpop.permute.xlu0 %1479  ;;  %v1475_v14 = vpop.permute.xlu1 %1474  ;;  %vm1986_vm10 = vmand %vm2668_vm0, %vm1793_vm2  ;;  %vm2615_vm2 = vcmp.eq.s32.totalorder %v1969_v1, 1  ;;  %vm2614_vm0 = vcmp.eq.s32.totalorder %v1972_v2, 1 }
 0x10c   : > { %v1477_v25 = vunpack.i.h.bf16 %v1475_v14  ;;  %v1476_v26 = vunpack.i.l.bf16 %v1475_v14  ;;  %v1482_v40 = vunpack.i.h.bf16 %v1912_v13  ;;  %v1481_v39 = vunpack.i.l.bf16 %v1912_v13 }
 0x10d   : > { %v2021_v36 = vsel %vm1986_vm10, 1, %v1641_v8 }
 0x10e   : > { %v830_v45 = vsel %vm826_vm8, %v1476_v26, %v1477_v25  ;;  %v829_v44 = vsel %vm826_vm8, %v1472_v55, %v1476_v26  ;;  %v358_v25 = vrot.slane %v1929_v38, %v1839_v41  ;;  %v287_v26 = vrot.slane %v1788_v24, %v1845_v43 }
 0x10f   : > { %v1939_v46 = vpop.permute.xlu0 %1489  ;;  %v817_v47 = vpop.permute.xlu1 %816  ;;  %v1332_v49 = vpack.c.bf16 %v830_v45, %v807_v32  ;;  %v1335_v50 = vpack.c.bf16 %v829_v44, %v806_v35  ;;  %v354_v35 = vrot.slane %v1929_v38, %v1845_v43 }
 0x110   : > { %v1492_v53 = vunpack.i.h.bf16 %v1939_v46  ;;  %v1491_v54 = vunpack.i.l.bf16 %v1939_v46  ;;  %v827_v55 = vsel %vm826_vm8, %v817_v47, %v1471_v56  ;;  %v782_v56 = vsel %vm780_vm1, %v1481_v39, %v1482_v40  ;;  %vm1257_vm8 = vmpackc.low %vm2616_vm6, %vm1945_vm3 }
 0x111   : > { %v1255_v57 = vpack.c.bf16 %v827_v55, %v804_v52  ;;  %1333 = vmatprep.subr.msk.bf16.mxu1 %vm1331_vm9, %v1332_v49  ;;  %vm1993_vm9 = vcmp.eq.s32.totalorder %v433_v59, 1  ;;  %v279_v46 = vrot.slane %v1788_v24, %v1819_v33  ;;  %v346_v24 = vrot.slane %v1929_v38, %v1819_v33 }
 0x112   : > { %v977_v63 = vsel %vm975_vm12, %v1491_v54, %v1492_v53  ;;  %1336 = vmatpush1.bf16.msk.msra.mxu1 %vm1334_vm4, %v1335_v50  ;;  %vm2665_vm4 = vcmp.lt.s32.totalorder %v1780_v23, 7  ;;  %v2070_v34 = vrot.slane %v287_v26, %v1819_v33 }
 0x113   : > { %v771_v3 = vpop.permute.xlu0 %770  ;;  %v1485_v4 = vpop.permute.xlu1 %1484  ;;  %1256 = vmatpush1.bf16.msk.msra.mxu0 %vm1254_vm14, %v1255_v57  ;;  %v1258_v5 = vpack.c.bf16 %v977_v63, %v782_v56  ;;  %vm1978_vm15 = vmand %vm2665_vm4, %vm1897_vm11  ;;  %vm734_vm14 = vcmask 515072   ;;  %vm1997_vm11 = vcmp.eq.s32.totalorder %v429_v62, 1 }
 0x114   : > { %v1487_v10 = vunpack.i.h.bf16 %v1485_v4  ;;  %v1486_v11 = vunpack.i.l.bf16 %v1485_v4  ;;  %v2014_v28 = vsel %vm1978_vm15, 1, %v1641_v8  ;;  %vm1337_vm15 = vmpackc.low %vm2616_vm6, %vm1993_vm9  ;;  %v781_v59 = vsel %vm780_vm1, %v771_v3, %v1481_v39 }
 0x115   : > { %1259 = vmatprep.subr.msk.bf16.mxu0 %vm1257_vm8, %v1258_v5  ;;  %vm1340_vm10 = vmpackc.low %vm2616_vm6, %vm1997_vm11  ;;  %v649_v38 = vrot.slane %v2014_v28, %v1807_v30  ;;  %vm2675_vm8 = vcmask 506880   ;;  %v2064_v39 = vrot.slane %v291_v22, %v1819_v33 }
 0x116   : > { %v783_v45 = vsel %vm780_vm1, %v1482_v40, %v1486_v11  ;;  %v784_v44 = vsel %vm780_vm1, %v1486_v11, %v1487_v10  ;;  %vm1260_vm4 = vmpackc.low %vm2616_vm6, %vm2615_vm2  ;;  %vm2676_vm1 = vcmp.eq.s32.totalorder %v1991_v9, 1  ;;  %v2073_v10 = vrot.slane %v354_v35, %v1819_v33 }
 0x117   : > { %v2003_v23 = vpop.permute.xlu0 %1499  ;;  %v1495_v27 = vpop.permute.xlu1 %1494  ;;  %v2076_v11 = vrot.slane %v279_v46, %v1819_v33  ;;  %v2087_v26 = vrot.slane %v649_v38, %v1819_v33  ;;  %v645_v35 = vrot.slane %v2014_v28, %v1819_v33 }
 0x118   : > { %v1497_v29 = vunpack.i.h.bf16 %v1495_v27  ;;  %v1496_v32 = vunpack.i.l.bf16 %v1495_v27  ;;  %v1502_v47 = vunpack.i.h.bf16 %v2003_v23  ;;  %v1501_v49 = vunpack.i.l.bf16 %v2003_v23 }
 0x119   : > { %v2079_v27 = vrot.slane %v346_v24, %v1819_v33  ;;  %v239_v23 = vrot.slane %v2021_v36, %v1819_v33 }
 0x11a   : > { %v978_v50 = vsel %vm975_vm12, %v1492_v53, %v1496_v32  ;;  %v979_v52 = vsel %vm975_vm12, %v1496_v32, %v1497_v29  ;;  %v243_v53 = vrot.slane %v2021_v36, %v1807_v30  ;;  %v736_v13 = vsel %vm734_vm14, %v1501_v49, %v1502_v47 }
 0x11b   : > { %v1338_v8 = vpack.c.bf16 %v979_v52, %v784_v44  ;;  %v1341_v40 = vpack.c.bf16 %v978_v50, %v783_v45  ;;  %v2035_v55 = vpop.permute.xlu0 %1509  ;;  %v966_v57 = vpop.permute.xlu1 %965  ;;  %vm2620_vm2 = vcmp.eq.s32.totalorder %v2079_v27, 1 }
 0x11c   : > { %v1512_v62 = vunpack.i.h.bf16 %v2035_v55  ;;  %v1511_v58 = vunpack.i.l.bf16 %v2035_v55  ;;  %v976_v63 = vsel %vm975_vm12, %v966_v57, %v1491_v54  ;;  %vm1263_vm12 = vmpackc.low %vm2676_vm1, %vm2614_vm0  ;;  %v2067_v54 = vrot.slane %v358_v25, %v1819_v33 }
 0x11d   : > { %v1261_v56 = vpack.c.bf16 %v976_v63, %v781_v59  ;;  %1339 = vmatprep.subr.msk.bf16.mxu1 %vm1337_vm15, %v1338_v8  ;;  %v2082_v22 = vrot.slane %v243_v53, %v1819_v33  ;;  %v588_v25 = vrot.slane %v1812_v31, %v1807_v30  ;;  %vm2618_vm1 = vcmp.eq.s32.totalorder %v2070_v34, 1 }
 0x11e   : > { %v759_v4 = vsel %vm2675_vm8, %v1511_v58, %v1512_v62  ;;  %1342 = vmatpush1.bf16.msk.msra.mxu1 %vm1340_vm10, %v1341_v40  ;;  %vm2619_vm10 = vcmp.eq.s32.totalorder %v2064_v39, 1  ;;  %vm2621_vm0 = vcmp.eq.s32.totalorder %v2073_v10, 1  ;;  %v251_v8 = vrot.slane %v2021_v36, %v1839_v41 }
 0x11f   : > { %v725_v3 = vpop.permute.xlu0 %724  ;;  %v1505_v5 = vpop.permute.xlu1 %1504  ;;  %1262 = vmatpush1.bf16.msk.msra.mxu0 %vm1260_vm4, %v1261_v56  ;;  %v1264_v6 = vpack.c.bf16 %v759_v4, %v736_v13  ;;  %vm2622_vm4 = vcmp.eq.s32.totalorder %v2067_v54, 1  ;;  %vm1346_vm15 = vmpackc.low %vm2621_vm0, %vm2618_vm1  ;;  %v247_v56 = vrot.slane %v2021_v36, %v1845_v43 }
 0x120   : > { %v1507_v29 = vunpack.i.h.bf16 %v1505_v5  ;;  %v1506_v32 = vunpack.i.l.bf16 %v1505_v5  ;;  %vm1343_vm6 = vmpackc.low %vm2622_vm4, %vm2619_vm10  ;;  %v735_v38 = vsel %vm734_vm14, %v725_v3, %v1501_v49  ;;  %v2138_v49 = vrot.slane %v588_v25, %v1819_v33 }
 0x121   : > { %1265 = vmatprep.subr.msk.bf16.mxu0 %vm1263_vm12, %v1264_v6  ;;  %vm2677_vm12 = vmmov %vm2675_vm8  ;;  %v2154_v25 = vrot.slane %v251_v8, %v1819_v33  ;;  %v2171_v8 = vrot.slane %v239_v23, %v1819_v33 }
 0x122   : > { %v737_v50 = vsel %vm734_vm14, %v1502_v47, %v1506_v32  ;;  %v738_v52 = vsel %vm734_vm14, %v1506_v32, %v1507_v29  ;;  %v653_v29 = vrot.slane %v2014_v28, %v1845_v43  ;;  %2679 = vst [vmem:[#allocation4_spill] sm:$0xff] %v2138_v49  ;;  %vm2680_vm14 = vcmask 900096  }
 0x123   : > { %v2092_v45 = vpop.permute.xlu0 %1519  ;;  %v1515_v44 = vpop.permute.xlu1 %1514 }
 0x124   : > { %v1517_v30 = vunpack.i.h.bf16 %v1515_v44  ;;  %v1516_v46 = vunpack.i.l.bf16 %v1515_v44  ;;  %v1522_v40 = vunpack.i.h.bf16 %v2092_v45  ;;  %v1521_v55 = vunpack.i.l.bf16 %v2092_v45 }
 0x126   : > { %v760_v57 = vsel %vm2675_vm8, %v1512_v62, %v1516_v46  ;;  %v761_v24 = vsel %vm2677_vm12, %v1516_v46, %v1517_v30  ;;  %v657_v62 = vrot.slane %v2014_v28, %v1839_v41  ;;  %vm2678_vm12 = vcmp.eq.s32.totalorder %v2076_v11, 1 }
 0x127   : > { %v1344_v47 = vpack.c.bf16 %v761_v24, %v738_v52  ;;  %v1347_v53 = vpack.c.bf16 %v760_v57, %v737_v50  ;;  %v2113_v59 = vpop.permute.xlu0 %1529  ;;  %v748_v63 = vpop.permute.xlu1 %747  ;;  %vm1266_vm1 = vmpackc.low %vm2620_vm2, %vm2678_vm12  ;;  %vm2682_vm12 = vcmp.eq.s32.totalorder %v2087_v26, 1  ;;  %v2160_v30 = vrot.slane %v247_v56, %v1819_v33 }
 0x128   : > { %v1532_v4 = vunpack.i.h.bf16 %v2113_v59  ;;  %v1531_v13 = vunpack.i.l.bf16 %v2113_v59  ;;  %v758_v5 = vsel %vm2675_vm8, %v748_v63, %v1511_v58  ;;  %v2143_v58 = vsel %vm2680_vm14, %v1521_v55, %v1522_v40 }
 0x129   : > { %v1267_v6 = vpack.c.bf16 %v758_v5, %v735_v38  ;;  %1345 = vmatprep.subr.msk.bf16.mxu1 %vm1343_vm6, %v1344_v47  ;;  %vm2681_vm8 = vcmask 523264   ;;  %vm2683_vm6 = vcmp.eq.s32.totalorder %v2082_v22, 1  ;;  %v2157_v44 = vrot.slane %v657_v62, %v1819_v33 }
 0x12a   : > { %v713_v3 = vsel %vm2681_vm8, %v1531_v13, %v1532_v4  ;;  %1348 = vmatpush1.bf16.msk.msra.mxu1 %vm1346_vm15, %v1347_v53  ;;  %vm1269_vm10 = vmpackc.low %vm2683_vm6, %vm2682_vm12  ;;  %v2163_v46 = vrot.slane %v645_v35, %v1819_v33  ;;  %v2168_v57 = vrot.slane %v653_v29, %v1819_v33  ;;  %v596_v24 = vrot.slane %v1812_v31, %v1839_v41 }
 0x12b   : > { %v1270_v28 = vpack.c.bf16 %v713_v3, %v2143_v58  ;;  %v679_v32 = vpop.permute.xlu0 %678  ;;  %v2151_v36 = vpop.permute.xlu1 %1524  ;;  %1268 = vmatpush1.bf16.msk.msra.mxu0 %vm1266_vm1, %v1267_v6  ;;  %vm2624_vm14 = vcmp.eq.s32.totalorder %v2154_v25, 1  ;;  %vm2623_vm8 = vcmp.eq.s32.totalorder %v2157_v44, 1  ;;  %vm2684_vm6 = vcmask 900096  }
 0x12c   : > { %v2632_v50 = vunpack.i.h.bf16 %v2151_v36  ;;  %v1526_v52 = vunpack.i.l.bf16 %v2151_v36  ;;  %vm2627_vm12 = vcmp.eq.s32.totalorder %v2163_v46, 1  ;;  %vm2685_vm2 = vmmov %vm2684_vm6  ;;  %vm2626_vm0 = vcmp.eq.s32.totalorder %v2168_v57, 1 }
 0x12d   : > { %1271 = vmatprep.subr.msk.bf16.mxu0 %vm1269_vm10, %v1270_v28  ;;  %vm2625_vm10 = vcmp.eq.s32.totalorder %v2160_v30, 1  ;;  %vm2686_vm1 = vcmask 523264  }
 0x12e   : > { %v2183_v63 = vsel %vm2684_vm6, %v1522_v40, %v1526_v52  ;;  %v2188_v41 = vsel %vm2685_vm2, %v1526_v52, %v2632_v50  ;;  %vm2687_vm15 = vmmov %vm2686_vm1 }
 0x12f   : > { %v2176_v47 = vpop.permute.xlu0 %1539  ;;  %v1535_v35 = vpop.permute.xlu1 %1534  ;;  %vm1349_vm6 = vmpackc.low %vm2624_vm14, %vm2623_vm8  ;;  %vm2689_vm8 = vcmp.eq.s32.totalorder %v2171_v8, 1 }
 0x130   : > { %v1537_v53 = vunpack.i.h.bf16 %v1535_v35  ;;  %v1536_v59 = vunpack.i.l.bf16 %v1535_v35  ;;  %v1542_v62 = vunpack.i.h.bf16 %v2176_v47  ;;  %v1541_v56 = vunpack.i.l.bf16 %v2176_v47  ;;  %vm1352_vm4 = vmpackc.low %vm2625_vm10, %vm2626_vm0 }
 0x131   : > { %vm1272_vm14 = vmpackc.low %vm2689_vm8, %vm2627_vm12  ;;  %vm2690_vm10 = vcmp.eq.s32.totalorder %v1842_v42, 1  ;;  %vm2691_vm0 = vcmp.eq.s32.totalorder %v2138_v49, 1  ;;  %vm2709_vm12 = vcmp.eq.s32.totalorder %v1878_v61, 1 }
 0x132   : > { %v714_v38 = vsel %vm2686_vm1, %v1532_v4, %v1536_v59  ;;  %v715_v5 = vsel %vm2687_vm15, %v1536_v59, %v1537_v53  ;;  %v592_v4 = vrot.slane %v1812_v31, %v1845_v43  ;;  %vm2688_vm15 = vmmov %vm2685_vm2  ;;  %v584_v53 = vrot.slane %v1812_v31, %v1819_v33 }
 0x133   : > { %v1350_v40 = vpack.c.bf16 %v715_v5, %v2188_v41  ;;  %v1353_v6 = vpack.c.bf16 %v714_v38, %v2183_v63  ;;  %v1550_v29 = vpop.permute.xlu0 %1549  ;;  %v702_v23 = vpop.permute.xlu1 %701  ;;  %v689_v3 = vsel %vm2688_vm15, %v679_v32, %v1521_v55  ;;  %vm2222_vm2 = vmpackc.low %vm2691_vm0, %vm2690_vm10  ;;  %vm2694_vm15 = vcmask 916480  }
 0x134   : > { %v1552_v28 = vunpack.i.h.bf16 %v1550_v29  ;;  %v1551_v52 = vunpack.i.l.bf16 %v1550_v29  ;;  %v712_v47 = vsel %vm2686_vm1, %v702_v23, %v1531_v13  ;;  %v570_v45 = vsel %vm2694_vm15, %v1541_v56, %v1542_v62 }
 0x135   : > { %v1273_v35 = vpack.c.bf16 %v712_v47, %v689_v3  ;;  %1351 = vmatprep.subr.msk.bf16.mxu1 %vm1349_vm6, %v1350_v40  ;;  %vm2695_vm1 = vcmask 908288   ;;  %v2229_v13 = vrot.slane %v596_v24, %v1819_v33  ;;  %v2236_v42 = vrot.slane %v592_v4, %v1819_v33 }
 0x136   : > { %v629_v55 = vsel %vm2695_vm1, %v1551_v52, %v1552_v28  ;;  %1354 = vmatpush1.bf16.msk.msra.mxu1 %vm1352_vm4, %v1353_v6  ;;  %v2244_v24 = vrot.slane %v584_v53, %v1819_v33  ;;  %vm2701_vm6 = vcmp.eq.s32.totalorder %v1887_v0, 1 }
 0x137   : > { %2696 = vst [vmem:[#allocation5_spill] sm:$0xff] %v2229_v13  ;;  %v2231_v32 = vpack.c.bf16 %v629_v55, %v570_v45  ;;  %v559_v59 = vpop.permute.xlu0 %558  ;;  %v2233_v31 = vpop.permute.xlu1 %1544  ;;  %1274 = vmatpush1.bf16.msk.msra.mxu0 %vm1272_vm14, %v1273_v35  ;;  %2697 = vst [vmem:[#allocation6_spill] sm:$0xff] %v2236_v42  ;;  %vm2628_vm0 = vcmp.eq.s32.totalorder %v2229_v13, 1  ;;  %vm2630_vm4 = vcmp.eq.s32.totalorder %v2236_v42, 1 }
 0x138   : > { %v2629_v38 = vunpack.i.h.bf16 %v2233_v31  ;;  %v1546_v5 = vunpack.i.l.bf16 %v2233_v31  ;;  %2698 = vst [vmem:[#allocation7_spill] sm:$0xff] %v2244_v24  ;;  %vm2699_vm14 = vmmov %vm2694_vm15  ;;  %vm2635_vm10 = vcmp.eq.s32.totalorder %v2244_v24, 1 }
 0x139   : > { %1277 = vmatprep.subr.msk.bf16.mxu0 %vm2222_vm2, %v2231_v32  ;;  %vm2700_vm8 = vmmov %vm2699_vm14 }
 0x13a   : > { %v571_v4 = vsel %vm2699_vm14, %v1542_v62, %v1546_v5  ;;  %v572_v3 = vsel %vm2700_vm8, %v1546_v5, %v2629_v38  ;;  %vm2261_vm15 = vmpackc.low %vm2628_vm0, %vm2701_vm6  ;;  %vm2705_vm6 = vcmp.eq.s32.totalorder %v1895_v7, 1 }
 0x13b   : > { %v1560_v40 = vpop.permute.xlu0 %1559  ;;  %v2247_v6 = vpop.permute.xlu1 %1554  ;;  %vm2704_vm14 = vmmov %vm2695_vm1 }
 0x13c   : > { %v2631_v29 = vunpack.i.h.bf16 %v2247_v6  ;;  %v1556_v23 = vunpack.i.l.bf16 %v2247_v6  ;;  %v1562_v47 = vunpack.i.h.bf16 %v1560_v40  ;;  %v1561_v35 = vunpack.i.l.bf16 %v1560_v40  ;;  %vm2277_vm0 = vmpackc.low %vm2630_vm4, %vm2705_vm6 }
 0x13d   : > { %v2706_v40 = vmov 0  ;;  %vm2712_vm6 = vmmov 1   ;;  %vm2716_vm4 = vcmask 973824  }
 0x13e   : > { %v630_v53 = vsel %vm2695_vm1, %v1552_v28, %v1556_v23  ;;  %v631_v62 = vsel %vm2704_vm14, %v1556_v23, %v2631_v29  ;;  %v2707_v40 = vsel %vm2277_vm0, 4294967295, %v2706_v40  ;;  %vm2708_vm1 = vmmov %vm2700_vm8 }
 0x13f   : > { %v2269_v45 = vpack.c.bf16 %v630_v53, %v571_v4  ;;  %v2271_v55 = vpack.c.bf16 %v631_v62, %v572_v3  ;;  %v1570_v0 = vpop.permute.xlu0 %1569  ;;  %v618_v5 = vpop.permute.xlu1 %617  ;;  %v569_v28 = vsel %vm2708_vm1, %v559_v59, %v1541_v56  ;;  %vm2287_vm8 = vmpackc.low %vm2635_vm10, %vm2709_vm12 }
 0x140   : > { %v1572_v38 = vunpack.i.h.bf16 %v1570_v0  ;;  %v1571_v23 = vunpack.i.l.bf16 %v1570_v0  ;;  %v628_v4 = vsel %vm2704_vm14, %v618_v5, %v1551_v52  ;;  %vm2297_vm1 = vmpackc.low %vm1854_vm7, %vm2712_vm6  ;;  %vm2715_vm14 = vcmask 965632  }
 0x141   : > { %v1279_v7 = vpack.c.bf16 %v628_v4, %v569_v28  ;;  %1357 = vmatprep.subr.msk.bf16.mxu1 %vm2261_vm15, %v2271_v55  ;;  %v509_v61 = vsel %vm2715_vm14, %v1561_v35, %v1562_v47  ;;  %vm2717_vm7 = vmmov %vm2715_vm14  ;;  %vm2721_vm14 = vcmask 973824  }
 0x142   : > { %v958_v52 = vsel %vm2716_vm4, %v1571_v23, %v1572_v38  ;;  %1360 = vmatpush1.bf16.msk.msra.mxu1 %vm2277_vm0, %v2269_v45  ;;  %vm2718_vm12 = vmmov %vm2717_vm7 }
 0x143   : > { %v2306_v59 = vpack.c.bf16 %v509_v61, %v958_v52  ;;  %v498_v53 = vpop.permute.xlu0 %497  ;;  %v2308_v62 = vpop.permute.xlu1 %1564  ;;  %1280 = vmatpush1.bf16.msk.msra.mxu0 %vm2287_vm8, %v1279_v7  ;;  %vm2328_vm4 = vmpackc.low %vm1901_vm13, %vm2712_vm6 }
 0x144   : > { %v2638_v48 = vunpack.i.h.bf16 %v2308_v62  ;;  %v1566_v0 = vunpack.i.l.bf16 %v2308_v62  ;;  %vm2722_vm10 = vmmov %vm2721_vm14 }
 0x145   : > { %1283 = vmatprep.subr.msk.bf16.mxu0 %vm2297_vm1, %v2306_v59  ;;  %vm2343_vm13 = vmpackc.low %vm1914_vm5, %vm2712_vm6  ;;  %vm2730_vm5 = vcmask 1031168  }
 0x146   : > { %v510_v52 = vsel %vm2717_vm7, %v1562_v47, %v1566_v0  ;;  %v511_v7 = vsel %vm2718_vm12, %v1566_v0, %v2638_v48  ;;  %vm2647_vm12 = vcmask 982016   ;;  %v2723_v48 = vmov 0 }
 0x147   : > { %v1580_v5 = vpop.permute.xlu0 %1579  ;;  %v2317_v28 = vpop.permute.xlu1 %1574  ;;  %v2724_v48 = vsel %vm2343_vm13, 4294967295, %v2723_v48 }
 0x148   : > { %v2641_v4 = vunpack.i.h.bf16 %v2317_v28  ;;  %v1576_v61 = vunpack.i.l.bf16 %v2317_v28  ;;  %v1582_v50 = vunpack.i.h.bf16 %v1580_v5  ;;  %v1581_v37 = vunpack.i.l.bf16 %v1580_v5  ;;  %2725 = vst [vmem:[#allocation8_spill] sm:$0xff] %v2724_v48 }
 0x14a   : > { %v959_v24 = vsel %vm2721_vm14, %v1572_v38, %v1576_v61  ;;  %v960_v42 = vsel %vm2722_vm10, %v1576_v61, %v2641_v4  ;;  %vm2726_vm14 = vmmov %vm2717_vm7  ;;  %vm2727_vm7 = vcmp.eq.s32.totalorder %v1875_v60, 1  ;;  %v391_v17 = vsel %vm2730_vm5, %v1581_v37, %v1582_v50 }
 0x14b   : > { %v2336_v47 = vpack.c.bf16 %v510_v52, %v959_v24  ;;  %v2338_v49 = vpack.c.bf16 %v511_v7, %v960_v42  ;;  %v1590_v0 = vpop.permute.xlu0 %1589  ;;  %v947_v12 = vpop.permute.xlu1 %946  ;;  %v508_v38 = vsel %vm2726_vm14, %v498_v53, %v1561_v35  ;;  %vm2352_vm0 = vmpackc.low %vm2727_vm7, %vm2712_vm6  ;;  %vm2731_vm14 = vcmp.eq.s32.totalorder %v1991_v9, 1 }
 0x14c   : > { %v1592_v5 = vunpack.i.h.bf16 %v1590_v0  ;;  %v1591_v13 = vunpack.i.l.bf16 %v1590_v0  ;;  %v957_v61 = vsel %vm2722_vm10, %v947_v12, %v1571_v23  ;;  %vm2368_vm6 = vmpackc.low %vm1945_vm3, %vm2731_vm14  ;;  %vm2645_vm3 = vcmask 1039360  }
 0x14d   : > { %v1285_v24 = vpack.c.bf16 %v508_v38, %v957_v61  ;;  %1363 = vmatprep.subr.msk.bf16.mxu1 %vm2328_vm4, %v2338_v49  ;;  %vm2735_vm7 = vmmov %vm2730_vm5 }
 0x14e   : > { %v450_v35 = vsel %vm2647_vm12, %v1591_v13, %v1592_v5  ;;  %1366 = vmatpush1.bf16.msk.msra.mxu1 %vm2343_vm13, %v2336_v47  ;;  %vm2736_vm10 = vmmov %vm2730_vm5  ;;  %vm2737_vm5 = vcmp.eq.s32.totalorder %v2067_v54, 1  ;;  %v2741_v54 = vmov 0 }
 0x14f   : > { %v2372_v23 = vpack.c.bf16 %v450_v35, %v391_v17  ;;  %v380_v53 = vpop.permute.xlu0 %379  ;;  %v2374_v52 = vpop.permute.xlu1 %1584  ;;  %1286 = vmatpush1.bf16.msk.msra.mxu0 %vm2352_vm0, %v1285_v24  ;;  %vm2399_vm14 = vmpackc.low %vm1993_vm9, %vm2737_vm5  ;;  %vm2743_vm9 = vcmask 1031168   ;;  %vm2744_vm5 = vcmp.eq.s32.totalorder %v2079_v27, 1 }
 0x150   : > { %v1587_v9 = vunpack.i.h.bf16 %v2374_v52  ;;  %v1586_v51 = vunpack.i.l.bf16 %v2374_v52  ;;  %v390_v14 = vsel %vm2743_vm9, %v380_v53, %v1581_v37  ;;  %v2750_v37 = vmov 0  ;;  %v2790_v52 = vld [vmem:[#allocation2_spill] sm:$0xff] }
 0x151   : > { %2734 = vst [vmem:[#allocation9_spill] sm:$0xff] %v2372_v23  ;;  %1289 = vmatprep.subr.msk.bf16.mxu0 %vm2368_vm6, %v2372_v23 }
 0x152   : > { %v392_v24 = vsel %vm2735_vm7, %v1582_v50, %v1586_v51  ;;  %v393_v35 = vsel %vm2736_vm10, %v1586_v51, %v1587_v9  ;;  %vm2740_vm7 = vcmp.eq.s32.totalorder %v2073_v10, 1 }
 0x153   : > { %v1600_v7 = vpop.permute.xlu0 %1599  ;;  %v2383_v0 = vpop.permute.xlu1 %1594  ;;  %vm2412_vm10 = vmpackc.low %vm1997_vm11, %vm2740_vm7  ;;  %vm2748_vm11 = vcmp.eq.s32.totalorder %v2082_v22, 1  ;;  %vm2749_vm7 = vcmp.eq.s32.totalorder %v1972_v2, 1 }
 0x154   : > { %v1602_v12 = vunpack.i.h.bf16 %v1600_v7  ;;  %v1601_v38 = vunpack.i.l.bf16 %v1600_v7  ;;  %v1597_v61 = vunpack.i.h.bf16 %v2383_v0  ;;  %v1596_v17 = vunpack.i.l.bf16 %v2383_v0  ;;  %vm2433_vm9 = vmpackc.low %vm2749_vm7, %vm2748_vm11 }
 0x155   : > { %v2738_v7 = vmov 0  ;;  %v2742_v54 = vsel %vm2412_vm10, 4294967295, %v2741_v54  ;;  %v2751_v37 = vsel %vm2433_vm9, 4294967295, %v2750_v37  ;;  %vm2754_vm11 = vcmask 1039360  }
 0x156   : > { %v451_v4 = vsel %vm2647_vm12, %v1592_v5, %v1596_v17  ;;  %v452_v18 = vsel %vm2647_vm12, %v1596_v17, %v1597_v61  ;;  %v2739_v7 = vsel %vm2399_vm14, 4294967295, %v2738_v7  ;;  %v326_v50 = vsel %vm2645_vm3, %v1601_v38, %v1602_v12 }
 0x157   : > { %v2404_v23 = vpack.c.bf16 %v451_v4, %v392_v24  ;;  %v2406_v48 = vpack.c.bf16 %v452_v18, %v393_v35  ;;  %v923_v51 = vpop.permute.xlu0 %922  ;;  %v439_v5 = vpop.permute.xlu1 %438  ;;  %vm2745_vm3 = vcmp.eq.s32.totalorder %v1969_v1, 1  ;;  %v2438_v20 = vpack.c.bf16 %v326_v50, %v1704_v15 }
 0x158   : > { %v449_v17 = vsel %vm2647_vm12, %v439_v5, %v1591_v13  ;;  %vm2422_vm13 = vmpackc.low %vm2745_vm3, %vm2744_vm5  ;;  %vm2752_vm3 = vcmp.eq.s32.totalorder %v2163_v46, 1  ;;  %vm2753_vm5 = vcmp.eq.s32.totalorder %v2087_v26, 1  ;;  %vm2755_vm7 = vcmp.eq.s32.totalorder %v2171_v8, 1  ;;  %v2798_v8 = vld [vmem:[#allocation6_spill] sm:$0xff] }
 0x159   : > { %v1291_v4 = vpack.c.bf16 %v449_v17, %v390_v14  ;;  %1369 = vmatprep.subr.msk.bf16.mxu1 %vm2399_vm14, %v2406_v48  ;;  %v942_v1 = vsel %vm2752_vm3, %v2143_v58, 0.0  ;;  %v943_v2 = vsel %vm2753_vm5, %v2183_v63, 0.0  ;;  %vm2756_vm3 = vcmp.eq.s32.totalorder %v2076_v11, 1  ;;  %vm2759_vm5 = vmmov %vm2754_vm11  ;;  %v2795_v58 = vld [vmem:[#allocation4_spill] sm:$0xff] }
 0x15a   : > { %1372 = vmatpush1.bf16.msk.msra.mxu1 %vm2412_vm10, %v2404_v23  ;;  %vm2459_vm12 = vmpackc.low %vm2756_vm3, %vm2755_vm7  ;;  %v1040_v24 = vpack.c.bf16 %v942_v1, %v942_v1  ;;  %v1041_v35 = vpack.c.bf16 %v943_v2, %v943_v2  ;;  %vm2761_vm10 = vcmp.eq.s32.totalorder %v2154_v25, 1  ;;  %vm2765_vm7 = vcmp.eq.s32.totalorder %v2168_v57, 1 }
 0x15b   : > { %v315_v10 = vpop.permute.xlu0 %314  ;;  %v1605_v27 = vpop.permute.xlu1 %1604  ;;  %1292 = vmatpush1.bf16.msk.msra.mxu0 %vm2422_vm13, %v1291_v4  ;;  %v944_v11 = vsel %vm2765_vm7, %v2188_v41, 0.0  ;;  %vm1060_vm3 = vcmask 1043456   ;;  %v2770_v25 = vunpack.i.h.bf16 %v2151_v36  ;;  %vm2772_vm7 = vcmp.eq.s32.totalorder %v2157_v44, 1 }
 0x15c   : > { %v325_v15 = vsel %vm2754_vm11, %v315_v10, %v1601_v38  ;;  %v1607_v22 = vunpack.i.h.bf16 %v1605_v27  ;;  %v1606_v13 = vunpack.i.l.bf16 %v1605_v27  ;;  %1295 = vmatprep.subr.msk.bf16.mxu0 %vm2433_vm9, %v2438_v20  ;;  %vm2760_vm11 = vmmov %vm2759_vm5  ;;  %vm2762_vm9 = vcmp.eq.s32.totalorder %v2064_v39, 1 }
 0x15d   : > { %v1297_v53 = vpack.c.bf16 %v325_v15, %v1722_v21  ;;  %vm2470_vm14 = vmpackc.low %vm2762_vm9, %vm2761_vm10  ;;  %vm2766_vm10 = vcmp.eq.s32.totalorder %v2160_v30, 1  ;;  %vm2767_vm9 = vcmp.eq.s32.totalorder %v2070_v34, 1  ;;  %v1042_v30 = vpack.c.bf16 %v944_v11, %v944_v11 }
 0x15e   : > { %v327_v63 = vsel %vm2759_vm5, %v1602_v12, %v1606_v13  ;;  %v328_v38 = vsel %vm2760_vm11, %v1606_v13, %v1607_v22  ;;  %vm2487_vm5 = vmpackc.low %vm2767_vm9, %vm2766_vm10  ;;  %vm2771_vm11 = vcmask 900096   ;;  %v1062_v34 = vsel %vm1060_vm3, %v1040_v24, 0 }
 0x15f   : > { %v1319_v21 = vpack.c.bf16 %v327_v63, %v1706_v16  ;;  %v2479_v50 = vpack.c.bf16 %v328_v38, %v1714_v19  ;;  %v915_v12 = vpop.permute.xlu0 %914  ;;  %v939_v5 = vpop.permute.xlu1 %938  ;;  %1298 = vmatpush1.bf16.msk.msra.mxu0 %vm2459_vm12, %v1297_v53  ;;  %v2773_v17 = vunpack.i.h.bf16 %v2233_v31  ;;  %vm2774_vm10 = vcmask 916480   ;;  %v2792_v53 = vld [vmem:[#allocation5_spill] sm:$0xff] }
 0x160   : > { %v940_v16 = vsel %vm2771_vm11, %v2770_v25, %v939_v5  ;;  %1299 = vmatprep.subr.msk.bf16.mxu0 %vm1060_vm3, %v1041_v35  ;;  %v2775_v1 = vunpack.i.h.bf16 %v2247_v6  ;;  %vm2776_vm9 = vcmask 908288   ;;  %v1068_v2 = vsel %vm1060_vm3, %v1042_v30, 0  ;;  %v2804_v5 = vld [vmem:[#allocation3_spill] sm:$0xff] }
 0x161   : > { %v945_v19 = vsel %vm2772_vm7, %v940_v16, 0.0  ;;  %1375 = vmatprep.subr.msk.bf16.mxu1 %vm2470_vm14, %v2479_v50  ;;  %v924_v4 = vsel %vm2774_vm10, %v2773_v17, %v923_v51  ;;  %v2777_v31 = vunpack.i.h.bf16 %v2308_v62  ;;  %vm2778_vm11 = vcmask 965632  }
 0x162   : > { %v1043_v41 = vpack.c.bf16 %v945_v19, %v945_v19  ;;  %1378 = vmatpush1.bf16.msk.msra.mxu1 %vm2487_vm5, %v1319_v21  ;;  %v2779_v6 = vunpack.i.h.bf16 %v2317_v28  ;;  %v2787_v28 = vld [vmem:[#allocation9_spill] sm:$0xff]  ;;  %vm2788_vm7 = vnez %v2739_v7  ;;  %vm849_vm10 = vcmask 384000  }
 0x163   : > { %v899_v14 = vpop.permute.xlu0 %898  ;;  %v931_v36 = vpop.permute.xlu1 %930  ;;  %1094 = vmatpush2.bf16.msra.mxu0 %v1062_v34  ;;  %v916_v43 = vsel %vm2778_vm11, %v2777_v31, %v915_v12  ;;  %vm2794_vm11 = vcmp.eq.s32.totalorder %v2157_v44, 1  ;;  %v2801_v12 = vld [vmem:[#allocation7_spill] sm:$0xff]  ;;  %v1249_v39 = vcombine.low %v2804_v5, %v2804_v5 }
 0x164   : > { %v932_v10 = vsel %vm2776_vm9, %v2775_v1, %v931_v36  ;;  %1302 = vmatprep.subr.msk.bf16.mxu0 %vm2222_vm2, %v2269_v45  ;;  %1379 = vmatprep.subr.msk.bf16.mxu1 %vm1060_vm3, %v1043_v41  ;;  %vm2780_vm2 = vcmask 973824   ;;  %vm2781_vm3 = vnez %v2707_v40  ;;  %vm2793_vm9 = vcmp.eq.s32.totalorder %v2792_v53, 1 }
 0x165   : > { %v1381_v27 = vpack.c.bf16 %v932_v10, %v924_v4 }
 0x166   : > { %1135 = vmatpush2.bf16.msra.mxu1 %v1068_v2 }
 0x167   : > { %v891_v15 = vpop.permute.xlu0 %890  ;;  %v985_v13 = vpop.permute.xlu1 %984  ;;  %1305 = vmatpush2.bf16.msk.msra.mxu0 %vm2287_vm8, %v2231_v32  ;;  %1382 = vmatprep.subr.msk.bf16.mxu1 %vm2261_vm15, %v1381_v27  ;;  %vm2782_vm15 = vcmask 1031168   ;;  %vm2783_vm8 = vcmask 982016  }
 0x168   : > { %v986_v45 = vsel %vm2780_vm2, %v2779_v6, %v985_v13  ;;  %1308 = vmatprep.subr.msk.bf16.mxu0 %vm2297_vm1, %v2336_v47  ;;  %v900_v3 = vsel %vm2782_vm15, %v1587_v9, %v899_v14  ;;  %vm2784_vm1 = vcmask 1039360   ;;  %vm1404_vm2 = vmpackc.low %vm2794_vm11, %vm2793_vm9  ;;  %vm2799_vm15 = vcmp.eq.s32.totalorder %v2798_v8, 1 }
 0x169   : > { %v1387_v51 = vpack.c.bf16 %v916_v43, %v986_v45  ;;  %v892_v40 = vsel %vm2784_vm1, %v1607_v22, %v891_v15 }
 0x16a   : > { %1385 = vmatpush2.bf16.msk.msra.mxu1 %vm2781_vm3, %v2271_v55  ;;  %v1399_v9 = vpack.c.bf16 %v892_v40, %v2790_v52 }
 0x16b   : > { %v1615_v32 = vpop.permute.xlu0 %1614  ;;  %v907_v33 = vpop.permute.xlu1 %906  ;;  %1311 = vmatpush2.bf16.msk.msra.mxu0 %vm2352_vm0, %v2306_v59  ;;  %1388 = vmatprep.subr.msk.bf16.mxu1 %vm2328_vm4, %v1387_v51  ;;  %v2785_v59 = vld [vmem:[#allocation8_spill] sm:$0xff]  ;;  %vm872_vm4 = vcmask 375808  }
 0x16c   : > { %v908_v56 = vsel %vm2783_vm8, %v1597_v61, %v907_v33  ;;  %1314 = vmatprep.subr.msk.bf16.mxu0 %vm2368_vm6, %v2404_v23  ;;  %vm2786_vm0 = vnez %v2785_v59  ;;  %v1617_v47 = vunpack.i.h.bf16 %v1615_v32  ;;  %v1616_v42 = vunpack.i.l.bf16 %v1615_v32 }
 0x16d   : > { %v1393_v55 = vpack.c.bf16 %v908_v56, %v900_v3  ;;  %vm2789_vm6 = vnez %v2751_v37  ;;  %vm2800_vm8 = vcmp.eq.s32.totalorder %v2168_v57, 1 }
 0x16e   : > { %1391 = vmatpush2.bf16.msk.msra.mxu1 %vm2786_vm0, %v2338_v49  ;;  %v853_v22 = vsel %vm849_vm10, %v1616_v42, %v1617_v47  ;;  %vm1407_vm1 = vmpackc.low %vm2800_vm8, %vm2799_vm15  ;;  %vm2803_vm0 = vcmp.eq.s32.totalorder %v2163_v46, 1 }
 0x16f   : > { %v1625_v29 = vpop.permute.xlu0 %1624  ;;  %v1610_v62 = vpop.permute.xlu1 %1609  ;;  %1317 = vmatpush2.bf16.msk.msra.mxu0 %vm2422_vm13, %v2787_v28  ;;  %1394 = vmatprep.subr.msk.bf16.mxu1 %vm2788_vm7, %v1393_v55  ;;  %vm2791_vm13 = vnez %v2742_v54 }
 0x170   : > { %v1627_v60 = vunpack.i.h.bf16 %v1625_v29  ;;  %v1626_v23 = vunpack.i.l.bf16 %v1625_v29  ;;  %1320 = vmatprep.subr.msk.bf16.mxu0 %vm2789_vm6, %v1319_v21  ;;  %v1612_v0 = vunpack.i.h.bf16 %v1610_v62  ;;  %v1611_v61 = vunpack.i.l.bf16 %v1610_v62 }
 0x172   : > { %v876_v49 = vsel %vm872_vm4, %v1626_v23, %v1627_v60  ;;  %1397 = vmatpush2.bf16.msk.msra.mxu1 %vm2791_vm13, %v2406_v48  ;;  %v852_v63 = vsel %vm849_vm10, %v1612_v0, %v1616_v42 }
 0x173   : > { %v1620_v7 = vpop.permute.xlu1 %1619  ;;  %1323 = vmatpush2.bf16.msk.msra.mxu0 %vm2459_vm12, %v2438_v20  ;;  %1400 = vmatprep.subr.msk.bf16.mxu1 %vm2470_vm14, %v1399_v9  ;;  %v1405_v24 = vpack.c.bf16 %v876_v49, %v853_v22  ;;  %v851_v20 = vsel %vm849_vm10, %v1611_v61, %v1612_v0  ;;  %vm2796_vm12 = vcmp.eq.s32.totalorder %v2795_v58, 1  ;;  %vm2797_vm14 = vcmp.eq.s32.totalorder %v2087_v26, 1  ;;  %v863_v44 = vpop.permute.xlu0 %862 }
 0x174   : > { %v1622_v18 = vunpack.i.h.bf16 %v1620_v7  ;;  %v1621_v37 = vunpack.i.l.bf16 %v1620_v7  ;;  %vm1324_vm3 = vmpackc.low %vm2797_vm14, %vm2796_vm12 }
 0x176   : > { %v875_v48 = vsel %vm872_vm4, %v1622_v18, %v1626_v23  ;;  %v874_v54 = vsel %vm872_vm4, %v1621_v37, %v1622_v18  ;;  %1403 = vmatpush2.bf16.msk.msra.mxu1 %vm2487_vm5, %v2479_v50  ;;  %v873_v50 = vsel %vm872_vm4, %v863_v44, %v1621_v37  ;;  %vm2802_vm5 = vcmp.eq.s32.totalorder %v2801_v12, 1 }
 0x177   : > { %v840_v38 = vpop.permute.xlu1 %839  ;;  %1406 = vmatprep.subr.msk.bf16.mxu1 %vm1404_vm2, %v1405_v24  ;;  %v1325_v35 = vpack.c.bf16 %v874_v54, %v851_v20  ;;  %v1408_v11 = vpack.c.bf16 %v875_v48, %v852_v63  ;;  %vm1327_vm7 = vmpackc.low %vm2803_vm0, %vm2802_vm5 }
 0x178   : > { %v850_v21 = vsel %vm849_vm10, %v840_v38, %v1611_v61 }
 0x179   : > { %v1328_v26 = vpack.c.bf16 %v873_v50, %v850_v21  ;;  %1326 = vmatprep.subr.msk.bf16.mxu0 %vm1324_vm3, %v1325_v35 }
 0x17a   : > { %1409 = vmatpush2.bf16.msk.msra.mxu1 %vm1407_vm1, %v1408_v11 }
 0x17b   : > { %1329 = vmatpush2.bf16.msk.msra.mxu0 %vm1327_vm7, %v1328_v26 }
 0x17d   : > { %1147 = vmatmul.mubr.bf16.vlgmr.msra.gmra.mxu1 %v1249_v39 }
 0x17e   : > { %1106 = vmatmul.mubr.bf16.vlgmr.msra.gmra.mxu0 %v1249_v39 }
 0x184   : > { %v1048_v57 = vpop.permute.xlu1 %1047 }
 0x23d   : > { %v1148_v25 = vpop.f32.mrf.mxu1 }
 0x23e   : > { %v1149_v16 = vadd.f32 %v1148_v25, %v1048_v57  ;;  %v1107_v19 = vpop.f32.mrf.mxu0 }
 0x23f   : > { %v1108_v30 = vadd.f32 %v1107_v19, %v1048_v57  ;;  %v1150_v41 = vpop.f32.mrf.mxu1 }
 0x240   : > { %v1161_v34 = vmul.f32 0.01, %v1149_v16  ;;  %v1151_v14 = vadd.f32 %v1150_v41, %v1048_v57  ;;  %v1109_v46 = vpop.f32.mrf.mxu0  ;;  %vm1157_vm4 = vcmp.gt.f32.partialorder %v1149_v16, 0.0 }
 0x241   : > { %v1159_v36 = vmul.f32 0.01, %v1108_v30  ;;  %v1110_v17 = vadd.f32 %v1109_v46, %v1048_v57  ;;  %v1152_v4 = vpop.f32.mrf.mxu1  ;;  %vm1155_vm6 = vcmp.gt.f32.partialorder %v1108_v30, 0.0 }
 0x242   : > { %vm1158_vm10 = vcmp.gt.f32.partialorder %v1151_v14, 0.0  ;;  %v1162_v1 = vmul.f32 0.01, %v1151_v14  ;;  %v1111_v10 = vpop.f32.mrf.mxu0  ;;  %v1165_v15 = vsel %vm1157_vm4, %v1149_v16, %v1161_v34 }
 0x243   : > { %vm1156_vm13 = vcmp.gt.f32.partialorder %v1110_v17, 0.0  ;;  %v1160_v27 = vmul.f32 0.01, %v1110_v17  ;;  %v1153_v2 = vpop.f32.mrf.mxu1  ;;  %v1163_v43 = vsel %vm1155_vm6, %v1108_v30, %v1159_v36 }
 0x244   : > { %v1166_v13 = vsel %vm1158_vm10, %v1151_v14, %v1162_v1  ;;  %v1112_v31 = vpop.f32.mrf.mxu0 }
 0x245   : > { %v1418_v6 = vpack.c.bf16 %v1166_v13, %v1165_v15  ;;  %v1164_v45 = vsel %vm1156_vm13, %v1110_v17, %v1160_v27 }
 0x246   : > { %v1417_v51 = vpack.c.bf16 %v1164_v45, %v1163_v43 }
 0x247   : > { %1184 = vst [vmem:[%s197_s24 + $0x8] sm:$0xff] %v1418_v6 }
 0x248   : > { %1183 = vst [vmem:[%s197_s24] sm:$0xff] %v1417_v51 }
 0x249 PF: > { %s14_s15 = sadd.s32 1, %s1638_s15  }
 0x24a   : > { %p11_p4 = scmp.ge.s32.totalorder %s14_s15, 4  }
 0x24c   :  { %13 = sbr.rel (!%p11_p4) target bundleno = 1 (0x1), region = 66 }

// kernel: encode_forward.3
= control target key start
LH: loop header
LB: loop body
LE: loop exit
PB: predicated region body
PF: predicated region fallthrough
CT: control target
= control target key end

     0   :  { %s2184_s21 = smov 0   ;;  %s3360_s0 = inlined_call_operand.vmem [shape: s32[2,512], index: 0, kind: input, shape index: {}]   ;;  %s3361_s1 = inlined_call_operand.vmem [shape: f32[512,64], index: 1, kind: input, shape index: {}]   ;;  %s3362_s2 = inlined_call_operand.vmem [shape: bf16[2,8,512], index: 2, kind: input, shape index: {}]   ;;  %s3363_s3 = inlined_call_operand.vmem [shape: bf16[8,216], index: 3, kind: input, shape index: {}]   ;;  %s3364_s4 = inlined_call_operand.vmem [shape: f32[8,1], index: 4, kind: input, shape index: {}]   ;;  %s3365_s5 = inlined_call_operand.vmem [shape: f32[2,8,512], index: 5, kind: output, shape index: {0}]   ;;  %s3366_s6 = inlined_call_operand.vmem [shape: f32[2,8,64], index: 6, kind: output, shape index: {1}]  }
   0x1 LB: > { %s1629_s22 = sadd.s32 4294967295, %s2126_s21   ;;  %p1633_p0 = scmp.ge.s32.totalorder %s2126_s21, 1  ;;  %s2126_s21 = sphi %s2184_s21, %s17_s21  }
   0x2   : > { %p215_p1 = scmp.lt.s32.totalorder %s2126_s21, 3 }
   0x4   : > { %p216_p2 = pnand %p1633_p0, %p215_p1 }
   0x6   : > { %219 = sbr.rel (%p216_p2) target bundleno = 1462 (0x5b6), region = 40 }
   0xb   : > { %p249_p3 = scmp.lt.s32.totalorder %s1629_s22, 1  ;;  %s2128_s27 = smov 73   ;;  %v2129_v9 = vmov 0   ;;  %vm284_vm0 = vcmask 596992   ;;  %v2292_v22 = vld [vmem:[%s3360_s0] sm:$0xff]  ;;  %v2145_v23 = vmov 0.0   ;;  %v301_v26 = vlaneseq }
   0xc   : > { %2084 = vset.pattern.permute.xlu1 %v2129_v9  ;;  %2115 = vset.pattern.permute.xlu0 %v2129_v9  ;;  %s2130_s28 = smov 54   ;;  %s2131_s29 = smov 56   ;;  %vm402_vm1 = vcmp.lt.s32.totalorder %v2292_v22, 7  ;;  %vm295_vm2 = vcmp.ge.s32.totalorder %v2292_v22, 1  ;;  %v2379_v44 = vld [vmem:[%s3363_s3] sm:$0xff]  ;;  %vm1121_vm9 = vcmask 719872  }
   0xd   : > { %s3586_s22 = smov (!%p249_p3, %s1629_s22), 1  ;;  %s2132_s30 = smov 48   ;;  %v2301_v24 = vsel %vm402_vm1, 1, %v2129_v9  ;;  %v2315_v28 = vshrl.u32 %v301_v26, 7  ;;  %v2324_v29 = vsel %vm295_vm2, 1, %v2129_v9  ;;  %3426 = vst [vmem:[#allocation3_spill] sm:$0xff] %v2379_v44  ;;  %v1640_v47 = vcombine.high %v2379_v44, %v2379_v44 }
   0xe   : > { %s1803_s23 = sshll.u32 %s3586_s22, 4  ;;  %s2133_s7 = smov 63   ;;  %v404_v25 = vrot.slane %v2301_v24, 7  ;;  %v297_v35 = vrot.slane %v2324_v29, 7  ;;  %v3427_v48 = vmov 0  ;;  %v3430_v50 = vmov 0 }
   0xf   : > { %s253_s26 = scalar_lea.vmem %s3362_s2, %s1803_s23  ;;  %s2134_s8 = smov 55   ;;  %v2327_v30 = vsub.s32 7, %v2315_v28  ;;  %v2337_v33 = vsub.s32 5, %v2315_v28  ;;  %v2343_v36 = vsub.s32 1, %v2315_v28  ;;  %v2382_v45 = vsub.s32 3, %v2315_v28  ;;  %1720 = vmatprep.mubr.msk.bf16.mxu0 %vm1121_vm9, %v1640_v47  ;;  %1800 = vmatprep.mubr.msk.bf16.mxu1 %vm1121_vm9, %v1640_v47 }
  0x10   : > { %v264_v0 = vld [vmem:[%s253_s26] sm:$0xff]  ;;  %v265_v1 = vld [vmem:[%s253_s26 + $0x8] sm:$0xff]  ;;  %s2135_s9 = smov 62   ;;  %s2136_s10 = smov 110   ;;  %vm2309_vm3 = vcmp.ne.s32.totalorder %v404_v25, 0  ;;  %vm2357_vm5 = vcmp.ne.s32.totalorder %v297_v35, 0 }
  0x11   : > { %v266_v2 = vunpack.c.l.bf16 %v264_v0  ;;  %v267_v3 = vunpack.c.h.bf16 %v264_v0  ;;  %v268_v4 = vunpack.c.l.bf16 %v265_v1  ;;  %v269_v5 = vunpack.c.h.bf16 %v265_v1  ;;  %s2137_s11 = smov 64   ;;  %s2138_s12 = smov 112   ;;  %vm705_vm4 = vmand %vm402_vm1, %vm2309_vm3 }
  0x12   : > { %s2139_s13 = smov 111   ;;  %s2140_s14 = smov 118   ;;  %v2330_v31 = vsel %vm705_vm4, 1, %v2129_v9  ;;  %v661_v32 = vrot.slane %v2301_v24, %v2327_v30  ;;  %v657_v38 = vrot.slane %v2301_v24, %v2337_v33  ;;  %vm585_vm6 = vmand %vm402_vm1, %vm2357_vm5  ;;  %v473_v46 = vsub.s32 2, %v2315_v28 }
  0x13   : > { %v1904_v6 = vpack.i.bf16 %v267_v3, %v266_v2  ;;  %v1909_v7 = vpack.i.bf16 %v269_v5, %v268_v4  ;;  %s2141_s15 = smov 126   ;;  %s2142_s16 = smov 119   ;;  %v722_v34 = vrot.slane %v2330_v31, %v2327_v30  ;;  %v718_v37 = vrot.slane %v2330_v31, %v2337_v33  ;;  %v1109_v4 = vld [vmem:[%s3364_s4] sm:$0xff] }
  0x14   : > { %s2143_s17 = smov 120   ;;  %s2144_s18 = smov 127   ;;  %v2352_v39 = vrot.slane %v661_v32, %v2343_v36  ;;  %v2365_v43 = vrot.slane %v657_v38, %v2343_v36  ;;  %v586_v49 = vsel %vm585_vm6, 1, %v2129_v9  ;;  %v2409_v51 = vsub.s32 0, %v2315_v28 }
  0x15   : > { %1905 = vrot.lane.b32.xlu0 %v1904_v6, %s2128_s27  ;;  %v2355_v40 = vrot.slane %v722_v34, %v2343_v36  ;;  %v2362_v42 = vrot.slane %v718_v37, %v2343_v36  ;;  %s2146_s23 = smov 47   ;;  %s2147_s26 = smov 46   ;;  %v533_v52 = vrot.slane %v2301_v24, %v473_v46  ;;  %v594_v53 = vrot.slane %v586_v49, %v2382_v45 }
  0x16   : > { %vm3368_vm7 = vcmp.eq.s32.totalorder %v2352_v39, 1  ;;  %vm3367_vm12 = vcmp.eq.s32.totalorder %v2365_v43, 1  ;;  %v481_v54 = vsub.s32 6, %v2315_v28  ;;  %v477_v55 = vsub.s32 4, %v2315_v28 }
  0x17   : > { %vm3370_vm8 = vcmp.eq.s32.totalorder %v2355_v40, 1  ;;  %vm3369_vm11 = vcmp.eq.s32.totalorder %v2362_v42, 1  ;;  %v549_v58 = vrot.slane %v533_v52, %v2409_v51  ;;  %v2424_v59 = vrot.slane %v594_v53, %v2343_v36 }
  0x18   : > { %vm2391_vm10 = vmpackc.low %vm3370_vm8, %vm3368_vm7  ;;  %v529_v60 = vrot.slane %v2301_v24, %v2409_v51  ;;  %v590_v61 = vrot.slane %v586_v49, %v2343_v36  ;;  %vm868_vm14 = vcmask 441344   ;;  %v541_v62 = vrot.slane %v2301_v24, %v481_v54 }
  0x19   : > { %1910 = vrot.lane.b32.xlu0 %v1909_v7, %s2128_s27  ;;  %v3428_v48 = vsel %vm2391_vm10, 4294967295, %v3427_v48  ;;  %vm2402_vm13 = vmpackc.low %vm3369_vm11, %vm3367_vm12  ;;  %v602_v63 = vrot.slane %v586_v49, %v2327_v30  ;;  %v598_v0 = vrot.slane %v586_v49, %v2337_v33  ;;  %vm891_vm15 = vcmask 392192  }
  0x1a   : > { %3429 = vst [vmem:[#allocation4_spill] sm:$0xff] %v3428_v48  ;;  %v3431_v50 = vsel %vm2402_vm13, 4294967295, %v3430_v50  ;;  %v537_v3 = vrot.slane %v2301_v24, %v477_v55  ;;  %vm3371_vm1 = vcmp.eq.s32.totalorder %v2424_v59, 1  ;;  %v474_v37 = vrot.slane %v2324_v29, %v473_v46  ;;  %vm2485_vm11 = vmand %vm295_vm2, %vm2309_vm3 }
  0x1b   : > { %3432 = vst [vmem:[#allocation5_spill] sm:$0xff] %v3431_v50  ;;  %vm3407_vm10 = vcmask 1031168   ;;  %v3502_v52 = vmov 0 }
  0x1c   : > { %v553_v26 = vrot.slane %v537_v3, %v2409_v51  ;;  %v348_v3 = vrot.slane %v2324_v29, %v2382_v45 }
  0x1e   : > { %vm2495_vm8 = vcmp.eq.s32.totalorder %v553_v26, 1 }
  0x87   : > { %v1906_v8 = vpop.permute.xlu0 %1905 }
  0x88   : > { %v1908_v10 = vunpack.i.h.bf16 %v1906_v8  ;;  %v1907_v11 = vunpack.i.l.bf16 %v1906_v8  ;;  %v2452_v8 = vrot.slane %v529_v60, %v2409_v51 }
  0x8a   : > { %v2201_v15 = vsel %vm284_vm0, %v1907_v11, %v1908_v10  ;;  %v2204_v16 = vsel %vm284_vm0, 0.0, %v1907_v11  ;;  %vm3372_vm6 = vcmp.eq.s32.totalorder %v2452_v8, 1 }
  0x8b   : > { %v1911_v12 = vpop.permute.xlu0 %1910 }
  0x8c   : > { %v1913_v13 = vunpack.i.h.bf16 %v1911_v12  ;;  %v1912_v14 = vunpack.i.l.bf16 %v1911_v12 }
  0x8e   : > { %v2207_v17 = vsel %vm284_vm0, %v1908_v10, %v1912_v14  ;;  %v2210_v18 = vsel %vm284_vm0, %v1912_v14, %v1913_v13  ;;  %v2225_v21 = vsel %vm284_vm0, %v1913_v13, 0.0  ;;  %vm2446_vm0 = vcmp.eq.s32.totalorder %v549_v58, 1 }
  0x8f   : > { %v2214_v19 = vpack.i.bf16 %v2210_v18, %v2204_v16  ;;  %v2218_v20 = vpack.i.bf16 %v2207_v17, %v2201_v15  ;;  %3421 = vst [vmem:[#allocation2_spill] sm:$0xff] %v2225_v21  ;;  %v2455_v10 = vrot.slane %v590_v61, %v2343_v36  ;;  %v557_v13 = vrot.slane %v541_v62, %v2409_v51  ;;  %vm1641_vm4 = vmpackc.low %vm3371_vm1, %vm2446_vm0 }
  0x90   : > { %v2459_v14 = vrot.slane %v602_v63, %v2343_v36  ;;  %v490_v62 = vrot.slane %v474_v37, %v2409_v51  ;;  %v470_v63 = vrot.slane %v2324_v29, %v2409_v51  ;;  %v2538_v37 = vrot.slane %v348_v3, %v2343_v36 }
  0x91   : > { %1925 = vrot.lane.b32.xlu0 %v2214_v19, %s2130_s28  ;;  %1915 = vrot.lane.b32.xlu1 %v2218_v20, %s2130_s28  ;;  %vm3375_vm9 = vcmp.eq.s32.totalorder %v2455_v10, 1  ;;  %vm2476_vm12 = vcmp.eq.s32.totalorder %v557_v13, 1 }
  0x92   : > { %vm3374_vm7 = vcmp.eq.s32.totalorder %v2459_v14, 1 }
  0x93   : > { %vm1721_vm3 = vmpackc.low %vm3374_vm7, %vm2476_vm12  ;;  %vm3382_vm7 = vcmask 506880  }
  0x95   : > { %1935 = vrot.lane.b32.xlu0 %v2218_v20, %s2131_s29  ;;  %1920 = vrot.lane.b32.xlu1 %v2218_v20, %s2132_s30 }
  0x99   : > { %889 = vrot.lane.b32.xlu0 %v2225_v21, %s2132_s30  ;;  %1930 = vrot.lane.b32.xlu1 %v2214_v19, %s2132_s30 }
  0x9d   : > { %1945 = vrot.lane.b32.xlu0 %v2214_v19, %s2131_s29  ;;  %866 = vrot.lane.b32.xlu1 %v2225_v21, %s2130_s28 }
  0xa1   : > { %1955 = vrot.lane.b32.xlu0 %v2218_v20, %s2133_s7  ;;  %1940 = vrot.lane.b32.xlu1 %v2218_v20, %s2134_s8 }
  0xa5   : > { %843 = vrot.lane.b32.xlu0 %v2225_v21, %s2131_s29  ;;  %1950 = vrot.lane.b32.xlu1 %v2214_v19, %s2134_s8  ;;  %s1804_s29 = sshll.u32 %s3586_s22, 5 }
  0xa9   : > { %1965 = vrot.lane.b32.xlu0 %v2214_v19, %s2133_s7  ;;  %1960 = vrot.lane.b32.xlu1 %v2218_v20, %s2135_s9 }
  0xad   : > { %1975 = vrot.lane.b32.xlu0 %v2218_v20, %s2136_s10  ;;  %1038 = vrot.lane.b32.xlu1 %v2225_v21, %s2134_s8  ;;  %s258_s8 = scalar_lea.vmem %s3365_s5, %s1804_s29 }
  0xb1   : > { %797 = vrot.lane.b32.xlu0 %v2225_v21, %s2133_s7  ;;  %1970 = vrot.lane.b32.xlu1 %v2214_v19, %s2135_s9 }
  0xb5   : > { %1985 = vrot.lane.b32.xlu0 %v2214_v19, %s2136_s10  ;;  %1980 = vrot.lane.b32.xlu1 %v2218_v20, %s2137_s11 }
  0xb9   : > { %1995 = vrot.lane.b32.xlu0 %v2218_v20, %s2138_s12  ;;  %820 = vrot.lane.b32.xlu1 %v2225_v21, %s2135_s9 }
  0xbd   : > { %751 = vrot.lane.b32.xlu0 %v2225_v21, %s2136_s10  ;;  %1990 = vrot.lane.b32.xlu1 %v2214_v19, %s2137_s11 }
  0xc1   : > { %2005 = vrot.lane.b32.xlu0 %v2214_v19, %s2138_s12  ;;  %2000 = vrot.lane.b32.xlu1 %v2218_v20, %s2139_s13 }
  0xc5   : > { %2015 = vrot.lane.b32.xlu0 %v2218_v20, %s2140_s14  ;;  %774 = vrot.lane.b32.xlu1 %v2225_v21, %s2137_s11 }
  0xc9   : > { %690 = vrot.lane.b32.xlu0 %v2225_v21, %s2139_s13  ;;  %2010 = vrot.lane.b32.xlu1 %v2214_v19, %s2139_s13 }
  0xcd   : > { %2025 = vrot.lane.b32.xlu0 %v2214_v19, %s2140_s14  ;;  %631 = vrot.lane.b32.xlu1 %v2225_v21, %s2138_s12 }
  0xd1   : > { %2035 = vrot.lane.b32.xlu0 %v2218_v20, %s2141_s15  ;;  %2020 = vrot.lane.b32.xlu1 %v2218_v20, %s2142_s16 }
  0xd5   : > { %570 = vrot.lane.b32.xlu0 %v2225_v21, %s2140_s14  ;;  %2030 = vrot.lane.b32.xlu1 %v2214_v19, %s2142_s16 }
  0xd9   : > { %2045 = vrot.lane.b32.xlu0 %v2214_v19, %s2141_s15  ;;  %2040 = vrot.lane.b32.xlu1 %v2218_v20, %s2143_s17 }
  0xdd   : > { %2055 = vrot.lane.b32.xlu0 %v2218_v20, %s2144_s18  ;;  %1019 = vrot.lane.b32.xlu1 %v2225_v21, %s2142_s16 }
  0xe1   : > { %511 = vrot.lane.b32.xlu0 %v2225_v21, %s2143_s17  ;;  %2050 = vrot.lane.b32.xlu1 %v2214_v19, %s2143_s17 }
  0xe5   : > { %987 = vrot.lane.b32.xlu0 %v2145_v23, %s2138_s12  ;;  %452 = vrot.lane.b32.xlu1 %v2225_v21, %s2141_s15 }
  0xe9   : > { %387 = vrot.lane.b32.xlu0 %v2225_v21, %s2144_s18  ;;  %2060 = vrot.lane.b32.xlu1 %v2214_v19, %s2144_s18 }
  0xed   : > { %979 = vrot.lane.b32.xlu0 %v2145_v23, %s2140_s14  ;;  %1003 = vrot.lane.b32.xlu1 %v2145_v23, %s2136_s10 }
  0xf1   : > { %963 = vrot.lane.b32.xlu0 %v2145_v23, %s2141_s15  ;;  %995 = vrot.lane.b32.xlu1 %v2145_v23, %s2139_s13 }
  0xf5   : > { %955 = vrot.lane.b32.xlu0 %v2145_v23, %s2144_s18  ;;  %1049 = vrot.lane.b32.xlu1 %v2145_v23, %s2142_s16 }
  0xf9   : > { %2065 = vrot.lane.b32.xlu0 %v2218_v20, %s2146_s23  ;;  %971 = vrot.lane.b32.xlu1 %v2145_v23, %s2143_s17 }
  0xfd   : > { %2080 = vrot.lane.b32.xlu0 %v2214_v19, %s2147_s26  ;;  %2070 = vrot.lane.b32.xlu1 %v2218_v20, %s2147_s26 }
 0x101   : > { %935 = vrot.lane.b32.xlu0 %v2225_v21, %s2147_s26  ;;  %2075 = vrot.lane.b32.xlu1 %v2214_v19, %s2146_s23  ;;  %v2462_v19 = vrot.slane %v598_v0, %v2343_v36 }
 0x103   : > { %v2418_v56 = vpop.permute.xlu0 %1925  ;;  %v2420_v57 = vpop.permute.xlu1 %1915  ;;  %vm3373_vm1 = vcmp.eq.s32.totalorder %v2462_v19, 1 }
 0x104   : > { %v1918_v1 = vunpack.i.h.bf16 %v2420_v57  ;;  %v1917_v2 = vunpack.i.l.bf16 %v2420_v57  ;;  %v1927_v20 = vunpack.i.l.bf16 %v2418_v56  ;;  %v1928_v49 = vunpack.i.h.bf16 %v2418_v56 }
 0x105   : > { %912 = vrot.lane.b32.xlu1 %v2225_v21, %s2146_s23 }
 0x106   : > { %v870_v23 = vsel %vm868_vm14, %v1917_v2, %v1918_v1  ;;  %v869_v46 = vsel %vm868_vm14, %v1927_v20, %v1917_v2 }
 0x107   : > { %v2444_v5 = vpop.permute.xlu0 %1935  ;;  %v1921_v6 = vpop.permute.xlu1 %1920 }
 0x108   : > { %v1923_v11 = vunpack.i.h.bf16 %v1921_v6  ;;  %v1922_v12 = vunpack.i.l.bf16 %v1921_v6  ;;  %v1937_v13 = vunpack.i.l.bf16 %v2444_v5 }
 0x109   : > { %1112 = vperm.xlu1 %2084, %v1109_v4   ;;  %v2517_v4 = vsel %vm2485_vm11, 1, %v2129_v9  ;;  %vm3376_vm11 = vcmask 457728  }
 0x10a   : > { %v893_v25 = vsel %vm891_vm15, %v1922_v12, %v1923_v11 }
 0x10b   : > { %v890_v32 = vpop.permute.xlu0 %889  ;;  %v1931_v34 = vpop.permute.xlu1 %1930  ;;  %v1642_v35 = vpack.c.bf16 %v893_v25, %v870_v23 }
 0x10c   : > { %v1933_v38 = vunpack.i.h.bf16 %v1931_v34  ;;  %v1932_v47 = vunpack.i.l.bf16 %v1931_v34 }
 0x10d   : > { %1643 = vmatprep.subr.msk.bf16.mxu0 %vm1641_vm4, %v1642_v35  ;;  %vm1644_vm4 = vmpackc.low %vm3375_vm9, %vm3372_vm6  ;;  %vm1040_vm6 = vcmask 449536   ;;  %vm3378_vm9 = vcmp.eq.s32.totalorder %v2538_v37, 1 }
 0x10e   : > { %v892_v57 = vsel %vm891_vm15, %v1932_v47, %v1922_v12  ;;  %v894_v61 = vsel %vm891_vm15, %v1923_v11, %v1933_v38  ;;  %v895_v2 = vsel %vm891_vm15, %v1933_v38, %v890_v32  ;;  %v871_v11 = vsel %vm868_vm14, %v1918_v1, %v1928_v49  ;;  %vm1724_vm15 = vmpackc.low %vm3373_vm1, %vm2495_vm8 }
 0x10f   : > { %v2500_v27 = vpop.permute.xlu0 %1945  ;;  %v867_v58 = vpop.permute.xlu1 %866  ;;  %v1645_v60 = vpack.c.bf16 %v892_v57, %v869_v46  ;;  %v1938_v12 = vunpack.i.h.bf16 %v2444_v5  ;;  %v1725_v20 = vpack.c.bf16 %v894_v61, %v871_v11  ;;  %v2533_v1 = vrot.slane %v470_v63, %v2409_v51 }
 0x110   : > { %v872_v0 = vsel %vm868_vm14, %v1928_v49, %v867_v58  ;;  %v415_v32 = vrot.slane %v2517_v4, %v2382_v45  ;;  %v482_v38 = vrot.slane %v2324_v29, %v481_v54  ;;  %v478_v47 = vrot.slane %v2324_v29, %v477_v55 }
 0x111   : > { %1646 = vmatpush1.bf16.msk.msra.mxu0 %vm1644_vm4, %v1645_v60  ;;  %v1722_v6 = vpack.c.bf16 %v895_v2, %v872_v0  ;;  %vm2528_vm4 = vcmp.eq.s32.totalorder %v490_v62, 1  ;;  %v1947_v49 = vunpack.i.l.bf16 %v2500_v27  ;;  %v847_v46 = vsel %vm3376_vm11, %v1937_v13, %v1938_v12  ;;  %vm2563_vm11 = vmand %vm295_vm2, %vm2357_vm5 }
 0x112   : > { %vm3380_vm14 = vmmov 1   ;;  %v2556_v28 = vrot.slane %v415_v32, %v2343_v36  ;;  %vm3385_vm1 = vcmask 515072   ;;  %v498_v61 = vrot.slane %v482_v38, %v2409_v51 }
 0x113   : > { %v2526_v23 = vpop.permute.xlu0 %1955  ;;  %v1941_v25 = vpop.permute.xlu1 %1940  ;;  %1723 = vmatprep.subr.msk.bf16.mxu1 %vm1721_vm3, %v1722_v6  ;;  %vm1647_vm3 = vmpackc.low %vm3380_vm14, %vm2528_vm4  ;;  %v494_v62 = vrot.slane %v478_v47, %v2409_v51  ;;  %v344_v63 = vrot.slane %v2324_v29, %v2343_v36  ;;  %v411_v0 = vrot.slane %v2517_v4, %v2343_v36  ;;  %vm3445_vm2 = vcmask 457728  }
 0x114   : > { %v1943_v34 = vunpack.i.h.bf16 %v1941_v25  ;;  %v1942_v35 = vunpack.i.l.bf16 %v1941_v25  ;;  %1726 = vmatpush1.bf16.msk.msra.mxu1 %vm1724_vm15, %v1725_v20  ;;  %vm3377_vm15 = vcmp.eq.s32.totalorder %v2533_v1, 1  ;;  %v1958_v2 = vunpack.i.h.bf16 %v2526_v23 }
 0x115   : > { %v1957_v41 = vunpack.i.l.bf16 %v2526_v23  ;;  %v846_v3 = vsel %vm3445_vm2, %v1947_v49, %v1937_v13  ;;  %vm1650_vm5 = vmpackc.low %vm3380_vm14, %vm3377_vm15  ;;  %v714_v25 = vrot.slane %v2330_v31, %v2382_v45  ;;  %v2592_v13 = vsel %vm2563_vm11, 1, %v2129_v9 }
 0x116   : > { %v1042_v53 = vsel %vm1040_vm6, %v1942_v35, %v1943_v34  ;;  %v1948_v38 = vunpack.i.h.bf16 %v2500_v27  ;;  %vm2595_vm2 = vcmp.eq.s32.totalorder %v498_v61, 1  ;;  %vm2599_vm15 = vcmp.eq.s32.totalorder %v494_v62, 1 }
 0x117   : > { %v844_v57 = vpop.permute.xlu0 %843  ;;  %v1951_v58 = vpop.permute.xlu1 %1950  ;;  %v1648_v54 = vpack.c.bf16 %v1042_v53, %v847_v46  ;;  %v801_v53 = vsel %vm3385_vm1, %v1957_v41, %v1958_v2  ;;  %v2614_v27 = vrot.slane %v344_v63, %v2343_v36  ;;  %v2617_v46 = vrot.slane %v411_v0, %v2343_v36 }
 0x118   : > { %v1952_v55 = vunpack.i.l.bf16 %v1951_v58  ;;  %v1953_v6 = vunpack.i.h.bf16 %v1951_v58  ;;  %v308_v61 = vrot.slane %v2592_v13, %v2382_v45  ;;  %v2625_v62 = vrot.slane %v714_v25, %v2343_v36 }
 0x119   : > { %1649 = vmatprep.subr.msk.bf16.mxu0 %vm1647_vm3, %v1648_v54  ;;  %vm3379_vm3 = vcmp.eq.s32.totalorder %v2556_v28, 1  ;;  %v423_v0 = vrot.slane %v2517_v4, %v2327_v30 }
 0x11a   : > { %v1041_v22 = vsel %vm1040_vm6, %v1952_v55, %v1942_v35  ;;  %vm1653_vm11 = vmpackc.low %vm3379_vm3, %vm3378_vm9  ;;  %v1043_v58 = vsel %vm1040_vm6, %v1943_v34, %v1953_v6  ;;  %v356_v34 = vrot.slane %v2324_v29, %v2327_v30  ;;  %v2650_v5 = vrot.slane %v308_v61, %v2343_v36 }
 0x11b   : > { %v2580_v51 = vpop.permute.xlu0 %1965  ;;  %v2582_v11 = vpop.permute.xlu1 %1960  ;;  %v1651_v20 = vpack.c.bf16 %v1041_v22, %v846_v3  ;;  %vm1727_vm9 = vmpackc.low %vm3380_vm14, %vm2595_vm2 }
 0x11c   : > { %v1963_v32 = vunpack.i.h.bf16 %v2582_v11  ;;  %v1962_v35 = vunpack.i.l.bf16 %v2582_v11  ;;  %v1967_v25 = vunpack.i.l.bf16 %v2580_v51 }
 0x11d   : > { %1652 = vmatpush1.bf16.msk.msra.mxu0 %vm1650_vm5, %v1651_v20  ;;  %vm3450_vm5 = vcmask 457728  }
 0x11e   : > { %v824_v9 = vsel %vm3382_vm7, %v1962_v35, %v1963_v32  ;;  %v849_v22 = vsel %vm3450_vm5, %v1948_v38, %v844_v57  ;;  %vm3451_vm3 = vmmov %vm3450_vm5  ;;  %v352_v57 = vrot.slane %v2324_v29, %v2337_v33  ;;  %vm3389_vm5 = vcmask 900096  }
 0x11f   : > { %v1654_v54 = vpack.c.bf16 %v824_v9, %v801_v53  ;;  %v2620_v55 = vpop.permute.xlu0 %1975  ;;  %v1039_v60 = vpop.permute.xlu1 %1038  ;;  %v848_v20 = vsel %vm3451_vm3, %v1938_v12, %v1948_v38  ;;  %vm3384_vm3 = vcmp.eq.s32.totalorder %v2617_v46, 1  ;;  %v2654_v29 = vrot.slane %v356_v34, %v2343_v36 }
 0x120   : > { %v1044_v63 = vsel %vm1040_vm6, %v1953_v6, %v1039_v60  ;;  %vm1730_vm6 = vmpackc.low %vm3380_vm14, %vm2599_vm15  ;;  %v419_v6 = vrot.slane %v2517_v4, %v2337_v33  ;;  %v1731_v53 = vpack.c.bf16 %v1043_v58, %v848_v20  ;;  %vm3388_vm14 = vcmask 523264  }
 0x121   : > { %v1728_v3 = vpack.c.bf16 %v1044_v63, %v849_v22  ;;  %1655 = vmatprep.subr.msk.bf16.mxu0 %vm1653_vm11, %v1654_v54  ;;  %vm3383_vm11 = vcmp.eq.s32.totalorder %v2614_v27, 1  ;;  %v2657_v4 = vrot.slane %v423_v0, %v2343_v36  ;;  %v2660_v38 = vrot.slane %v352_v57, %v2343_v36 }
 0x122   : > { %v2663_v58 = vrot.slane %v419_v6, %v2343_v36  ;;  %v800_v54 = vsel %vm3385_vm1, %v1967_v25, %v1957_v41  ;;  %v3387_v61 = vunpack.i.h.bf16 %v2620_v55  ;;  %v1977_v22 = vunpack.i.l.bf16 %v2620_v55 }
 0x123   : > { %v798_v9 = vpop.permute.xlu0 %797  ;;  %v1971_v60 = vpop.permute.xlu1 %1970  ;;  %1729 = vmatprep.subr.msk.bf16.mxu1 %vm1727_vm9, %v1728_v3  ;;  %vm3452_vm9 = vcmask 506880   ;;  %vm3386_vm7 = vcmp.eq.s32.totalorder %v2650_v5, 1  ;;  %v304_v41 = vrot.slane %v2592_v13, %v2343_v36  ;;  %v653_v57 = vrot.slane %v2301_v24, %v2382_v45 }
 0x124   : > { %v1972_v12 = vunpack.i.l.bf16 %v1971_v60  ;;  %1732 = vmatpush1.bf16.msk.msra.mxu1 %vm1730_vm6, %v1731_v53  ;;  %vm1656_vm6 = vmpackc.low %vm3384_vm3, %vm3383_vm11  ;;  %v1973_v34 = vunpack.i.h.bf16 %v1971_v60  ;;  %v710_v25 = vrot.slane %v2330_v31, %v2343_v36  ;;  %v1968_v53 = vunpack.i.h.bf16 %v2580_v51 }
 0x125   : > { %vm3394_vm11 = vcmp.eq.s32.totalorder %v2657_v4, 1  ;;  %v2692_v60 = vsel %vm3389_vm5, %v1977_v22, %v3387_v61  ;;  %vm3453_vm3 = vcmp.eq.s32.totalorder %v2625_v62, 1  ;;  %vm3390_vm13 = vcmp.eq.s32.totalorder %v2660_v38, 1 }
 0x126   : > { %v823_v63 = vsel %vm3452_vm9, %v1972_v12, %v1962_v35  ;;  %vm1659_vm1 = vmpackc.low %vm3386_vm7, %vm3453_vm3  ;;  %v825_v31 = vsel %vm3452_vm9, %v1963_v32, %v1973_v34  ;;  %vm3455_vm3 = vcmask 515072   ;;  %v2720_v11 = vrot.slane %v710_v25, %v2343_v36 }
 0x127   : > { %v1657_v0 = vpack.c.bf16 %v823_v63, %v800_v54  ;;  %v2673_v3 = vpop.permute.xlu0 %1985  ;;  %v2675_v20 = vpop.permute.xlu1 %1980  ;;  %v2708_v63 = vrot.slane %v304_v41, %v2343_v36  ;;  %vm3456_vm7 = vmmov %vm3452_vm9 }
 0x128   : > { %v1983_v35 = vunpack.i.h.bf16 %v2675_v20  ;;  %v1982_v6 = vunpack.i.l.bf16 %v2675_v20  ;;  %v803_v20 = vsel %vm3455_vm3, %v1968_v53, %v798_v9  ;;  %vm3458_vm5 = vmmov %vm3455_vm3  ;;  %v316_v9 = vrot.slane %v2592_v13, %v2327_v30 }
 0x129   : > { %1658 = vmatpush1.bf16.msk.msra.mxu0 %vm1656_vm6, %v1657_v0  ;;  %vm3391_vm6 = vcmp.eq.s32.totalorder %v2663_v58, 1  ;;  %v2711_v0 = vrot.slane %v653_v57, %v2343_v36  ;;  %v802_v32 = vsel %vm3458_vm5, %v1958_v2, %v1968_v53  ;;  %v1987_v25 = vunpack.i.l.bf16 %v2673_v3 }
 0x12a   : > { %v778_v45 = vsel %vm3388_vm14, %v1982_v6, %v1983_v35  ;;  %vm3457_vm14 = vcmp.eq.s32.totalorder %v2654_v29, 1  ;;  %vm1736_vm3 = vmpackc.low %vm3391_vm6, %vm3390_vm13  ;;  %v1737_v57 = vpack.c.bf16 %v825_v31, %v802_v32  ;;  %vm3392_vm5 = vcmp.eq.s32.totalorder %v2720_v11, 1 }
 0x12b   : > { %v1660_v51 = vpack.c.bf16 %v778_v45, %v2692_v60  ;;  %v2705_v12 = vpop.permute.xlu0 %1995  ;;  %v821_v54 = vpop.permute.xlu1 %820  ;;  %3454 = vst [vmem:[#allocation6_spill] sm:$0xff] %v2711_v0  ;;  %vm1733_vm9 = vmpackc.low %vm3394_vm11, %vm3457_vm14  ;;  %vm3400_vm14 = vcmask 916480   ;;  %v2740_v30 = vrot.slane %v316_v9, %v2343_v36  ;;  %vm3459_vm13 = vcmask 900096  }
 0x12c   : > { %v826_v61 = vsel %vm3456_vm7, %v1973_v34, %v821_v54  ;;  %v312_v34 = vrot.slane %v2592_v13, %v2337_v33  ;;  %vm3393_vm7 = vcmp.eq.s32.totalorder %v2708_v63, 1  ;;  %v754_v13 = vsel %vm3459_vm13, %v1987_v25, %v1977_v22 }
 0x12d   : > { %v1734_v41 = vpack.c.bf16 %v826_v61, %v803_v20  ;;  %1661 = vmatprep.subr.msk.bf16.mxu0 %vm1659_vm1, %v1660_v51  ;;  %vm3395_vm1 = vcmp.eq.s32.totalorder %v2711_v0, 1  ;;  %v1998_v61 = vunpack.i.h.bf16 %v2705_v12  ;;  %v1997_v53 = vunpack.i.l.bf16 %v2705_v12 }
 0x12e   : > { %v2743_v33 = vrot.slane %v312_v34, %v2343_v36  ;;  %vm3396_vm6 = vcmask 908288   ;;  %v1988_v34 = vunpack.i.h.bf16 %v2673_v3  ;;  %vm3397_vm13 = vcmp.eq.s32.totalorder %v2740_v30, 1 }
 0x12f   : > { %v2734_v45 = vpop.permute.xlu0 %751  ;;  %v1991_v23 = vpop.permute.xlu1 %1990  ;;  %1735 = vmatprep.subr.msk.bf16.mxu1 %vm1733_vm9, %v1734_v41  ;;  %vm3460_vm9 = vcmask 523264   ;;  %v649_v41 = vrot.slane %v2301_v24, %v2343_v36  ;;  %v635_v12 = vsel %vm3400_vm14, %v1997_v53, %v1998_v61  ;;  %vm3464_vm11 = vcmask 523264  }
 0x130   : > { %v1992_v2 = vunpack.i.l.bf16 %v1991_v23  ;;  %1738 = vmatpush1.bf16.msk.msra.mxu1 %vm1736_vm3, %v1737_v57  ;;  %vm1662_vm3 = vmpackc.low %vm3393_vm7, %vm3392_vm5  ;;  %v1993_v51 = vunpack.i.h.bf16 %v1991_v23  ;;  %vm3398_vm7 = vcmp.eq.s32.totalorder %v2743_v33, 1  ;;  %v3509_v0 = vmov 0 }
 0x132   : > { %v777_v31 = vsel %vm3460_vm9, %v1992_v2, %v1982_v6  ;;  %vm3461_vm9 = vcmp.eq.s32.totalorder %v2424_v59, 1  ;;  %v779_v24 = vsel %vm3464_vm11, %v1983_v35, %v1993_v51  ;;  %v2774_v59 = vrot.slane %v649_v41, %v2343_v36 }
 0x133   : > { %v1663_v54 = vpack.c.bf16 %v777_v31, %v754_v13  ;;  %v2006_v20 = vpop.permute.xlu0 %2005  ;;  %v2001_v32 = vpop.permute.xlu1 %2000  ;;  %vm2761_vm5 = vmpackc.low %vm3395_vm1, %vm3461_vm9  ;;  %vm3468_vm1 = vcmp.eq.s32.totalorder %v2355_v40, 1  ;;  %v3469_v35 = vunpack.i.h.bf16 %v2620_v55 }
 0x134   : > { %v2003_v22 = vunpack.i.h.bf16 %v2001_v32  ;;  %v2002_v9 = vunpack.i.l.bf16 %v2001_v32  ;;  %3465 = vst [vmem:[#allocation7_spill] sm:$0xff] %v2774_v59  ;;  %vm3467_vm9 = vmmov %vm3464_vm11 }
 0x135   : > { %1664 = vmatpush1.bf16.msk.msra.mxu0 %vm1662_vm3, %v1663_v54  ;;  %vm3466_vm3 = vcmask 900096  }
 0x136   : > { %v694_v57 = vsel %vm3396_vm6, %v2002_v9, %v2003_v22  ;;  %v2778_v2 = vsel %vm3466_vm3, %v1988_v34, %v2734_v45  ;;  %vm1739_vm6 = vmpackc.low %vm3397_vm13, %vm3468_vm1  ;;  %vm3401_vm1 = vcmp.eq.s32.totalorder %v2774_v59, 1  ;;  %vm3473_vm13 = vcmp.eq.s32.totalorder %v2455_v10, 1 }
 0x137   : > { %v2769_v3 = vpack.c.bf16 %v694_v57, %v635_v12  ;;  %v2771_v25 = vpop.permute.xlu0 %2015  ;;  %v775_v23 = vpop.permute.xlu1 %774  ;;  %vm3470_vm11 = vmmov %vm3466_vm3  ;;  %vm3471_vm3 = vcmp.eq.s32.totalorder %v2362_v42, 1  ;;  %v2008_v12 = vunpack.i.h.bf16 %v2006_v20 }
 0x138   : > { %v780_v13 = vsel %vm3467_vm9, %v1993_v51, %v775_v23  ;;  %v2788_v31 = vsel %vm3470_vm11, %v3469_v35, %v1988_v34  ;;  %vm1742_vm9 = vmpackc.low %vm3398_vm7, %vm3471_vm3  ;;  %v2007_v51 = vunpack.i.l.bf16 %v2006_v20  ;;  %vm3472_vm11 = vcmask 908288  }
 0x139   : > { %v1740_v54 = vpack.c.bf16 %v780_v13, %v2778_v2  ;;  %1667 = vmatprep.subr.msk.bf16.mxu0 %vm2761_vm5, %v2769_v3  ;;  %v1743_v36 = vpack.c.bf16 %v779_v24, %v2788_v31  ;;  %vm2808_vm3 = vmpackc.low %vm3401_vm1, %vm3473_vm13 }
 0x13a   : > { %v634_v57 = vsel %vm3400_vm14, %v2007_v51, %v1997_v53  ;;  %vm3476_vm7 = vmmov %vm3472_vm11 }
 0x13b   : > { %v2799_v32 = vpop.permute.xlu0 %690  ;;  %v2011_v55 = vpop.permute.xlu1 %2010  ;;  %1741 = vmatprep.subr.msk.bf16.mxu1 %vm1739_vm6, %v1740_v54  ;;  %vm3477_vm6 = vcmp.eq.s32.totalorder %v2459_v14, 1  ;;  %vm3482_vm13 = vmmov %vm3476_vm7  ;;  %v2018_v14 = vunpack.i.h.bf16 %v2771_v25 }
 0x13c   : > { %v2013_v41 = vunpack.i.h.bf16 %v2011_v55  ;;  %v2012_v34 = vunpack.i.l.bf16 %v2011_v55  ;;  %1744 = vmatpush1.bf16.msk.msra.mxu1 %vm1742_vm9, %v1743_v36  ;;  %vm3478_vm9 = vcmp.eq.s32.totalorder %v2352_v39, 1  ;;  %v3486_v39 = vmov 0 }
 0x13d   : > { %vm2819_vm14 = vmpackc.low %vm3478_vm9, %vm3477_vm6  ;;  %vm3485_vm6 = vcmp.eq.s32.totalorder %v2365_v43, 1  ;;  %v2017_v36 = vunpack.i.l.bf16 %v2771_v25 }
 0x13e   : > { %v693_v23 = vsel %vm3472_vm11, %v2012_v34, %v2002_v9  ;;  %v695_v13 = vsel %vm3476_vm7, %v2003_v22, %v2013_v41  ;;  %vm3481_vm11 = vcmask 916480   ;;  %v696_v20 = vsel %vm3482_vm13, %v2013_v41, %v2799_v32 }
 0x13f   : > { %v1669_v35 = vpack.c.bf16 %v693_v23, %v634_v57  ;;  %v2026_v54 = vpop.permute.xlu0 %2025  ;;  %v2813_v50 = vpop.permute.xlu1 %631  ;;  %vm3483_vm1 = vmmov %vm3481_vm11  ;;  %vm3484_vm7 = vcmp.eq.s32.totalorder %v2462_v19, 1  ;;  %vm3488_vm13 = vmmov 1  }
 0x140   : > { %v637_v10 = vsel %vm3481_vm11, %v2008_v12, %v2813_v50  ;;  %v636_v22 = vsel %vm3483_vm1, %v1998_v61, %v2008_v12  ;;  %vm2836_vm9 = vmpackc.low %vm3485_vm6, %vm3484_vm7  ;;  %vm3406_vm1 = vcmask 965632   ;;  %vm3409_vm11 = vcmask 973824  }
 0x141   : > { %v2828_v9 = vpack.c.bf16 %v696_v20, %v637_v10  ;;  %1670 = vmatpush1.bf16.msk.msra.mxu0 %vm2808_vm3, %v1669_v35  ;;  %v3487_v39 = vsel %vm2836_vm9, 4294967295, %v3486_v39  ;;  %v2842_v51 = vpack.c.bf16 %v695_v13, %v636_v22  ;;  %vm2855_vm7 = vmpackc.low %vm2446_vm0, %vm3488_vm13  ;;  %v574_v41 = vsel %vm3406_vm1, %v2017_v36, %v2018_v14 }
 0x142   : > { %v2027_v34 = vunpack.i.l.bf16 %v2026_v54  ;;  %vm3491_vm0 = vcmp.eq.s32.totalorder %v2452_v8, 1  ;;  %v2028_v59 = vunpack.i.h.bf16 %v2026_v54 }
 0x143   : > { %v2844_v61 = vpop.permute.xlu0 %2035  ;;  %v2021_v55 = vpop.permute.xlu1 %2020  ;;  %1747 = vmatprep.subr.msk.bf16.mxu1 %vm2819_vm14, %v2828_v9  ;;  %vm2875_vm6 = vmpackc.low %vm3491_vm0, %vm3488_vm13  ;;  %vm3494_vm0 = vcmp.eq.s32.totalorder %v2556_v28, 1 }
 0x144   : > { %v2023_v43 = vunpack.i.h.bf16 %v2021_v55  ;;  %v2022_v19 = vunpack.i.l.bf16 %v2021_v55  ;;  %1750 = vmatpush1.bf16.msk.msra.mxu1 %vm2836_vm9, %v2842_v51  ;;  %v573_v7 = vsel %vm3406_vm1, %v2027_v34, %v2017_v36  ;;  %v2038_v10 = vunpack.i.h.bf16 %v2844_v61  ;;  %vm2887_vm1 = vmpackc.low %vm2528_vm4, %vm3494_vm0 }
 0x145   : > { %v2037_v20 = vunpack.i.l.bf16 %v2844_v61  ;;  %vm3408_vm9 = vcmask 982016   ;;  %vm3507_vm0 = vcmp.eq.s32.totalorder %v2617_v46, 1 }
 0x146   : > { %v1023_v12 = vsel %vm3409_vm11, %v2022_v19, %v2023_v43 }
 0x147   : > { %v2861_v57 = vpack.c.bf16 %v574_v41, %v1023_v12  ;;  %v2863_v23 = vpop.permute.xlu0 %570  ;;  %v2031_v13 = vpop.permute.xlu1 %2030  ;;  %v456_v61 = vsel %vm3407_vm10, %v2037_v20, %v2038_v10  ;;  %vm2899_vm10 = vmpackc.low %vm2476_vm12, %vm3488_vm13 }
 0x148   : > { %v2032_v35 = vunpack.i.l.bf16 %v2031_v13  ;;  %v2033_v41 = vunpack.i.h.bf16 %v2031_v13  ;;  %vm2916_vm12 = vmpackc.low %vm2495_vm8, %vm3488_vm13  ;;  %vm3505_vm8 = vcmask 1031168   ;;  %vm3506_vm13 = vcmask 982016  }
 0x149   : > { %1673 = vmatprep.subr.msk.bf16.mxu0 %vm2855_vm7, %v2861_v57  ;;  %v3503_v52 = vsel %vm2916_vm12, 4294967295, %v3502_v52 }
 0x14a   : > { %v1022_v22 = vsel %vm3409_vm11, %v2032_v35, %v2022_v19  ;;  %v3495_v19 = vmov 0  ;;  %v1024_v13 = vsel %vm3409_vm11, %v2023_v43, %v2033_v41  ;;  %3504 = vst [vmem:[#allocation9_spill] sm:$0xff] %v3503_v52 }
 0x14b   : > { %v1675_v12 = vpack.c.bf16 %v573_v7, %v1022_v22  ;;  %v2046_v48 = vpop.permute.xlu0 %2045  ;;  %v2041_v44 = vpop.permute.xlu1 %2040  ;;  %v3496_v19 = vsel %vm2887_vm1, 4294967295, %v3495_v19 }
 0x14c   : > { %v2043_v36 = vunpack.i.h.bf16 %v2041_v44  ;;  %v2042_v34 = vunpack.i.l.bf16 %v2041_v44  ;;  %v2048_v56 = vunpack.i.h.bf16 %v2046_v48 }
 0x14d   : > { %1676 = vmatpush1.bf16.msk.msra.mxu0 %vm2875_vm6, %v1675_v12 }
 0x14e   : > { %v515_v8 = vsel %vm3408_vm9, %v2042_v34, %v2043_v36  ;;  %vm3500_vm9 = vcmask 965632  }
 0x14f   : > { %v2892_v35 = vpack.c.bf16 %v515_v8, %v456_v61  ;;  %v2056_v44 = vpop.permute.xlu0 %2055  ;;  %v2894_v54 = vpop.permute.xlu1 %1019  ;;  %v576_v26 = vsel %vm3500_vm9, %v2028_v59, %v2863_v23  ;;  %vm3501_vm4 = vmmov %vm3500_vm9  ;;  %vm3415_vm9 = vcmask 1039360  }
 0x150   : > { %v1025_v28 = vsel %vm3409_vm11, %v2033_v41, %v2894_v54  ;;  %v575_v43 = vsel %vm3501_vm4, %v2018_v14, %v2028_v59  ;;  %v2058_v22 = vunpack.i.h.bf16 %v2056_v44  ;;  %v2057_v12 = vunpack.i.l.bf16 %v2056_v44 }
 0x151   : > { %3497 = vst [vmem:[#allocation8_spill] sm:$0xff] %v2892_v35  ;;  %v2908_v61 = vpack.c.bf16 %v576_v26, %v1025_v28  ;;  %1679 = vmatprep.subr.msk.bf16.mxu0 %vm2887_vm1, %v2892_v35  ;;  %v2920_v8 = vpack.c.bf16 %v575_v43, %v1024_v13  ;;  %v2047_v41 = vunpack.i.l.bf16 %v2046_v48  ;;  %vm3508_vm4 = vcmp.eq.s32.totalorder %v2533_v1, 1  ;;  %vm3511_vm1 = vmmov %vm3506_vm13 }
 0x152   : > { %v391_v28 = vsel %vm3415_vm9, %v2057_v12, %v2058_v22  ;;  %vm2937_vm11 = vmpackc.low %vm3508_vm4, %vm3507_vm0  ;;  %vm3512_vm9 = vcmp.eq.s32.totalorder %v2650_v5, 1  ;;  %v3514_v48 = vmov 0  ;;  %vm3517_vm0 = vcmp.eq.s32.totalorder %v2657_v4, 1 }
 0x153   : > { %v2922_v59 = vpop.permute.xlu0 %511  ;;  %v2051_v14 = vpop.permute.xlu1 %2050  ;;  %1753 = vmatprep.subr.msk.bf16.mxu1 %vm2899_vm10, %v2908_v61  ;;  %v455_v13 = vsel %vm3505_vm8, %v2047_v41, %v2037_v20  ;;  %v3510_v0 = vsel %vm2937_vm11, 4294967295, %v3509_v0  ;;  %vm3513_vm8 = vcmp.eq.s32.totalorder %v2538_v37, 1  ;;  %v2953_v1 = vpack.c.bf16 %v391_v28, %v2201_v15  ;;  %vm2963_vm4 = vmpackc.low %vm2595_vm2, %vm3517_vm0 }
 0x154   : > { %v2053_v44 = vunpack.i.h.bf16 %v2051_v14  ;;  %v2052_v26 = vunpack.i.l.bf16 %v2051_v14  ;;  %1756 = vmatpush1.bf16.msk.msra.mxu1 %vm2916_vm12, %v2920_v8  ;;  %vm2948_vm12 = vmpackc.low %vm3513_vm8, %vm3512_vm9  ;;  %v3518_v5 = vmov 0  ;;  %vm3521_vm8 = vcmp.eq.s32.totalorder %v2663_v58, 1 }
 0x155   : > { %v3515_v48 = vsel %vm2948_vm12, 4294967295, %v3514_v48  ;;  %v3519_v5 = vsel %vm2963_vm4, 4294967295, %v3518_v5  ;;  %v3522_v15 = vmov 0  ;;  %vm3525_vm2 = vcmp.eq.s32.totalorder %v2614_v27, 1 }
 0x156   : > { %v514_v43 = vsel %vm3506_vm13, %v2052_v26, %v2042_v34  ;;  %v516_v14 = vsel %vm3511_vm1, %v2043_v36, %v2053_v44  ;;  %vm3516_vm13 = vcmask 1031168   ;;  %v517_v20 = vsel %vm3511_vm1, %v2053_v44, %v2922_v59 }
 0x157   : > { %v1681_v35 = vpack.c.bf16 %v514_v43, %v455_v13  ;;  %v988_v21 = vpop.permute.xlu0 %987  ;;  %v2942_v52 = vpop.permute.xlu1 %452  ;;  %vm3520_vm9 = vmmov %vm3516_vm13  ;;  %vm3528_vm0 = vcmp.eq.s32.totalorder %v2625_v62, 1 }
 0x158   : > { %v458_v46 = vsel %vm3516_vm13, %v2048_v56, %v2942_v52  ;;  %v457_v37 = vsel %vm3520_vm9, %v2038_v10, %v2048_v56  ;;  %vm2976_vm13 = vmpackc.low %vm2599_vm15, %vm3521_vm8  ;;  %vm3524_vm15 = vcmp.eq.s32.totalorder %v2708_v63, 1  ;;  %vm3529_vm9 = vcmp.eq.s32.totalorder %v2720_v11, 1 }
 0x159   : > { %v2968_v36 = vpack.c.bf16 %v517_v20, %v458_v46  ;;  %1682 = vmatpush1.bf16.msk.msra.mxu0 %vm2937_vm11, %v1681_v35  ;;  %v3523_v15 = vsel %vm2976_vm13, 4294967295, %v3522_v15  ;;  %v2980_v47 = vpack.c.bf16 %v516_v14, %v457_v37  ;;  %vm2995_vm1 = vmpackc.low %vm3525_vm2, %vm3524_vm15  ;;  %v1008_v35 = vsel %vm3528_vm0, %v2788_v31, 0.0 }
 0x15a   : > { %1685 = vmatprep.subr.msk.bf16.mxu0 %vm2948_vm12, %v2953_v1  ;;  %v1007_v41 = vsel %vm3529_vm9, %v2692_v60, 0.0  ;;  %vm3530_vm8 = vcmp.eq.s32.totalorder %v2362_v42, 1  ;;  %vm3534_vm2 = vcmp.eq.s32.totalorder %v2740_v30, 1  ;;  %vm3535_vm11 = vcmp.eq.s32.totalorder %v2654_v29, 1 }
 0x15b   : > { %v388_v4 = vpop.permute.xlu0 %387  ;;  %v2061_v10 = vpop.permute.xlu1 %2060  ;;  %1759 = vmatprep.subr.msk.bf16.mxu1 %vm2963_vm4, %v2968_v36  ;;  %v1009_v44 = vsel %vm3530_vm8, %v2778_v2, 0.0  ;;  %vm3015_vm4 = vmpackc.low %vm3535_vm11, %vm3534_vm2  ;;  %vm3542_vm11 = vcmask 900096   ;;  %vm3543_vm9 = vcmp.eq.s32.totalorder %v2355_v40, 1  ;;  %vm1125_vm8 = vcmask 1043456  }
 0x15c   : > { %v2063_v34 = vunpack.i.h.bf16 %v2061_v10  ;;  %v2062_v58 = vunpack.i.l.bf16 %v2061_v10  ;;  %1762 = vmatpush1.bf16.msk.msra.mxu1 %vm2976_vm13, %v2980_v47  ;;  %vm3531_vm13 = vcmask 1039360   ;;  %v1107_v28 = vpack.c.bf16 %v1009_v44, %v1009_v44  ;;  %v3567_v44 = vld [vmem:[#allocation3_spill] sm:$0xff] }
 0x15d   : > { %vm3532_vm12 = vmmov %vm3531_vm13  ;;  %vm3545_vm2 = vcmask 908288  }
 0x15e   : > { %v392_v63 = vsel %vm3531_vm13, %v2058_v22, %v2063_v34  ;;  %v393_v27 = vsel %vm3532_vm12, %v2063_v34, %v388_v4  ;;  %vm3533_vm15 = vmmov %vm3532_vm12  ;;  %vm3538_vm12 = vcmp.eq.s32.totalorder %v2743_v33, 1  ;;  %vm3539_vm13 = vcmp.eq.s32.totalorder %v2660_v38, 1 }
 0x15f   : > { %v390_v26 = vsel %vm3533_vm15, %v2062_v58, %v2057_v12  ;;  %v1709_v60 = vpack.c.bf16 %v392_v63, %v2207_v17  ;;  %v3021_v56 = vpack.c.bf16 %v393_v27, %v2210_v18  ;;  %v980_v2 = vpop.permute.xlu0 %979  ;;  %v1004_v22 = vpop.permute.xlu1 %1003  ;;  %vm3028_vm0 = vmpackc.low %vm3539_vm13, %vm3538_vm12  ;;  %v1106_v12 = vpack.c.bf16 %v1008_v35, %v1008_v35 }
 0x160   : > { %v1687_v42 = vpack.c.bf16 %v390_v26, %v2204_v16  ;;  %v1005_v29 = vsel %vm3542_vm11, %v2734_v45, %v1004_v22  ;;  %v1105_v17 = vpack.c.bf16 %v1007_v41, %v1007_v41  ;;  %vm3544_vm15 = vcmask 916480  }
 0x161   : > { %v1010_v18 = vsel %vm3543_vm9, %v1005_v29, 0.0  ;;  %1765 = vmatprep.subr.msk.bf16.mxu1 %vm3015_vm4, %v3021_v56  ;;  %v989_v33 = vsel %vm3544_vm15, %v2813_v50, %v988_v21  ;;  %v1133_v14 = vsel %vm1125_vm8, %v1107_v28, 0  ;;  %vm3546_vm12 = vcmask 965632  }
 0x162   : > { %1688 = vmatpush1.bf16.msk.msra.mxu0 %vm2995_vm1, %v1687_v42  ;;  %v1108_v16 = vpack.c.bf16 %v1010_v18, %v1010_v18  ;;  %1768 = vmatpush1.bf16.msk.msra.mxu1 %vm3028_vm0, %v1709_v60  ;;  %v1127_v13 = vsel %vm1125_vm8, %v1105_v17, 0  ;;  %v981_v21 = vsel %vm3546_vm12, %v2863_v23, %v980_v2  ;;  %vm3547_vm13 = vcmask 973824   ;;  %v3553_v23 = vld [vmem:[#allocation9_spill] sm:$0xff] }
 0x163   : > { %1689 = vmatprep.subr.msk.bf16.mxu0 %vm1125_vm8, %v1106_v12  ;;  %v964_v38 = vpop.permute.xlu0 %963  ;;  %v996_v45 = vpop.permute.xlu1 %995  ;;  %vm3550_vm11 = vcmask 982016   ;;  %vm914_vm9 = vcmask 384000   ;;  %vm937_vm15 = vcmask 375808   ;;  %vm3560_vm12 = vnez %v3523_v15 }
 0x164   : > { %v997_v40 = vsel %vm3545_vm2, %v2799_v32, %v996_v45  ;;  %1769 = vmatprep.subr.msk.bf16.mxu1 %vm1125_vm8, %v1108_v16  ;;  %vm3555_vm8 = vnez %v3519_v5  ;;  %vm3559_vm2 = vnez %v3515_v48  ;;  %v1639_v63 = vcombine.low %v3567_v44, %v3567_v44 }
 0x165   : > { %v1771_v43 = vpack.c.bf16 %v997_v40, %v989_v33 }
 0x166   : > { %1159 = vmatpush2.bf16.msra.mxu0 %v1127_v13  ;;  %1200 = vmatpush2.bf16.msra.mxu1 %v1133_v14 }
 0x167   : > { %1692 = vmatprep.subr.msk.bf16.mxu0 %vm2761_vm5, %v2842_v51  ;;  %v956_v46 = vpop.permute.xlu0 %955  ;;  %v1050_v20 = vpop.permute.xlu1 %1049  ;;  %1772 = vmatprep.subr.msk.bf16.mxu1 %vm2819_vm14, %v1771_v43  ;;  %vm3548_vm5 = vnez %v3487_v39  ;;  %vm3549_vm14 = vcmask 1031168  }
 0x168   : > { %v1051_v50 = vsel %vm3547_vm13, %v2894_v54, %v1050_v20  ;;  %v965_v51 = vsel %vm3549_vm14, %v2942_v52, %v964_v38  ;;  %v3556_v52 = vld [vmem:[#allocation2_spill] sm:$0xff] }
 0x169   : > { %v1777_v32 = vpack.c.bf16 %v981_v21, %v1051_v50 }
 0x16a   : > { %1695 = vmatpush2.bf16.msk.msra.mxu0 %vm2808_vm3, %v2769_v3  ;;  %1775 = vmatpush2.bf16.msk.msra.mxu1 %vm3548_vm5, %v2828_v9  ;;  %vm3551_vm3 = vcmask 1039360   ;;  %vm3563_vm5 = vcmp.eq.s32.totalorder %v2625_v62, 1  ;;  %v3564_v62 = vld [vmem:[#allocation7_spill] sm:$0xff] }
 0x16b   : > { %1698 = vmatprep.subr.msk.bf16.mxu0 %vm2855_vm7, %v2920_v8  ;;  %v2066_v6 = vpop.permute.xlu0 %2065  ;;  %v972_v53 = vpop.permute.xlu1 %971  ;;  %1778 = vmatprep.subr.msk.bf16.mxu1 %vm2899_vm10, %v1777_v32  ;;  %v957_v25 = vsel %vm3551_vm3, %v388_v4, %v956_v46  ;;  %vm3552_vm7 = vnez %v3496_v19  ;;  %vm3554_vm10 = vnez %v3553_v23 }
 0x16c   : > { %v973_v24 = vsel %vm3550_vm11, %v2922_v59, %v972_v53  ;;  %v2068_v39 = vunpack.i.h.bf16 %v2066_v6  ;;  %v2067_v9 = vunpack.i.l.bf16 %v2066_v6  ;;  %v1789_v8 = vpack.c.bf16 %v957_v25, %v3556_v52  ;;  %v3557_v59 = vld [vmem:[#allocation8_spill] sm:$0xff] }
 0x16d   : > { %v1783_v3 = vpack.c.bf16 %v973_v24, %v965_v51  ;;  %vm3566_vm11 = vcmp.eq.s32.totalorder %v2720_v11, 1  ;;  %v3570_v11 = vld [vmem:[#allocation5_spill] sm:$0xff] }
 0x16e   : > { %1701 = vmatpush2.bf16.msk.msra.mxu0 %vm2875_vm6, %v2861_v57  ;;  %1781 = vmatpush2.bf16.msk.msra.mxu1 %vm3554_vm10, %v2908_v61  ;;  %vm3558_vm6 = vnez %v3510_v0  ;;  %v916_v19 = vsel %vm914_vm9, %v2067_v9, %v2068_v39 }
 0x16f   : > { %1704 = vmatprep.subr.msk.bf16.mxu0 %vm3552_vm7, %v2980_v47  ;;  %v2081_v54 = vpop.permute.xlu0 %2080  ;;  %v2071_v7 = vpop.permute.xlu1 %2070  ;;  %1784 = vmatprep.subr.msk.bf16.mxu1 %vm3555_vm8, %v1783_v3  ;;  %v3561_v47 = vld [vmem:[#allocation6_spill] sm:$0xff] }
 0x170   : > { %v2073_v57 = vunpack.i.h.bf16 %v2071_v7  ;;  %v2072_v55 = vunpack.i.l.bf16 %v2071_v7  ;;  %v2082_v37 = vunpack.i.l.bf16 %v2081_v54  ;;  %vm3562_vm13 = vcmp.eq.s32.totalorder %v3561_v47, 1 }
 0x171   : > { %vm1714_vm14 = vmpackc.low %vm3563_vm5, %vm3562_vm13  ;;  %v2083_v48 = vunpack.i.h.bf16 %v2081_v54  ;;  %vm3576_vm13 = vcmask 982016  }
 0x172   : > { %1707 = vmatpush2.bf16.msk.msra.mxu0 %vm3558_vm6, %v3557_v59  ;;  %1787 = vmatpush2.bf16.msk.msra.mxu1 %vm3560_vm12, %v2968_v36  ;;  %v939_v61 = vsel %vm937_vm15, %v2072_v55, %v2073_v57  ;;  %v938_v15 = vsel %vm937_vm15, %v2082_v37, %v2072_v55  ;;  %vm3577_vm5 = vmmov %vm3576_vm13 }
 0x173   : > { %1710 = vmatprep.subr.msk.bf16.mxu0 %vm3559_vm2, %v1709_v60  ;;  %v2076_v5 = vpop.permute.xlu1 %2075  ;;  %1790 = vmatprep.subr.msk.bf16.mxu1 %vm3015_vm4, %v1789_v8  ;;  %v1715_v0 = vpack.c.bf16 %v939_v61, %v916_v19  ;;  %v936_v34 = vpop.permute.xlu0 %935  ;;  %vm3565_vm4 = vcmp.eq.s32.totalorder %v3564_v62, 1  ;;  %v940_v26 = vsel %vm937_vm15, %v2073_v57, %v2083_v48  ;;  %v3568_v60 = vld [vmem:[#allocation4_spill] sm:$0xff] }
 0x174   : > { %v2078_v4 = vunpack.i.h.bf16 %v2076_v5  ;;  %v2077_v10 = vunpack.i.l.bf16 %v2076_v5  ;;  %vm1717_vm3 = vmpackc.low %vm3566_vm11, %vm3565_vm4  ;;  %vm3580_vm11 = vcmask 523264  }
 0x175   : > { %vm3579_vm4 = vmmov %vm3577_vm5 }
 0x176   : > { %1713 = vmatpush2.bf16.msk.msra.mxu0 %vm2995_vm1, %v2953_v1  ;;  %v915_v36 = vsel %vm914_vm9, %v2077_v10, %v2067_v9  ;;  %1793 = vmatpush2.bf16.msk.msra.mxu1 %vm3028_vm0, %v3021_v56  ;;  %v917_v58 = vsel %vm914_vm9, %v2068_v39, %v2078_v4  ;;  %v941_v1 = vsel %vm937_vm15, %v2083_v48, %v936_v34  ;;  %vm3572_vm15 = vcmask 1039360  }
 0x177   : > { %1716 = vmatprep.subr.msk.bf16.mxu0 %vm1714_vm14, %v1715_v0  ;;  %v913_v35 = vpop.permute.xlu1 %912  ;;  %v1718_v41 = vpack.c.bf16 %v938_v15, %v915_v36  ;;  %v1798_v31 = vpack.c.bf16 %v940_v26, %v917_v58  ;;  %vm3569_vm1 = vnez %v3568_v60  ;;  %vm3571_vm0 = vnez %v3570_v11  ;;  %vm3573_vm6 = vmmov %vm3572_vm15  ;;  %v1385_v26 = vld [vmem:[%s3361_s1 + $0x178] sm:$0xff]  ;;  %v1400_v60 = vld [vmem:[%s3361_s1 + $0x1f0] sm:$0xff] }
 0x178   : > { %v918_v49 = vsel %vm914_vm9, %v2078_v4, %v913_v35  ;;  %v1369_v35 = vld [vmem:[%s3361_s1 + $0xf8] sm:$0xff]  ;;  %vm3574_vm2 = vmmov %vm3573_vm6 }
 0x179   : > { %v1795_v27 = vpack.c.bf16 %v941_v1, %v918_v49  ;;  %v1353_v1 = vld [vmem:[%s3361_s1 + $0x78] sm:$0xff]  ;;  %vm3575_vm12 = vmmov %vm3574_vm2 }
 0x17a   : > { %1719 = vmatpush2.bf16.msk.msra.mxu0 %vm1717_vm3, %v1718_v41  ;;  %v1401_v41 = vld [vmem:[%s3361_s1 + $0x1f8] sm:$0xff]  ;;  %vm3578_vm14 = vmmov %vm3577_vm5 }
 0x17b   : > { %1796 = vmatprep.subr.msk.bf16.mxu1 %vm3569_vm1, %v1795_v27  ;;  %1805 = vmatprep.subr.mxu0 %v1369_v35  ;;  %v1340_v35 = vld [vmem:[%s3361_s1 + $0x10] sm:$0xff]  ;;  %vm3581_vm3 = vmmov %vm3580_vm11 }
 0x17c   : > { %1799 = vmatpush2.bf16.msk.msra.mxu1 %vm3571_vm0, %v1798_v31  ;;  %v1368_v31 = vld [vmem:[%s3361_s1 + $0xf0] sm:$0xff]  ;;  %vm3582_vm1 = vmmov %vm3581_vm3 }
 0x17d   : > { %1171 = vmatmul.mubr.bf16.vlgmr.msra.gmra.mxu0 %v1639_v63  ;;  %1840 = vmatprep.subr.mxu1 %v1401_v41  ;;  %v1372_v41 = vld [vmem:[%s3361_s1 + $0x110] sm:$0xff]  ;;  %vm3583_vm0 = vmmov %vm3582_vm1 }
 0x17e   : > { %1806 = vmatpush3.msra.mxu0 %v1353_v1  ;;  %v1355_v1 = vld [vmem:[%s3361_s1 + $0x88] sm:$0xff] }
 0x17f   : > { %1212 = vmatmul.mubr.bf16.vlgmr.msra.gmra.mxu1 %v1639_v63  ;;  %1807 = vmatprep.subr.mxu0 %v1368_v31  ;;  %v1354_v31 = vld [vmem:[%s3361_s1 + $0x80] sm:$0xff] }
 0x180   : > { %1841 = vmatpush3.msra.mxu1 %v1385_v26  ;;  %v1371_v26 = vld [vmem:[%s3361_s1 + $0x108] sm:$0xff] }
 0x181   : > { %1842 = vmatprep.subr.mxu1 %v1400_v60 }
 0x184   : > { %v1113_v56 = vpop.permute.xlu1 %1112 }
 0x23d   : > { %v1172_v42 = vpop.f32.mrf.mxu0 }
 0x23e   : > { %v1173_v2 = vadd.f32 %v1172_v42, %v1113_v56 }
 0x23f   : > { %v1174_v22 = vpop.f32.mrf.mxu0  ;;  %v1213_v12 = vpop.f32.mrf.mxu1 }
 0x240   : > { %v1224_v30 = vmul.f32 0.01, %v1173_v2  ;;  %v1175_v29 = vadd.f32 %v1174_v22, %v1113_v56  ;;  %vm1220_vm7 = vcmp.gt.f32.partialorder %v1173_v2, 0.0  ;;  %v1214_v17 = vadd.f32 %v1213_v12, %v1113_v56  ;;  %v1352_v22 = vld [vmem:[%s3361_s1 + $0x70] sm:$0xff] }
 0x241   : > { %v1176_v28 = vpop.f32.mrf.mxu0  ;;  %v1215_v16 = vpop.f32.mrf.mxu1  ;;  %1808 = vmatpush3.msra.mxu0 %v1352_v22 }
 0x242   : > { %vm1221_vm10 = vcmp.gt.f32.partialorder %v1175_v29, 0.0  ;;  %v1225_v18 = vmul.f32 0.01, %v1175_v29  ;;  %vm1222_vm9 = vcmp.gt.f32.partialorder %v1214_v17, 0.0  ;;  %v1226_v38 = vmul.f32 0.01, %v1214_v17 }
 0x243   : > { %v1216_v45 = vadd.f32 %v1215_v16, %v1113_v56  ;;  %v1177_v33 = vpop.f32.mrf.mxu0  ;;  %v1228_v40 = vsel %vm1220_vm7, %v1173_v2, %v1224_v30  ;;  %v1217_v43 = vpop.f32.mrf.mxu1  ;;  %v1384_v30 = vld [vmem:[%s3361_s1 + $0x170] sm:$0xff]  ;;  %v1399_v28 = vld [vmem:[%s3361_s1 + $0x1e8] sm:$0xff]  ;;  %vm3584_vm7 = vmmov %vm3583_vm0 }
 0x244   : > { %v1229_v13 = vsel %vm1221_vm10, %v1175_v29, %v1225_v18  ;;  %v1230_v46 = vsel %vm1222_vm9, %v1214_v17, %v1226_v38  ;;  %v1367_v17 = vld [vmem:[%s3361_s1 + $0xe8] sm:$0xff]  ;;  %1843 = vmatpush3.msra.mxu1 %v1384_v30  ;;  %v1366_v38 = vld [vmem:[%s3361_s1 + $0xe0] sm:$0xff]  ;;  %v1397_v43 = vld [vmem:[%s3361_s1 + $0x1d8] sm:$0xff] }
 0x245   : > { %v1227_v14 = vmul.f32 0.01, %v1216_v45  ;;  %vm1223_vm8 = vcmp.gt.f32.partialorder %v1216_v45, 0.0  ;;  %v1232_v20 = vadd.f32 %v1229_v13, %v1228_v40  ;;  %v1218_v21 = vpop.f32.mrf.mxu1  ;;  %v1351_v18 = vld [vmem:[%s3361_s1 + $0x68] sm:$0xff]  ;;  %1809 = vmatprep.subr.mxu0 %v1367_v17  ;;  %1844 = vmatprep.subr.mxu1 %v1399_v28  ;;  %v1350_v33 = vld [vmem:[%s3361_s1 + $0x60] sm:$0xff] }
 0x246   : > { %v1383_v16 = vld [vmem:[%s3361_s1 + $0x168] sm:$0xff]  ;;  %1810 = vmatpush3.msra.mxu0 %v1351_v18  ;;  %v1396_v21 = vld [vmem:[%s3361_s1 + $0x1d0] sm:$0xff]  ;;  %v1338_v17 = vld [vmem:[%s3361_s1] sm:$0xff] }
 0x247   : > { %v1231_v50 = vsel %vm1223_vm8, %v1216_v45, %v1227_v14  ;;  %v1233_v32 = vadd.f32 %v1232_v20, %v1230_v46  ;;  %v1398_v45 = vld [vmem:[%s3361_s1 + $0x1e0] sm:$0xff]  ;;  %1845 = vmatpush3.msra.mxu1 %v1383_v16  ;;  %1811 = vmatprep.subr.mxu0 %v1366_v38  ;;  %v1349_v14 = vld [vmem:[%s3361_s1 + $0x58] sm:$0xff]  ;;  %v1364_v20 = vld [vmem:[%s3361_s1 + $0xd0] sm:$0xff] }
 0x248   : > { %1846 = vmatprep.subr.mxu1 %v1398_v45  ;;  %1812 = vmatpush3.msra.mxu0 %v1350_v33  ;;  %v1370_v28 = vld [vmem:[%s3361_s1 + $0x100] sm:$0xff] }
 0x249   : > { %v1234_v6 = vadd.f32 %v1233_v32, %v1231_v50  ;;  %v1380_v32 = vld [vmem:[%s3361_s1 + $0x150] sm:$0xff] }
 0x24b   : > { %1235 = vadd.xlane.f32.xlu0 %v1234_v6  ;;  %v1363_v6 = vld [vmem:[%s3361_s1 + $0xc8] sm:$0xff] }
 0x2d4   : > { %v1236_v53 = vpop.xlane.xlu0 %1235 }
 0x2d5   : > { %v1238_v51 = vmul.f32 0.001953125, %v1236_v53  ;;  %v1395_v53 = vld [vmem:[%s3361_s1 + $0x1c8] sm:$0xff] }
 0x2d7   : > { %v1239_v24 = vsub.f32 %v1228_v40, %v1238_v51  ;;  %v1240_v3 = vsub.f32 %v1229_v13, %v1238_v51  ;;  %v1241_v25 = vsub.f32 %v1230_v46, %v1238_v51  ;;  %v1242_v39 = vsub.f32 %v1231_v50, %v1238_v51  ;;  %v1382_v40 = vld [vmem:[%s3361_s1 + $0x160] sm:$0xff]  ;;  %v1365_v13 = vld [vmem:[%s3361_s1 + $0xd8] sm:$0xff]  ;;  %v1348_v50 = vld [vmem:[%s3361_s1 + $0x50] sm:$0xff] }
 0x2d8   : > { %v1381_v46 = vld [vmem:[%s3361_s1 + $0x158] sm:$0xff]  ;;  %1847 = vmatpush3.msra.mxu1 %v1382_v40  ;;  %1813 = vmatprep.subr.mxu0 %v1365_v13  ;;  %v1347_v51 = vld [vmem:[%s3361_s1 + $0x48] sm:$0xff] }
 0x2d9   : > { %v1243_v9 = vmul.f32 %v1239_v24, %v1239_v24  ;;  %v1244_v23 = vmul.f32 %v1240_v3, %v1240_v3  ;;  %v1245_v54 = vmul.f32 %v1241_v25, %v1241_v25  ;;  %v1246_v57 = vmul.f32 %v1242_v39, %v1242_v39  ;;  %1848 = vmatprep.subr.mxu1 %v1397_v43 }
 0x2da   : > { %1814 = vmatpush3.msra.mxu0 %v1349_v14  ;;  %1849 = vmatpush3.msra.mxu1 %v1381_v46 }
 0x2db   : > { %v1247_v7 = vadd.f32 %v1244_v23, %v1243_v9  ;;  %1815 = vmatprep.subr.mxu0 %v1364_v20  ;;  %1850 = vmatprep.subr.mxu1 %v1396_v21  ;;  %v1378_v9 = vld [vmem:[%s3361_s1 + $0x140] sm:$0xff]  ;;  %v1361_v23 = vld [vmem:[%s3361_s1 + $0xb8] sm:$0xff] }
 0x2dc   : > { %1816 = vmatpush3.msra.mxu0 %v1348_v50  ;;  %1851 = vmatpush3.msra.mxu1 %v1380_v32 }
 0x2dd   : > { %v1248_v55 = vadd.f32 %v1247_v7, %v1245_v54  ;;  %1817 = vmatprep.subr.mxu0 %v1363_v6  ;;  %1852 = vmatprep.subr.mxu1 %v1395_v53  ;;  %v1393_v54 = vld [vmem:[%s3361_s1 + $0x1b8] sm:$0xff] }
 0x2de   : > { %1818 = vmatpush3.msra.mxu0 %v1347_v51  ;;  %v1345_v7 = vld [vmem:[%s3361_s1 + $0x38] sm:$0xff] }
 0x2df   : > { %v1249_v52 = vadd.f32 %v1248_v55, %v1246_v57  ;;  %v1377_v57 = vld [vmem:[%s3361_s1 + $0x138] sm:$0xff]  ;;  %v1360_v55 = vld [vmem:[%s3361_s1 + $0xb0] sm:$0xff] }
 0x2e1   : > { %1250 = vadd.xlane.f32.xlu1 %v1249_v52  ;;  %v1392_v52 = vld [vmem:[%s3361_s1 + $0x1b0] sm:$0xff] }
 0x36a   : > { %v1251_v8 = vpop.xlane.xlu1 %1250 }
 0x36b   : > { %v1252_v59 = vmul.f32 0.001953125, %v1251_v8  ;;  %v1344_v8 = vld [vmem:[%s3361_s1 + $0x30] sm:$0xff] }
 0x36d   : > { %v1253_v19 = vadd.f32 1e-05, %v1252_v59  ;;  %v1376_v59 = vld [vmem:[%s3361_s1 + $0x130] sm:$0xff] }
 0x36f   : > { %2118 = vrsqrt.f32 %v1253_v19  ;;  %v1359_v19 = vld [vmem:[%s3361_s1 + $0xa8] sm:$0xff] }
 0x37c   : > { %v2119_v37 = vpop.eup %2118 }
 0x37d   : > { %v1257_v61 = vmul.f32 %v2119_v37, %v1241_v25  ;;  %v1258_v5 = vmul.f32 %v2119_v37, %v1242_v39  ;;  %v1255_v47 = vmul.f32 %v2119_v37, %v1239_v24  ;;  %v1256_v0 = vmul.f32 %v2119_v37, %v1240_v3  ;;  %v1379_v24 = vld [vmem:[%s3361_s1 + $0x148] sm:$0xff]  ;;  %v1362_v3 = vld [vmem:[%s3361_s1 + $0xc0] sm:$0xff] }
 0x37e   : > { %v1394_v25 = vld [vmem:[%s3361_s1 + $0x1c0] sm:$0xff]  ;;  %1853 = vmatpush3.msra.mxu1 %v1379_v24  ;;  %1819 = vmatprep.subr.mxu0 %v1362_v3  ;;  %v1391_v37 = vld [vmem:[%s3361_s1 + $0x1a8] sm:$0xff] }
 0x37f   : > { %1262 = vst [vmem:[%s258_s8 + $0x18] sm:$0xff] %v1258_v5  ;;  %v2090_v4 = vpack.i.bf16 %v1258_v5, %v1257_v61  ;;  %1261 = vst [vmem:[%s258_s8 + $0x10] sm:$0xff] %v1257_v61  ;;  %v2085_v10 = vpack.i.bf16 %v1256_v0, %v1255_v47  ;;  %v1346_v39 = vld [vmem:[%s3361_s1 + $0x40] sm:$0xff]  ;;  %1854 = vmatprep.subr.mxu1 %v1394_v25 }
 0x380   : > { %1260 = vst [vmem:[%s258_s8 + $0x8] sm:$0xff] %v1256_v0  ;;  %1259 = vst [vmem:[%s258_s8] sm:$0xff] %v1255_v47  ;;  %1820 = vmatpush3.msra.mxu0 %v1346_v39  ;;  %1855 = vmatpush3.msra.mxu1 %v1378_v9 }
 0x381   : > { %2091 = vrot.lane.b32.xlu1 %v2090_v4, %s2144_s18  ;;  %2086 = vrot.lane.b32.xlu0 %v2085_v10, %s2144_s18  ;;  %v1342_v4 = vld [vmem:[%s3361_s1 + $0x20] sm:$0xff] }
 0x382   : > { %1821 = vmatprep.subr.mxu0 %v1361_v23  ;;  %1856 = vmatprep.subr.mxu1 %v1393_v54  ;;  %v1374_v10 = vld [vmem:[%s3361_s1 + $0x120] sm:$0xff] }
 0x383   : > { %1822 = vmatpush3.msra.mxu0 %v1345_v7  ;;  %1857 = vmatpush3.msra.mxu1 %v1377_v57 }
 0x384   : > { %1823 = vmatprep.subr.mxu0 %v1360_v55  ;;  %1858 = vmatprep.subr.mxu1 %v1392_v52 }
 0x385   : > { %1824 = vmatpush3.msra.mxu0 %v1344_v8  ;;  %1859 = vmatpush3.msra.mxu1 %v1376_v59 }
 0x386   : > { %1825 = vmatprep.subr.mxu0 %v1359_v19  ;;  %1860 = vmatprep.subr.mxu1 %v1391_v37 }
 0x3f3   : > { %v2092_v48 = vpop.permute.xlu1 %2091  ;;  %v2087_v34 = vpop.permute.xlu0 %2086 }
 0x3f4   : > { %v2094_v36 = vunpack.i.h.bf16 %v2092_v48  ;;  %v2093_v15 = vunpack.i.l.bf16 %v2092_v48  ;;  %v2089_v62 = vunpack.i.h.bf16 %v2087_v34  ;;  %v2088_v58 = vunpack.i.l.bf16 %v2087_v34  ;;  %v1357_v48 = vld [vmem:[%s3361_s1 + $0x98] sm:$0xff] }
 0x3f5   : > { %v1389_v34 = vld [vmem:[%s3361_s1 + $0x198] sm:$0xff] }
 0x3f6   : > { %v1277_v49 = vsel %vm3572_vm15, %v2093_v15, %v2094_v36  ;;  %v1276_v44 = vsel %vm3573_vm6, %v2089_v62, %v2093_v15  ;;  %v1275_v63 = vsel %vm3574_vm2, %v2088_v58, %v2089_v62  ;;  %v1283_v27 = vsel %vm3575_vm12, %v2094_v36, %v2088_v58  ;;  %v1341_v36 = vld [vmem:[%s3361_s1 + $0x18] sm:$0xff]  ;;  %v1356_v62 = vld [vmem:[%s3361_s1 + $0x90] sm:$0xff] }
 0x3f7   : > { %v3150_v11 = vmax.f32 %v1257_v61, %v1277_v49  ;;  %v3152_v56 = vmax.f32 %v1258_v5, %v1283_v27  ;;  %v3154_v42 = vmax.f32 %v1255_v47, %v1275_v63  ;;  %v3156_v2 = vmax.f32 %v1256_v0, %v1276_v44  ;;  %v1343_v61 = vld [vmem:[%s3361_s1 + $0x28] sm:$0xff]  ;;  %v1358_v47 = vld [vmem:[%s3361_s1 + $0xa0] sm:$0xff]  ;;  %v1373_v15 = vld [vmem:[%s3361_s1 + $0x118] sm:$0xff] }
 0x3f8   : > { %v1375_v5 = vld [vmem:[%s3361_s1 + $0x128] sm:$0xff]  ;;  %v1390_v0 = vld [vmem:[%s3361_s1 + $0x1a0] sm:$0xff]  ;;  %1826 = vmatpush3.msra.mxu0 %v1343_v61  ;;  %v1388_v58 = vld [vmem:[%s3361_s1 + $0x190] sm:$0xff] }
 0x3f9   : > { %v2100_v29 = vpack.i.bf16 %v3152_v56, %v3150_v11  ;;  %v2095_v12 = vpack.i.bf16 %v3156_v2, %v3154_v42  ;;  %1861 = vmatpush3.msra.mxu1 %v1375_v5  ;;  %1827 = vmatprep.subr.mxu0 %v1358_v47  ;;  %v1387_v49 = vld [vmem:[%s3361_s1 + $0x188] sm:$0xff] }
 0x3fa   : > { %1862 = vmatprep.subr.mxu1 %v1390_v0  ;;  %1828 = vmatpush3.msra.mxu0 %v1342_v4  ;;  %v1339_v27 = vld [vmem:[%s3361_s1 + $0x8] sm:$0xff] }
 0x3fb   : > { %2101 = vrot.lane.b32.xlu1 %v2100_v29, %s2143_s17  ;;  %2096 = vrot.lane.b32.xlu0 %v2095_v12, %s2143_s17  ;;  %v1386_v12 = vld [vmem:[%s3361_s1 + $0x180] sm:$0xff] }
 0x3fc   : > { %1863 = vmatpush3.msra.mxu1 %v1374_v10  ;;  %1829 = vmatprep.subr.mxu0 %v1357_v48 }
 0x3fd   : > { %1864 = vmatprep.subr.mxu1 %v1389_v34  ;;  %1830 = vmatpush3.msra.mxu0 %v1341_v36 }
 0x3fe   : > { %1865 = vmatpush3.msra.mxu1 %v1373_v15  ;;  %1831 = vmatprep.subr.mxu0 %v1356_v62 }
 0x3ff   : > { %1866 = vmatprep.subr.mxu1 %v1388_v58  ;;  %1832 = vmatpush3.msra.mxu0 %v1340_v35 }
 0x400   : > { %1867 = vmatpush3.msra.mxu1 %v1372_v41  ;;  %1833 = vmatprep.subr.mxu0 %v1355_v1 }
 0x401   : > { %1868 = vmatprep.subr.mxu1 %v1387_v49  ;;  %1834 = vmatpush3.msra.mxu0 %v1339_v27 }
 0x402   : > { %1869 = vmatpush3.msra.mxu1 %v1371_v26  ;;  %1835 = vmatprep.subr.mxu0 %v1354_v31 }
 0x403   : > { %1870 = vmatprep.subr.mxu1 %v1386_v12  ;;  %1836 = vmatpush3.msra.mxu0 %v1338_v17 }
 0x404   : > { %1871 = vmatpush3.msra.mxu1 %v1370_v28 }
 0x46d   : > { %v2102_v44 = vpop.permute.xlu1 %2101  ;;  %v2097_v63 = vpop.permute.xlu0 %2096 }
 0x46e   : > { %v2104_v60 = vunpack.i.h.bf16 %v2102_v44  ;;  %v2103_v22 = vunpack.i.l.bf16 %v2102_v44  ;;  %v2099_v30 = vunpack.i.h.bf16 %v2097_v63  ;;  %v2098_v29 = vunpack.i.l.bf16 %v2097_v63 }
 0x470   : > { %v1302_v18 = vsel %vm3576_vm13, %v2103_v22, %v2104_v60  ;;  %v1301_v16 = vsel %vm3577_vm5, %v2099_v30, %v2103_v22  ;;  %v1300_v38 = vsel %vm3578_vm14, %v2098_v29, %v2099_v30  ;;  %v1308_v45 = vsel %vm3579_vm4, %v2104_v60, %v2098_v29 }
 0x471   : > { %v1311_v33 = vmax.f32 %v3150_v11, %v1302_v18  ;;  %v1312_v40 = vmax.f32 %v3152_v56, %v1308_v45  ;;  %v1309_v13 = vmax.f32 %v3154_v42, %v1300_v38  ;;  %v1310_v43 = vmax.f32 %v3156_v2, %v1301_v16 }
 0x473   : > { %v2110_v14 = vpack.i.bf16 %v1312_v40, %v1311_v33  ;;  %v2105_v46 = vpack.i.bf16 %v1310_v43, %v1309_v13 }
 0x475   : > { %2111 = vrot.lane.b32.xlu1 %v2110_v14, %s2137_s11  ;;  %2106 = vrot.lane.b32.xlu0 %v2105_v46, %s2137_s11  ;;  %s1638_s11 = sshll.u32 %s3586_s22, 3 }
 0x476   : > { %s262_s15 = scalar_lea.vmem %s3366_s6, %s1638_s11 }
 0x4e7   : > { %v2112_v20 = vpop.permute.xlu1 %2111  ;;  %v2107_v21 = vpop.permute.xlu0 %2106 }
 0x4e8   : > { %v2114_v50 = vunpack.i.h.bf16 %v2112_v20  ;;  %v2113_v32 = vunpack.i.l.bf16 %v2112_v20  ;;  %v2109_v11 = vunpack.i.h.bf16 %v2107_v21  ;;  %v2108_v56 = vunpack.i.l.bf16 %v2107_v21 }
 0x4ea   : > { %v1327_v42 = vsel %vm3580_vm11, %v2113_v32, %v2114_v50  ;;  %v1325_v2 = vsel %vm3581_vm3, %v2108_v56, %v2109_v11  ;;  %v1326_v6 = vsel %vm3582_vm1, %v2109_v11, %v2113_v32  ;;  %v1333_v53 = vsel %vm3583_vm0, %v2114_v50, %v2108_v56 }
 0x4eb   : > { %v1336_v51 = vmax.f32 %v1311_v33, %v1327_v42  ;;  %v1334_v24 = vmax.f32 %v1309_v13, %v1325_v2  ;;  %v1335_v3 = vmax.f32 %v1310_v43, %v1326_v6  ;;  %v1337_v25 = vmax.f32 %v1312_v40, %v1333_v53 }
 0x4ed   : > { %1466 = vmatprep.mubr.f32.mxu0 %v1335_v3  ;;  %1536 = vmatprep.mubr.f32.mxu1 %v1337_v25 }
 0x4ee   : > { %1467 = vmatmul.mubr.f32.vlgmr.msra.gmra.mxu0 %v1334_v24  ;;  %1537 = vmatmul.mubr.f32.vlgmr.msra.gmra.mxu1 %v1336_v51 }
 0x5ae   : > { %v1837_v39 = vpop.f32.mrf.mxu0  ;;  %v1872_v9 = vpop.f32.mrf.mxu1 }
 0x5b0   : > { %v1838_v23 = vpop.f32.mrf.mxu0  ;;  %v1873_v54 = vpop.f32.mrf.mxu1 }
 0x5b1   : > { %v1839_v7 = vadd.f32 %v1838_v23, %v1837_v39  ;;  %v1874_v57 = vadd.f32 %v1873_v54, %v1872_v9 }
 0x5b3   : > { %v1539_v55 = vadd.f32 %v1874_v57, %v1839_v7 }
 0x5b5   : > { %1542 = vst.msk [vmem:[%s262_s15] sm:$0xff] %vm3584_vm7, %v1539_v55 }
 0x5b6 PF: > { %s17_s21 = sadd.s32 1, %s2126_s21  }
 0x5b7   : > { %p14_p4 = scmp.ge.s32.totalorder %s17_s21, 4  }
 0x5b9   :  { %16 = sbr.rel (!%p14_p4) target bundleno = 1 (0x1), region = 82 }

</bundles_post_ra>
